<compile_context>
chip_gen: v6e
topology: v6e:2x2x1
jax: 0.10.0
libtpu: 0.0.40
codegen_flags: <defaults>
</compile_context>

<pallas_src>
import jax
import jax.numpy as jnp
from jax.experimental import pallas as pl
from jax.experimental.pallas import tpu as pltpu

CLASS_NUMBER = 3
KSIZE = 11
PAD = (KSIZE - 1) // 2


def fused_cnn_kernel(x_ref, *args):
    # x_ref : (N, L, C0)  channels-last input
    # args  : w1, b1, ..., w5, b5, o_ref, act_ref
    #   wi      : (K, Cin_i, Cout_i)        bi : (1, Cout_i)
    #   o_ref   : (N, L, Cout_last)
    #   act_ref : (N * Lp, Cmax) f32 VMEM scratch, Lp = L + 2*pad
    act_ref = args[-1]
    o_ref = args[-2]
    wb = args[:-2]
    n_layers = len(wb) // 2

    N, L, C0 = x_ref.shape
    K = wb[0].shape[0]
    pad = (K - 1) // 2
    Lp = L + 2 * pad
    # Rows of the batch-flattened matmul; rows whose window straddles two batch
    # slabs are computed and simply discarded.
    M = (N - 1) * Lp + L

    # One-time zero init: pad rows stay zero for every layer, which implements
    # Conv1d's zero "same" padding for free across all 5 layers.
    act_ref[...] = jnp.zeros_like(act_ref)
    for n in range(N):  # N is tiny and static
        act_ref[n * Lp + pad:n * Lp + pad + L, :C0] = x_ref[n]

    for li in range(n_layers):
        w_ref = wb[2 * li]        # (K, cin, cout)
        b_ref = wb[2 * li + 1]    # (1, cout)
        cin, cout = w_ref.shape[1], w_ref.shape[2]

        xs = act_ref[...]         # load the whole padded slab once per layer
        # bias folded into the accumulator init (no separate add)
        acc = jnp.broadcast_to(b_ref[...], (M, cout))
        for k in range(K):        # K shifted taps -> K batch-wide MXU matmuls
            acc = acc + jnp.dot(
                xs[k:k + M, :cin], w_ref[k],
                preferred_element_type=jnp.float32)
        y = jnp.maximum(acc, 0.0)  # fused ReLU

        if li < n_layers - 1:
            # write this layer's output back into the data rows of the slab
            for n in range(N):
                act_ref[n * Lp + pad:n * Lp + pad + L, :cout] = (
                    y[n * Lp:n * Lp + L, :])
        else:
            for n in range(N):
                o_ref[n] = y[n * Lp:n * Lp + L, :].astype(o_ref.dtype)


def cnn_forward_fused(x_nlc, params):
    """x_nlc: (N, L, 45) f32; params: list of (w=(K,Cin,Cout), b=(Cout,))."""
    N, L, _ = x_nlc.shape
    Lp = L + 2 * PAD
    cmax = max(w.shape[1] for w, _ in params)     # = 45
    cout_last = params[-1][0].shape[2]

    flat = [x_nlc]
    for w, b in params:
        flat.append(w)
        flat.append(b.reshape(1, -1))

    return pl.pallas_call(
        fused_cnn_kernel,
        out_shape=jax.ShapeDtypeStruct((N, L, cout_last), x_nlc.dtype),
        in_specs=[pl.BlockSpec(memory_space=pltpu.MemorySpace.VMEM)] * len(flat),
        out_specs=pl.BlockSpec(memory_space=pltpu.MemorySpace.VMEM),
        scratch_shapes=[pltpu.VMEM((N * Lp, cmax), jnp.float32)],
    )(*flat)


def init_conv_params(key, cin, cout, k):
    """PyTorch Conv1d default init: U(-sqrt(1/(cin*k)), sqrt(1/(cin*k)))."""
    kw, kb = jax.random.split(key)
    bound = 1.0 / jnp.sqrt(cin * k)
    # stored directly in kernel layout (K, Cin, Cout) == torch (Cout, Cin, K) transposed
    w = jax.random.uniform(kw, (k, cin, cout), jnp.float32, -bound, bound)
    b = jax.random.uniform(kb, (cout,), jnp.float32, -bound, bound)
    return w, b


def make_params(key):
    layer_dims = [(45, 16), (16, 10), (10, 10), (10, 10), (10, CLASS_NUMBER)]
    keys = jax.random.split(key, len(layer_dims))
    return [init_conv_params(kk, cin, cout, KSIZE)
            for kk, (cin, cout) in zip(keys, layer_dims)]


@jax.jit
def cnn_model_forward(x_ncl, params):
    """x_ncl: (N, 45, L) like the PyTorch module; returns (N, 3, L)."""
    x = jnp.transpose(x_ncl, (0, 2, 1))   # NCL -> NLC (tiny boundary transpose)
    y = cnn_forward_fused(x, params)      # all 5 conv+ReLU layers in one kernel
    return jnp.transpose(y, (0, 2, 1))    # NLC -> NCL


def cnn_reference(x_ncl, params):
    """Pure-JAX reference: same math as torch Conv1d + ReLU with 'same' padding."""
    x = jnp.transpose(x_ncl, (0, 2, 1))
    for w, b in params:
        k = w.shape[0]
        pad = (k - 1) // 2
        L = x.shape[1]
        xp = jnp.pad(x, ((0, 0), (pad, pad), (0, 0)))
        y = b
        for kk in range(k):
            y = y + jnp.einsum('nlc,co->nlo', xp[:, kk:kk + L, :], w[kk])
        x = jnp.maximum(y, 0.0)
    return jnp.transpose(x, (0, 2, 1))


if __name__ == "__main__":
    key = jax.random.PRNGKey(0)
    kx, kp = jax.random.split(key)

    N, C_IN, L = 2, 45, 16
    x = jax.random.normal(kx, (N, C_IN, L), jnp.float32)
    params = make_params(kp)

    out = jax.block_until_ready(cnn_model_forward(x, params))
    ref = jax.block_until_ready(cnn_reference(x, params))

    assert out.shape == (N, CLASS_NUMBER, L), out.shape
    assert bool(jnp.all(out >= 0.0))                        # final ReLU
    assert bool(jnp.allclose(out, ref, atol=1e-4, rtol=1e-4)), (
        float(jnp.max(jnp.abs(out - ref))))
    print("KERNEL_OK")
</pallas_src>

<mosaic_0001>
module attributes {stable_mosaic.version = 11 : i64} {
  func.func @fused_cnn_kernel(%arg0: memref<2x16x45xf32, #tpu.memory_space<vmem>>, %arg1: memref<11x45x16xf32, #tpu.memory_space<vmem>>, %arg2: memref<1x16xf32, #tpu.memory_space<vmem>>, %arg3: memref<11x16x10xf32, #tpu.memory_space<vmem>>, %arg4: memref<1x10xf32, #tpu.memory_space<vmem>>, %arg5: memref<11x10x10xf32, #tpu.memory_space<vmem>>, %arg6: memref<1x10xf32, #tpu.memory_space<vmem>>, %arg7: memref<11x10x10xf32, #tpu.memory_space<vmem>>, %arg8: memref<1x10xf32, #tpu.memory_space<vmem>>, %arg9: memref<11x10x3xf32, #tpu.memory_space<vmem>>, %arg10: memref<1x3xf32, #tpu.memory_space<vmem>>, %arg11: memref<2x16x3xf32, #tpu.memory_space<vmem>>, %arg12: memref<52x45xf32, #tpu.memory_space<vmem>>) attributes {dimension_semantics = [], scalar_prefetch = 0 : i64, scratch_operands = 1 : i64, tpu.core_type = #tpu.core_type<tc>} {
    %cst = arith.constant 0.000000e+00 : f32
    %0 = vector.broadcast %cst : f32 to vector<52x45xf32>
    %c0 = arith.constant 0 : index
    %c0_0 = arith.constant 0 : index
    %1 = vector.load %arg12[%c0, %c0_0] : memref<52x45xf32, #tpu.memory_space<vmem>>, vector<52x45xf32>
    tpu.vector_store %arg12[%c0, %c0_0], %0 {strides = array<i32>} : memref<52x45xf32, #tpu.memory_space<vmem>>, vector<52x45xf32>,
    %c0_1 = arith.constant 0 : index
    %c0_2 = arith.constant 0 : index
    %c0_3 = arith.constant 0 : index
    %2 = vector.load %arg0[%c0_1, %c0_2, %c0_3] : memref<2x16x45xf32, #tpu.memory_space<vmem>>, vector<1x16x45xf32>
    %3 = vector.shape_cast %2 : vector<1x16x45xf32> to vector<16x45xf32>
    %c5 = arith.constant 5 : index
    %c0_4 = arith.constant 0 : index
    %4 = vector.load %arg12[%c5, %c0_4] : memref<52x45xf32, #tpu.memory_space<vmem>>, vector<16x45xf32>
    tpu.vector_store %arg12[%c5, %c0_4], %3 {strides = array<i32>} : memref<52x45xf32, #tpu.memory_space<vmem>>, vector<16x45xf32>,
    %c1 = arith.constant 1 : index
    %c0_5 = arith.constant 0 : index
    %c0_6 = arith.constant 0 : index
    %5 = vector.load %arg0[%c1, %c0_5, %c0_6] : memref<2x16x45xf32, #tpu.memory_space<vmem>>, vector<1x16x45xf32>
    %6 = vector.shape_cast %5 : vector<1x16x45xf32> to vector<16x45xf32>
    %c31 = arith.constant 31 : index
    %c0_7 = arith.constant 0 : index
    %7 = vector.load %arg12[%c31, %c0_7] : memref<52x45xf32, #tpu.memory_space<vmem>>, vector<16x45xf32>
    tpu.vector_store %arg12[%c31, %c0_7], %6 {strides = array<i32>} : memref<52x45xf32, #tpu.memory_space<vmem>>, vector<16x45xf32>,
    %c0_8 = arith.constant 0 : index
    %c0_9 = arith.constant 0 : index
    %8 = vector.load %arg12[%c0_8, %c0_9] : memref<52x45xf32, #tpu.memory_space<vmem>>, vector<52x45xf32>
    %c0_10 = arith.constant 0 : index
    %c0_11 = arith.constant 0 : index
    %9 = vector.load %arg2[%c0_10, %c0_11] : memref<1x16xf32, #tpu.memory_space<vmem>>, vector<1x16xf32>
    %10 = vector.shape_cast %9 : vector<1x16xf32> to vector<1x16xf32>
    %11 = vector.broadcast %10 : vector<1x16xf32> to vector<42x16xf32>
    %12 = vector.extract_strided_slice %8 {offsets = [0, 0], sizes = [42, 45], strides = [1, 1]} : vector<52x45xf32> to vector<42x45xf32>
    %c0_12 = arith.constant 0 : index
    %c0_13 = arith.constant 0 : index
    %c0_14 = arith.constant 0 : index
    %13 = vector.load %arg1[%c0_12, %c0_13, %c0_14] : memref<11x45x16xf32, #tpu.memory_space<vmem>>, vector<1x45x16xf32>
    %14 = vector.shape_cast %13 : vector<1x45x16xf32> to vector<45x16xf32>
    %cst_15 = arith.constant dense<0.000000e+00> : vector<42x16xf32>
    %15 = tpu.matmul %12, %14, %cst_15 {dimension_numbers = #tpu.dot_dimension_numbers<[1], [0], [0], [1], [0, 0, 1, 1], [], []>} : vector<42x45xf32>, vector<45x16xf32>, vector<42x16xf32> -> vector<42x16xf32>
    %16 = arith.addf %11, %15 : vector<42x16xf32>
    %17 = vector.extract_strided_slice %8 {offsets = [1, 0], sizes = [42, 45], strides = [1, 1]} : vector<52x45xf32> to vector<42x45xf32>
    %c1_16 = arith.constant 1 : index
    %c0_17 = arith.constant 0 : index
    %c0_18 = arith.constant 0 : index
    %18 = vector.load %arg1[%c1_16, %c0_17, %c0_18] : memref<11x45x16xf32, #tpu.memory_space<vmem>>, vector<1x45x16xf32>
    %19 = vector.shape_cast %18 : vector<1x45x16xf32> to vector<45x16xf32>
    %cst_19 = arith.constant dense<0.000000e+00> : vector<42x16xf32>
    %20 = tpu.matmul %17, %19, %cst_19 {dimension_numbers = #tpu.dot_dimension_numbers<[1], [0], [0], [1], [0, 0, 1, 1], [], []>} : vector<42x45xf32>, vector<45x16xf32>, vector<42x16xf32> -> vector<42x16xf32>
    %21 = arith.addf %16, %20 : vector<42x16xf32>
    %22 = vector.extract_strided_slice %8 {offsets = [2, 0], sizes = [42, 45], strides = [1, 1]} : vector<52x45xf32> to vector<42x45xf32>
    %c2 = arith.constant 2 : index
    %c0_20 = arith.constant 0 : index
    %c0_21 = arith.constant 0 : index
    %23 = vector.load %arg1[%c2, %c0_20, %c0_21] : memref<11x45x16xf32, #tpu.memory_space<vmem>>, vector<1x45x16xf32>
    %24 = vector.shape_cast %23 : vector<1x45x16xf32> to vector<45x16xf32>
    %cst_22 = arith.constant dense<0.000000e+00> : vector<42x16xf32>
    %25 = tpu.matmul %22, %24, %cst_22 {dimension_numbers = #tpu.dot_dimension_numbers<[1], [0], [0], [1], [0, 0, 1, 1], [], []>} : vector<42x45xf32>, vector<45x16xf32>, vector<42x16xf32> -> vector<42x16xf32>
    %26 = arith.addf %21, %25 : vector<42x16xf32>
    %27 = vector.extract_strided_slice %8 {offsets = [3, 0], sizes = [42, 45], strides = [1, 1]} : vector<52x45xf32> to vector<42x45xf32>
    %c3 = arith.constant 3 : index
    %c0_23 = arith.constant 0 : index
    %c0_24 = arith.constant 0 : index
    %28 = vector.load %arg1[%c3, %c0_23, %c0_24] : memref<11x45x16xf32, #tpu.memory_space<vmem>>, vector<1x45x16xf32>
    %29 = vector.shape_cast %28 : vector<1x45x16xf32> to vector<45x16xf32>
    %cst_25 = arith.constant dense<0.000000e+00> : vector<42x16xf32>
    %30 = tpu.matmul %27, %29, %cst_25 {dimension_numbers = #tpu.dot_dimension_numbers<[1], [0], [0], [1], [0, 0, 1, 1], [], []>} : vector<42x45xf32>, vector<45x16xf32>, vector<42x16xf32> -> vector<42x16xf32>
    %31 = arith.addf %26, %30 : vector<42x16xf32>
    %32 = vector.extract_strided_slice %8 {offsets = [4, 0], sizes = [42, 45], strides = [1, 1]} : vector<52x45xf32> to vector<42x45xf32>
    %c4 = arith.constant 4 : index
    %c0_26 = arith.constant 0 : index
    %c0_27 = arith.constant 0 : index
    %33 = vector.load %arg1[%c4, %c0_26, %c0_27] : memref<11x45x16xf32, #tpu.memory_space<vmem>>, vector<1x45x16xf32>
    %34 = vector.shape_cast %33 : vector<1x45x16xf32> to vector<45x16xf32>
    %cst_28 = arith.constant dense<0.000000e+00> : vector<42x16xf32>
    %35 = tpu.matmul %32, %34, %cst_28 {dimension_numbers = #tpu.dot_dimension_numbers<[1], [0], [0], [1], [0, 0, 1, 1], [], []>} : vector<42x45xf32>, vector<45x16xf32>, vector<42x16xf32> -> vector<42x16xf32>
    %36 = arith.addf %31, %35 : vector<42x16xf32>
    %37 = vector.extract_strided_slice %8 {offsets = [5, 0], sizes = [42, 45], strides = [1, 1]} : vector<52x45xf32> to vector<42x45xf32>
    %c5_29 = arith.constant 5 : index
    %c0_30 = arith.constant 0 : index
    %c0_31 = arith.constant 0 : index
    %38 = vector.load %arg1[%c5_29, %c0_30, %c0_31] : memref<11x45x16xf32, #tpu.memory_space<vmem>>, vector<1x45x16xf32>
    %39 = vector.shape_cast %38 : vector<1x45x16xf32> to vector<45x16xf32>
    %cst_32 = arith.constant dense<0.000000e+00> : vector<42x16xf32>
    %40 = tpu.matmul %37, %39, %cst_32 {dimension_numbers = #tpu.dot_dimension_numbers<[1], [0], [0], [1], [0, 0, 1, 1], [], []>} : vector<42x45xf32>, vector<45x16xf32>, vector<42x16xf32> -> vector<42x16xf32>
    %41 = arith.addf %36, %40 : vector<42x16xf32>
    %42 = vector.extract_strided_slice %8 {offsets = [6, 0], sizes = [42, 45], strides = [1, 1]} : vector<52x45xf32> to vector<42x45xf32>
    %c6 = arith.constant 6 : index
    %c0_33 = arith.constant 0 : index
    %c0_34 = arith.constant 0 : index
    %43 = vector.load %arg1[%c6, %c0_33, %c0_34] : memref<11x45x16xf32, #tpu.memory_space<vmem>>, vector<1x45x16xf32>
    %44 = vector.shape_cast %43 : vector<1x45x16xf32> to vector<45x16xf32>
    %cst_35 = arith.constant dense<0.000000e+00> : vector<42x16xf32>
    %45 = tpu.matmul %42, %44, %cst_35 {dimension_numbers = #tpu.dot_dimension_numbers<[1], [0], [0], [1], [0, 0, 1, 1], [], []>} : vector<42x45xf32>, vector<45x16xf32>, vector<42x16xf32> -> vector<42x16xf32>
    %46 = arith.addf %41, %45 : vector<42x16xf32>
    %47 = vector.extract_strided_slice %8 {offsets = [7, 0], sizes = [42, 45], strides = [1, 1]} : vector<52x45xf32> to vector<42x45xf32>
    %c7 = arith.constant 7 : index
    %c0_36 = arith.constant 0 : index
    %c0_37 = arith.constant 0 : index
    %48 = vector.load %arg1[%c7, %c0_36, %c0_37] : memref<11x45x16xf32, #tpu.memory_space<vmem>>, vector<1x45x16xf32>
    %49 = vector.shape_cast %48 : vector<1x45x16xf32> to vector<45x16xf32>
    %cst_38 = arith.constant dense<0.000000e+00> : vector<42x16xf32>
    %50 = tpu.matmul %47, %49, %cst_38 {dimension_numbers = #tpu.dot_dimension_numbers<[1], [0], [0], [1], [0, 0, 1, 1], [], []>} : vector<42x45xf32>, vector<45x16xf32>, vector<42x16xf32> -> vector<42x16xf32>
    %51 = arith.addf %46, %50 : vector<42x16xf32>
    %52 = vector.extract_strided_slice %8 {offsets = [8, 0], sizes = [42, 45], strides = [1, 1]} : vector<52x45xf32> to vector<42x45xf32>
    %c8 = arith.constant 8 : index
    %c0_39 = arith.constant 0 : index
    %c0_40 = arith.constant 0 : index
    %53 = vector.load %arg1[%c8, %c0_39, %c0_40] : memref<11x45x16xf32, #tpu.memory_space<vmem>>, vector<1x45x16xf32>
    %54 = vector.shape_cast %53 : vector<1x45x16xf32> to vector<45x16xf32>
    %cst_41 = arith.constant dense<0.000000e+00> : vector<42x16xf32>
    %55 = tpu.matmul %52, %54, %cst_41 {dimension_numbers = #tpu.dot_dimension_numbers<[1], [0], [0], [1], [0, 0, 1, 1], [], []>} : vector<42x45xf32>, vector<45x16xf32>, vector<42x16xf32> -> vector<42x16xf32>
    %56 = arith.addf %51, %55 : vector<42x16xf32>
    %57 = vector.extract_strided_slice %8 {offsets = [9, 0], sizes = [42, 45], strides = [1, 1]} : vector<52x45xf32> to vector<42x45xf32>
    %c9 = arith.constant 9 : index
    %c0_42 = arith.constant 0 : index
    %c0_43 = arith.constant 0 : index
    %58 = vector.load %arg1[%c9, %c0_42, %c0_43] : memref<11x45x16xf32, #tpu.memory_space<vmem>>, vector<1x45x16xf32>
    %59 = vector.shape_cast %58 : vector<1x45x16xf32> to vector<45x16xf32>
    %cst_44 = arith.constant dense<0.000000e+00> : vector<42x16xf32>
    %60 = tpu.matmul %57, %59, %cst_44 {dimension_numbers = #tpu.dot_dimension_numbers<[1], [0], [0], [1], [0, 0, 1, 1], [], []>} : vector<42x45xf32>, vector<45x16xf32>, vector<42x16xf32> -> vector<42x16xf32>
    %61 = arith.addf %56, %60 : vector<42x16xf32>
    %62 = vector.extract_strided_slice %8 {offsets = [10, 0], sizes = [42, 45], strides = [1, 1]} : vector<52x45xf32> to vector<42x45xf32>
    %c10 = arith.constant 10 : index
    %c0_45 = arith.constant 0 : index
    %c0_46 = arith.constant 0 : index
    %63 = vector.load %arg1[%c10, %c0_45, %c0_46] : memref<11x45x16xf32, #tpu.memory_space<vmem>>, vector<1x45x16xf32>
    %64 = vector.shape_cast %63 : vector<1x45x16xf32> to vector<45x16xf32>
    %cst_47 = arith.constant dense<0.000000e+00> : vector<42x16xf32>
    %65 = tpu.matmul %62, %64, %cst_47 {dimension_numbers = #tpu.dot_dimension_numbers<[1], [0], [0], [1], [0, 0, 1, 1], [], []>} : vector<42x45xf32>, vector<45x16xf32>, vector<42x16xf32> -> vector<42x16xf32>
    %66 = arith.addf %61, %65 : vector<42x16xf32>
    %cst_48 = arith.constant 0.000000e+00 : f32
    %67 = vector.broadcast %cst_48 : f32 to vector<42x16xf32>
    %68 = arith.maximumf %66, %67 : vector<42x16xf32>
    %69 = vector.extract_strided_slice %68 {offsets = [0, 0], sizes = [16, 16], strides = [1, 1]} : vector<42x16xf32> to vector<16x16xf32>
    %c5_49 = arith.constant 5 : index
    %c0_50 = arith.constant 0 : index
    %70 = vector.load %arg12[%c5_49, %c0_50] : memref<52x45xf32, #tpu.memory_space<vmem>>, vector<16x16xf32>
    tpu.vector_store %arg12[%c5_49, %c0_50], %69 {strides = array<i32>} : memref<52x45xf32, #tpu.memory_space<vmem>>, vector<16x16xf32>,
    %71 = vector.extract_strided_slice %68 {offsets = [26, 0], sizes = [16, 16], strides = [1, 1]} : vector<42x16xf32> to vector<16x16xf32>
    %c31_51 = arith.constant 31 : index
    %c0_52 = arith.constant 0 : index
    %72 = vector.load %arg12[%c31_51, %c0_52] : memref<52x45xf32, #tpu.memory_space<vmem>>, vector<16x16xf32>
    tpu.vector_store %arg12[%c31_51, %c0_52], %71 {strides = array<i32>} : memref<52x45xf32, #tpu.memory_space<vmem>>, vector<16x16xf32>,
    %c0_53 = arith.constant 0 : index
    %c0_54 = arith.constant 0 : index
    %73 = vector.load %arg12[%c0_53, %c0_54] : memref<52x45xf32, #tpu.memory_space<vmem>>, vector<52x45xf32>
    %c0_55 = arith.constant 0 : index
    %c0_56 = arith.constant 0 : index
    %74 = vector.load %arg4[%c0_55, %c0_56] : memref<1x10xf32, #tpu.memory_space<vmem>>, vector<1x10xf32>
    %75 = vector.shape_cast %74 : vector<1x10xf32> to vector<1x10xf32>
    %76 = vector.broadcast %75 : vector<1x10xf32> to vector<42x10xf32>
    %77 = vector.extract_strided_slice %73 {offsets = [0, 0], sizes = [42, 16], strides = [1, 1]} : vector<52x45xf32> to vector<42x16xf32>
    %c0_57 = arith.constant 0 : index
    %c0_58 = arith.constant 0 : index
    %c0_59 = arith.constant 0 : index
    %78 = vector.load %arg3[%c0_57, %c0_58, %c0_59] : memref<11x16x10xf32, #tpu.memory_space<vmem>>, vector<1x16x10xf32>
    %79 = vector.shape_cast %78 : vector<1x16x10xf32> to vector<16x10xf32>
    %cst_60 = arith.constant dense<0.000000e+00> : vector<42x10xf32>
    %80 = tpu.matmul %77, %79, %cst_60 {dimension_numbers = #tpu.dot_dimension_numbers<[1], [0], [0], [1], [0, 0, 1, 1], [], []>} : vector<42x16xf32>, vector<16x10xf32>, vector<42x10xf32> -> vector<42x10xf32>
    %81 = arith.addf %76, %80 : vector<42x10xf32>
    %82 = vector.extract_strided_slice %73 {offsets = [1, 0], sizes = [42, 16], strides = [1, 1]} : vector<52x45xf32> to vector<42x16xf32>
    %c1_61 = arith.constant 1 : index
    %c0_62 = arith.constant 0 : index
    %c0_63 = arith.constant 0 : index
    %83 = vector.load %arg3[%c1_61, %c0_62, %c0_63] : memref<11x16x10xf32, #tpu.memory_space<vmem>>, vector<1x16x10xf32>
    %84 = vector.shape_cast %83 : vector<1x16x10xf32> to vector<16x10xf32>
    %cst_64 = arith.constant dense<0.000000e+00> : vector<42x10xf32>
    %85 = tpu.matmul %82, %84, %cst_64 {dimension_numbers = #tpu.dot_dimension_numbers<[1], [0], [0], [1], [0, 0, 1, 1], [], []>} : vector<42x16xf32>, vector<16x10xf32>, vector<42x10xf32> -> vector<42x10xf32>
    %86 = arith.addf %81, %85 : vector<42x10xf32>
    %87 = vector.extract_strided_slice %73 {offsets = [2, 0], sizes = [42, 16], strides = [1, 1]} : vector<52x45xf32> to vector<42x16xf32>
    %c2_65 = arith.constant 2 : index
    %c0_66 = arith.constant 0 : index
    %c0_67 = arith.constant 0 : index
    %88 = vector.load %arg3[%c2_65, %c0_66, %c0_67] : memref<11x16x10xf32, #tpu.memory_space<vmem>>, vector<1x16x10xf32>
    %89 = vector.shape_cast %88 : vector<1x16x10xf32> to vector<16x10xf32>
    %cst_68 = arith.constant dense<0.000000e+00> : vector<42x10xf32>
    %90 = tpu.matmul %87, %89, %cst_68 {dimension_numbers = #tpu.dot_dimension_numbers<[1], [0], [0], [1], [0, 0, 1, 1], [], []>} : vector<42x16xf32>, vector<16x10xf32>, vector<42x10xf32> -> vector<42x10xf32>
    %91 = arith.addf %86, %90 : vector<42x10xf32>
    %92 = vector.extract_strided_slice %73 {offsets = [3, 0], sizes = [42, 16], strides = [1, 1]} : vector<52x45xf32> to vector<42x16xf32>
    %c3_69 = arith.constant 3 : index
    %c0_70 = arith.constant 0 : index
    %c0_71 = arith.constant 0 : index
    %93 = vector.load %arg3[%c3_69, %c0_70, %c0_71] : memref<11x16x10xf32, #tpu.memory_space<vmem>>, vector<1x16x10xf32>
    %94 = vector.shape_cast %93 : vector<1x16x10xf32> to vector<16x10xf32>
    %cst_72 = arith.constant dense<0.000000e+00> : vector<42x10xf32>
    %95 = tpu.matmul %92, %94, %cst_72 {dimension_numbers = #tpu.dot_dimension_numbers<[1], [0], [0], [1], [0, 0, 1, 1], [], []>} : vector<42x16xf32>, vector<16x10xf32>, vector<42x10xf32> -> vector<42x10xf32>
    %96 = arith.addf %91, %95 : vector<42x10xf32>
    %97 = vector.extract_strided_slice %73 {offsets = [4, 0], sizes = [42, 16], strides = [1, 1]} : vector<52x45xf32> to vector<42x16xf32>
    %c4_73 = arith.constant 4 : index
    %c0_74 = arith.constant 0 : index
    %c0_75 = arith.constant 0 : index
    %98 = vector.load %arg3[%c4_73, %c0_74, %c0_75] : memref<11x16x10xf32, #tpu.memory_space<vmem>>, vector<1x16x10xf32>
    %99 = vector.shape_cast %98 : vector<1x16x10xf32> to vector<16x10xf32>
    %cst_76 = arith.constant dense<0.000000e+00> : vector<42x10xf32>
    %100 = tpu.matmul %97, %99, %cst_76 {dimension_numbers = #tpu.dot_dimension_numbers<[1], [0], [0], [1], [0, 0, 1, 1], [], []>} : vector<42x16xf32>, vector<16x10xf32>, vector<42x10xf32> -> vector<42x10xf32>
    %101 = arith.addf %96, %100 : vector<42x10xf32>
    %102 = vector.extract_strided_slice %73 {offsets = [5, 0], sizes = [42, 16], strides = [1, 1]} : vector<52x45xf32> to vector<42x16xf32>
    %c5_77 = arith.constant 5 : index
    %c0_78 = arith.constant 0 : index
    %c0_79 = arith.constant 0 : index
    %103 = vector.load %arg3[%c5_77, %c0_78, %c0_79] : memref<11x16x10xf32, #tpu.memory_space<vmem>>, vector<1x16x10xf32>
    %104 = vector.shape_cast %103 : vector<1x16x10xf32> to vector<16x10xf32>
    %cst_80 = arith.constant dense<0.000000e+00> : vector<42x10xf32>
    %105 = tpu.matmul %102, %104, %cst_80 {dimension_numbers = #tpu.dot_dimension_numbers<[1], [0], [0], [1], [0, 0, 1, 1], [], []>} : vector<42x16xf32>, vector<16x10xf32>, vector<42x10xf32> -> vector<42x10xf32>
    %106 = arith.addf %101, %105 : vector<42x10xf32>
    %107 = vector.extract_strided_slice %73 {offsets = [6, 0], sizes = [42, 16], strides = [1, 1]} : vector<52x45xf32> to vector<42x16xf32>
    %c6_81 = arith.constant 6 : index
    %c0_82 = arith.constant 0 : index
    %c0_83 = arith.constant 0 : index
    %108 = vector.load %arg3[%c6_81, %c0_82, %c0_83] : memref<11x16x10xf32, #tpu.memory_space<vmem>>, vector<1x16x10xf32>
    %109 = vector.shape_cast %108 : vector<1x16x10xf32> to vector<16x10xf32>
    %cst_84 = arith.constant dense<0.000000e+00> : vector<42x10xf32>
    %110 = tpu.matmul %107, %109, %cst_84 {dimension_numbers = #tpu.dot_dimension_numbers<[1], [0], [0], [1], [0, 0, 1, 1], [], []>} : vector<42x16xf32>, vector<16x10xf32>, vector<42x10xf32> -> vector<42x10xf32>
    %111 = arith.addf %106, %110 : vector<42x10xf32>
    %112 = vector.extract_strided_slice %73 {offsets = [7, 0], sizes = [42, 16], strides = [1, 1]} : vector<52x45xf32> to vector<42x16xf32>
    %c7_85 = arith.constant 7 : index
    %c0_86 = arith.constant 0 : index
    %c0_87 = arith.constant 0 : index
    %113 = vector.load %arg3[%c7_85, %c0_86, %c0_87] : memref<11x16x10xf32, #tpu.memory_space<vmem>>, vector<1x16x10xf32>
    %114 = vector.shape_cast %113 : vector<1x16x10xf32> to vector<16x10xf32>
    %cst_88 = arith.constant dense<0.000000e+00> : vector<42x10xf32>
    %115 = tpu.matmul %112, %114, %cst_88 {dimension_numbers = #tpu.dot_dimension_numbers<[1], [0], [0], [1], [0, 0, 1, 1], [], []>} : vector<42x16xf32>, vector<16x10xf32>, vector<42x10xf32> -> vector<42x10xf32>
    %116 = arith.addf %111, %115 : vector<42x10xf32>
    %117 = vector.extract_strided_slice %73 {offsets = [8, 0], sizes = [42, 16], strides = [1, 1]} : vector<52x45xf32> to vector<42x16xf32>
    %c8_89 = arith.constant 8 : index
    %c0_90 = arith.constant 0 : index
    %c0_91 = arith.constant 0 : index
    %118 = vector.load %arg3[%c8_89, %c0_90, %c0_91] : memref<11x16x10xf32, #tpu.memory_space<vmem>>, vector<1x16x10xf32>
    %119 = vector.shape_cast %118 : vector<1x16x10xf32> to vector<16x10xf32>
    %cst_92 = arith.constant dense<0.000000e+00> : vector<42x10xf32>
    %120 = tpu.matmul %117, %119, %cst_92 {dimension_numbers = #tpu.dot_dimension_numbers<[1], [0], [0], [1], [0, 0, 1, 1], [], []>} : vector<42x16xf32>, vector<16x10xf32>, vector<42x10xf32> -> vector<42x10xf32>
    %121 = arith.addf %116, %120 : vector<42x10xf32>
    %122 = vector.extract_strided_slice %73 {offsets = [9, 0], sizes = [42, 16], strides = [1, 1]} : vector<52x45xf32> to vector<42x16xf32>
    %c9_93 = arith.constant 9 : index
    %c0_94 = arith.constant 0 : index
    %c0_95 = arith.constant 0 : index
    %123 = vector.load %arg3[%c9_93, %c0_94, %c0_95] : memref<11x16x10xf32, #tpu.memory_space<vmem>>, vector<1x16x10xf32>
    %124 = vector.shape_cast %123 : vector<1x16x10xf32> to vector<16x10xf32>
    %cst_96 = arith.constant dense<0.000000e+00> : vector<42x10xf32>
    %125 = tpu.matmul %122, %124, %cst_96 {dimension_numbers = #tpu.dot_dimension_numbers<[1], [0], [0], [1], [0, 0, 1, 1], [], []>} : vector<42x16xf32>, vector<16x10xf32>, vector<42x10xf32> -> vector<42x10xf32>
    %126 = arith.addf %121, %125 : vector<42x10xf32>
    %127 = vector.extract_strided_slice %73 {offsets = [10, 0], sizes = [42, 16], strides = [1, 1]} : vector<52x45xf32> to vector<42x16xf32>
    %c10_97 = arith.constant 10 : index
    %c0_98 = arith.constant 0 : index
    %c0_99 = arith.constant 0 : index
    %128 = vector.load %arg3[%c10_97, %c0_98, %c0_99] : memref<11x16x10xf32, #tpu.memory_space<vmem>>, vector<1x16x10xf32>
    %129 = vector.shape_cast %128 : vector<1x16x10xf32> to vector<16x10xf32>
    %cst_100 = arith.constant dense<0.000000e+00> : vector<42x10xf32>
    %130 = tpu.matmul %127, %129, %cst_100 {dimension_numbers = #tpu.dot_dimension_numbers<[1], [0], [0], [1], [0, 0, 1, 1], [], []>} : vector<42x16xf32>, vector<16x10xf32>, vector<42x10xf32> -> vector<42x10xf32>
    %131 = arith.addf %126, %130 : vector<42x10xf32>
    %cst_101 = arith.constant 0.000000e+00 : f32
    %132 = vector.broadcast %cst_101 : f32 to vector<42x10xf32>
    %133 = arith.maximumf %131, %132 : vector<42x10xf32>
    %134 = vector.extract_strided_slice %133 {offsets = [0, 0], sizes = [16, 10], strides = [1, 1]} : vector<42x10xf32> to vector<16x10xf32>
    %c5_102 = arith.constant 5 : index
    %c0_103 = arith.constant 0 : index
    %135 = vector.load %arg12[%c5_102, %c0_103] : memref<52x45xf32, #tpu.memory_space<vmem>>, vector<16x10xf32>
    tpu.vector_store %arg12[%c5_102, %c0_103], %134 {strides = array<i32>} : memref<52x45xf32, #tpu.memory_space<vmem>>, vector<16x10xf32>,
    %136 = vector.extract_strided_slice %133 {offsets = [26, 0], sizes = [16, 10], strides = [1, 1]} : vector<42x10xf32> to vector<16x10xf32>
    %c31_104 = arith.constant 31 : index
    %c0_105 = arith.constant 0 : index
    %137 = vector.load %arg12[%c31_104, %c0_105] : memref<52x45xf32, #tpu.memory_space<vmem>>, vector<16x10xf32>
    tpu.vector_store %arg12[%c31_104, %c0_105], %136 {strides = array<i32>} : memref<52x45xf32, #tpu.memory_space<vmem>>, vector<16x10xf32>,
    %c0_106 = arith.constant 0 : index
    %c0_107 = arith.constant 0 : index
    %138 = vector.load %arg12[%c0_106, %c0_107] : memref<52x45xf32, #tpu.memory_space<vmem>>, vector<52x45xf32>
    %c0_108 = arith.constant 0 : index
    %c0_109 = arith.constant 0 : index
    %139 = vector.load %arg6[%c0_108, %c0_109] : memref<1x10xf32, #tpu.memory_space<vmem>>, vector<1x10xf32>
    %140 = vector.shape_cast %139 : vector<1x10xf32> to vector<1x10xf32>
    %141 = vector.broadcast %140 : vector<1x10xf32> to vector<42x10xf32>
    %142 = vector.extract_strided_slice %138 {offsets = [0, 0], sizes = [42, 10], strides = [1, 1]} : vector<52x45xf32> to vector<42x10xf32>
    %c0_110 = arith.constant 0 : index
    %c0_111 = arith.constant 0 : index
    %c0_112 = arith.constant 0 : index
    %143 = vector.load %arg5[%c0_110, %c0_111, %c0_112] : memref<11x10x10xf32, #tpu.memory_space<vmem>>, vector<1x10x10xf32>
    %144 = vector.shape_cast %143 : vector<1x10x10xf32> to vector<10x10xf32>
    %cst_113 = arith.constant dense<0.000000e+00> : vector<42x10xf32>
    %145 = tpu.matmul %142, %144, %cst_113 {dimension_numbers = #tpu.dot_dimension_numbers<[1], [0], [0], [1], [0, 0, 1, 1], [], []>} : vector<42x10xf32>, vector<10x10xf32>, vector<42x10xf32> -> vector<42x10xf32>
    %146 = arith.addf %141, %145 : vector<42x10xf32>
    %147 = vector.extract_strided_slice %138 {offsets = [1, 0], sizes = [42, 10], strides = [1, 1]} : vector<52x45xf32> to vector<42x10xf32>
    %c1_114 = arith.constant 1 : index
    %c0_115 = arith.constant 0 : index
    %c0_116 = arith.constant 0 : index
    %148 = vector.load %arg5[%c1_114, %c0_115, %c0_116] : memref<11x10x10xf32, #tpu.memory_space<vmem>>, vector<1x10x10xf32>
    %149 = vector.shape_cast %148 : vector<1x10x10xf32> to vector<10x10xf32>
    %cst_117 = arith.constant dense<0.000000e+00> : vector<42x10xf32>
    %150 = tpu.matmul %147, %149, %cst_117 {dimension_numbers = #tpu.dot_dimension_numbers<[1], [0], [0], [1], [0, 0, 1, 1], [], []>} : vector<42x10xf32>, vector<10x10xf32>, vector<42x10xf32> -> vector<42x10xf32>
    %151 = arith.addf %146, %150 : vector<42x10xf32>
    %152 = vector.extract_strided_slice %138 {offsets = [2, 0], sizes = [42, 10], strides = [1, 1]} : vector<52x45xf32> to vector<42x10xf32>
    %c2_118 = arith.constant 2 : index
    %c0_119 = arith.constant 0 : index
    %c0_120 = arith.constant 0 : index
    %153 = vector.load %arg5[%c2_118, %c0_119, %c0_120] : memref<11x10x10xf32, #tpu.memory_space<vmem>>, vector<1x10x10xf32>
    %154 = vector.shape_cast %153 : vector<1x10x10xf32> to vector<10x10xf32>
    %cst_121 = arith.constant dense<0.000000e+00> : vector<42x10xf32>
    %155 = tpu.matmul %152, %154, %cst_121 {dimension_numbers = #tpu.dot_dimension_numbers<[1], [0], [0], [1], [0, 0, 1, 1], [], []>} : vector<42x10xf32>, vector<10x10xf32>, vector<42x10xf32> -> vector<42x10xf32>
    %156 = arith.addf %151, %155 : vector<42x10xf32>
    %157 = vector.extract_strided_slice %138 {offsets = [3, 0], sizes = [42, 10], strides = [1, 1]} : vector<52x45xf32> to vector<42x10xf32>
    %c3_122 = arith.constant 3 : index
    %c0_123 = arith.constant 0 : index
    %c0_124 = arith.constant 0 : index
    %158 = vector.load %arg5[%c3_122, %c0_123, %c0_124] : memref<11x10x10xf32, #tpu.memory_space<vmem>>, vector<1x10x10xf32>
    %159 = vector.shape_cast %158 : vector<1x10x10xf32> to vector<10x10xf32>
    %cst_125 = arith.constant dense<0.000000e+00> : vector<42x10xf32>
    %160 = tpu.matmul %157, %159, %cst_125 {dimension_numbers = #tpu.dot_dimension_numbers<[1], [0], [0], [1], [0, 0, 1, 1], [], []>} : vector<42x10xf32>, vector<10x10xf32>, vector<42x10xf32> -> vector<42x10xf32>
    %161 = arith.addf %156, %160 : vector<42x10xf32>
    %162 = vector.extract_strided_slice %138 {offsets = [4, 0], sizes = [42, 10], strides = [1, 1]} : vector<52x45xf32> to vector<42x10xf32>
    %c4_126 = arith.constant 4 : index
    %c0_127 = arith.constant 0 : index
    %c0_128 = arith.constant 0 : index
    %163 = vector.load %arg5[%c4_126, %c0_127, %c0_128] : memref<11x10x10xf32, #tpu.memory_space<vmem>>, vector<1x10x10xf32>
    %164 = vector.shape_cast %163 : vector<1x10x10xf32> to vector<10x10xf32>
    %cst_129 = arith.constant dense<0.000000e+00> : vector<42x10xf32>
    %165 = tpu.matmul %162, %164, %cst_129 {dimension_numbers = #tpu.dot_dimension_numbers<[1], [0], [0], [1], [0, 0, 1, 1], [], []>} : vector<42x10xf32>, vector<10x10xf32>, vector<42x10xf32> -> vector<42x10xf32>
    %166 = arith.addf %161, %165 : vector<42x10xf32>
    %167 = vector.extract_strided_slice %138 {offsets = [5, 0], sizes = [42, 10], strides = [1, 1]} : vector<52x45xf32> to vector<42x10xf32>
    %c5_130 = arith.constant 5 : index
    %c0_131 = arith.constant 0 : index
    %c0_132 = arith.constant 0 : index
    %168 = vector.load %arg5[%c5_130, %c0_131, %c0_132] : memref<11x10x10xf32, #tpu.memory_space<vmem>>, vector<1x10x10xf32>
    %169 = vector.shape_cast %168 : vector<1x10x10xf32> to vector<10x10xf32>
    %cst_133 = arith.constant dense<0.000000e+00> : vector<42x10xf32>
    %170 = tpu.matmul %167, %169, %cst_133 {dimension_numbers = #tpu.dot_dimension_numbers<[1], [0], [0], [1], [0, 0, 1, 1], [], []>} : vector<42x10xf32>, vector<10x10xf32>, vector<42x10xf32> -> vector<42x10xf32>
    %171 = arith.addf %166, %170 : vector<42x10xf32>
    %172 = vector.extract_strided_slice %138 {offsets = [6, 0], sizes = [42, 10], strides = [1, 1]} : vector<52x45xf32> to vector<42x10xf32>
    %c6_134 = arith.constant 6 : index
    %c0_135 = arith.constant 0 : index
    %c0_136 = arith.constant 0 : index
    %173 = vector.load %arg5[%c6_134, %c0_135, %c0_136] : memref<11x10x10xf32, #tpu.memory_space<vmem>>, vector<1x10x10xf32>
    %174 = vector.shape_cast %173 : vector<1x10x10xf32> to vector<10x10xf32>
    %cst_137 = arith.constant dense<0.000000e+00> : vector<42x10xf32>
    %175 = tpu.matmul %172, %174, %cst_137 {dimension_numbers = #tpu.dot_dimension_numbers<[1], [0], [0], [1], [0, 0, 1, 1], [], []>} : vector<42x10xf32>, vector<10x10xf32>, vector<42x10xf32> -> vector<42x10xf32>
    %176 = arith.addf %171, %175 : vector<42x10xf32>
    %177 = vector.extract_strided_slice %138 {offsets = [7, 0], sizes = [42, 10], strides = [1, 1]} : vector<52x45xf32> to vector<42x10xf32>
    %c7_138 = arith.constant 7 : index
    %c0_139 = arith.constant 0 : index
    %c0_140 = arith.constant 0 : index
    %178 = vector.load %arg5[%c7_138, %c0_139, %c0_140] : memref<11x10x10xf32, #tpu.memory_space<vmem>>, vector<1x10x10xf32>
    %179 = vector.shape_cast %178 : vector<1x10x10xf32> to vector<10x10xf32>
    %cst_141 = arith.constant dense<0.000000e+00> : vector<42x10xf32>
    %180 = tpu.matmul %177, %179, %cst_141 {dimension_numbers = #tpu.dot_dimension_numbers<[1], [0], [0], [1], [0, 0, 1, 1], [], []>} : vector<42x10xf32>, vector<10x10xf32>, vector<42x10xf32> -> vector<42x10xf32>
    %181 = arith.addf %176, %180 : vector<42x10xf32>
    %182 = vector.extract_strided_slice %138 {offsets = [8, 0], sizes = [42, 10], strides = [1, 1]} : vector<52x45xf32> to vector<42x10xf32>
    %c8_142 = arith.constant 8 : index
    %c0_143 = arith.constant 0 : index
    %c0_144 = arith.constant 0 : index
    %183 = vector.load %arg5[%c8_142, %c0_143, %c0_144] : memref<11x10x10xf32, #tpu.memory_space<vmem>>, vector<1x10x10xf32>
    %184 = vector.shape_cast %183 : vector<1x10x10xf32> to vector<10x10xf32>
    %cst_145 = arith.constant dense<0.000000e+00> : vector<42x10xf32>
    %185 = tpu.matmul %182, %184, %cst_145 {dimension_numbers = #tpu.dot_dimension_numbers<[1], [0], [0], [1], [0, 0, 1, 1], [], []>} : vector<42x10xf32>, vector<10x10xf32>, vector<42x10xf32> -> vector<42x10xf32>
    %186 = arith.addf %181, %185 : vector<42x10xf32>
    %187 = vector.extract_strided_slice %138 {offsets = [9, 0], sizes = [42, 10], strides = [1, 1]} : vector<52x45xf32> to vector<42x10xf32>
    %c9_146 = arith.constant 9 : index
    %c0_147 = arith.constant 0 : index
    %c0_148 = arith.constant 0 : index
    %188 = vector.load %arg5[%c9_146, %c0_147, %c0_148] : memref<11x10x10xf32, #tpu.memory_space<vmem>>, vector<1x10x10xf32>
    %189 = vector.shape_cast %188 : vector<1x10x10xf32> to vector<10x10xf32>
    %cst_149 = arith.constant dense<0.000000e+00> : vector<42x10xf32>
    %190 = tpu.matmul %187, %189, %cst_149 {dimension_numbers = #tpu.dot_dimension_numbers<[1], [0], [0], [1], [0, 0, 1, 1], [], []>} : vector<42x10xf32>, vector<10x10xf32>, vector<42x10xf32> -> vector<42x10xf32>
    %191 = arith.addf %186, %190 : vector<42x10xf32>
    %192 = vector.extract_strided_slice %138 {offsets = [10, 0], sizes = [42, 10], strides = [1, 1]} : vector<52x45xf32> to vector<42x10xf32>
    %c10_150 = arith.constant 10 : index
    %c0_151 = arith.constant 0 : index
    %c0_152 = arith.constant 0 : index
    %193 = vector.load %arg5[%c10_150, %c0_151, %c0_152] : memref<11x10x10xf32, #tpu.memory_space<vmem>>, vector<1x10x10xf32>
    %194 = vector.shape_cast %193 : vector<1x10x10xf32> to vector<10x10xf32>
    %cst_153 = arith.constant dense<0.000000e+00> : vector<42x10xf32>
    %195 = tpu.matmul %192, %194, %cst_153 {dimension_numbers = #tpu.dot_dimension_numbers<[1], [0], [0], [1], [0, 0, 1, 1], [], []>} : vector<42x10xf32>, vector<10x10xf32>, vector<42x10xf32> -> vector<42x10xf32>
    %196 = arith.addf %191, %195 : vector<42x10xf32>
    %cst_154 = arith.constant 0.000000e+00 : f32
    %197 = vector.broadcast %cst_154 : f32 to vector<42x10xf32>
    %198 = arith.maximumf %196, %197 : vector<42x10xf32>
    %199 = vector.extract_strided_slice %198 {offsets = [0, 0], sizes = [16, 10], strides = [1, 1]} : vector<42x10xf32> to vector<16x10xf32>
    %c5_155 = arith.constant 5 : index
    %c0_156 = arith.constant 0 : index
    %200 = vector.load %arg12[%c5_155, %c0_156] : memref<52x45xf32, #tpu.memory_space<vmem>>, vector<16x10xf32>
    tpu.vector_store %arg12[%c5_155, %c0_156], %199 {strides = array<i32>} : memref<52x45xf32, #tpu.memory_space<vmem>>, vector<16x10xf32>,
    %201 = vector.extract_strided_slice %198 {offsets = [26, 0], sizes = [16, 10], strides = [1, 1]} : vector<42x10xf32> to vector<16x10xf32>
    %c31_157 = arith.constant 31 : index
    %c0_158 = arith.constant 0 : index
    %202 = vector.load %arg12[%c31_157, %c0_158] : memref<52x45xf32, #tpu.memory_space<vmem>>, vector<16x10xf32>
    tpu.vector_store %arg12[%c31_157, %c0_158], %201 {strides = array<i32>} : memref<52x45xf32, #tpu.memory_space<vmem>>, vector<16x10xf32>,
    %c0_159 = arith.constant 0 : index
    %c0_160 = arith.constant 0 : index
    %203 = vector.load %arg12[%c0_159, %c0_160] : memref<52x45xf32, #tpu.memory_space<vmem>>, vector<52x45xf32>
    %c0_161 = arith.constant 0 : index
    %c0_162 = arith.constant 0 : index
    %204 = vector.load %arg8[%c0_161, %c0_162] : memref<1x10xf32, #tpu.memory_space<vmem>>, vector<1x10xf32>
    %205 = vector.shape_cast %204 : vector<1x10xf32> to vector<1x10xf32>
    %206 = vector.broadcast %205 : vector<1x10xf32> to vector<42x10xf32>
    %207 = vector.extract_strided_slice %203 {offsets = [0, 0], sizes = [42, 10], strides = [1, 1]} : vector<52x45xf32> to vector<42x10xf32>
    %c0_163 = arith.constant 0 : index
    %c0_164 = arith.constant 0 : index
    %c0_165 = arith.constant 0 : index
    %208 = vector.load %arg7[%c0_163, %c0_164, %c0_165] : memref<11x10x10xf32, #tpu.memory_space<vmem>>, vector<1x10x10xf32>
    %209 = vector.shape_cast %208 : vector<1x10x10xf32> to vector<10x10xf32>
    %cst_166 = arith.constant dense<0.000000e+00> : vector<42x10xf32>
    %210 = tpu.matmul %207, %209, %cst_166 {dimension_numbers = #tpu.dot_dimension_numbers<[1], [0], [0], [1], [0, 0, 1, 1], [], []>} : vector<42x10xf32>, vector<10x10xf32>, vector<42x10xf32> -> vector<42x10xf32>
    %211 = arith.addf %206, %210 : vector<42x10xf32>
    %212 = vector.extract_strided_slice %203 {offsets = [1, 0], sizes = [42, 10], strides = [1, 1]} : vector<52x45xf32> to vector<42x10xf32>
    %c1_167 = arith.constant 1 : index
    %c0_168 = arith.constant 0 : index
    %c0_169 = arith.constant 0 : index
    %213 = vector.load %arg7[%c1_167, %c0_168, %c0_169] : memref<11x10x10xf32, #tpu.memory_space<vmem>>, vector<1x10x10xf32>
    %214 = vector.shape_cast %213 : vector<1x10x10xf32> to vector<10x10xf32>
    %cst_170 = arith.constant dense<0.000000e+00> : vector<42x10xf32>
    %215 = tpu.matmul %212, %214, %cst_170 {dimension_numbers = #tpu.dot_dimension_numbers<[1], [0], [0], [1], [0, 0, 1, 1], [], []>} : vector<42x10xf32>, vector<10x10xf32>, vector<42x10xf32> -> vector<42x10xf32>
    %216 = arith.addf %211, %215 : vector<42x10xf32>
    %217 = vector.extract_strided_slice %203 {offsets = [2, 0], sizes = [42, 10], strides = [1, 1]} : vector<52x45xf32> to vector<42x10xf32>
    %c2_171 = arith.constant 2 : index
    %c0_172 = arith.constant 0 : index
    %c0_173 = arith.constant 0 : index
    %218 = vector.load %arg7[%c2_171, %c0_172, %c0_173] : memref<11x10x10xf32, #tpu.memory_space<vmem>>, vector<1x10x10xf32>
    %219 = vector.shape_cast %218 : vector<1x10x10xf32> to vector<10x10xf32>
    %cst_174 = arith.constant dense<0.000000e+00> : vector<42x10xf32>
    %220 = tpu.matmul %217, %219, %cst_174 {dimension_numbers = #tpu.dot_dimension_numbers<[1], [0], [0], [1], [0, 0, 1, 1], [], []>} : vector<42x10xf32>, vector<10x10xf32>, vector<42x10xf32> -> vector<42x10xf32>
    %221 = arith.addf %216, %220 : vector<42x10xf32>
    %222 = vector.extract_strided_slice %203 {offsets = [3, 0], sizes = [42, 10], strides = [1, 1]} : vector<52x45xf32> to vector<42x10xf32>
    %c3_175 = arith.constant 3 : index
    %c0_176 = arith.constant 0 : index
    %c0_177 = arith.constant 0 : index
    %223 = vector.load %arg7[%c3_175, %c0_176, %c0_177] : memref<11x10x10xf32, #tpu.memory_space<vmem>>, vector<1x10x10xf32>
    %224 = vector.shape_cast %223 : vector<1x10x10xf32> to vector<10x10xf32>
    %cst_178 = arith.constant dense<0.000000e+00> : vector<42x10xf32>
    %225 = tpu.matmul %222, %224, %cst_178 {dimension_numbers = #tpu.dot_dimension_numbers<[1], [0], [0], [1], [0, 0, 1, 1], [], []>} : vector<42x10xf32>, vector<10x10xf32>, vector<42x10xf32> -> vector<42x10xf32>
    %226 = arith.addf %221, %225 : vector<42x10xf32>
    %227 = vector.extract_strided_slice %203 {offsets = [4, 0], sizes = [42, 10], strides = [1, 1]} : vector<52x45xf32> to vector<42x10xf32>
    %c4_179 = arith.constant 4 : index
    %c0_180 = arith.constant 0 : index
    %c0_181 = arith.constant 0 : index
    %228 = vector.load %arg7[%c4_179, %c0_180, %c0_181] : memref<11x10x10xf32, #tpu.memory_space<vmem>>, vector<1x10x10xf32>
    %229 = vector.shape_cast %228 : vector<1x10x10xf32> to vector<10x10xf32>
    %cst_182 = arith.constant dense<0.000000e+00> : vector<42x10xf32>
    %230 = tpu.matmul %227, %229, %cst_182 {dimension_numbers = #tpu.dot_dimension_numbers<[1], [0], [0], [1], [0, 0, 1, 1], [], []>} : vector<42x10xf32>, vector<10x10xf32>, vector<42x10xf32> -> vector<42x10xf32>
    %231 = arith.addf %226, %230 : vector<42x10xf32>
    %232 = vector.extract_strided_slice %203 {offsets = [5, 0], sizes = [42, 10], strides = [1, 1]} : vector<52x45xf32> to vector<42x10xf32>
    %c5_183 = arith.constant 5 : index
    %c0_184 = arith.constant 0 : index
    %c0_185 = arith.constant 0 : index
    %233 = vector.load %arg7[%c5_183, %c0_184, %c0_185] : memref<11x10x10xf32, #tpu.memory_space<vmem>>, vector<1x10x10xf32>
    %234 = vector.shape_cast %233 : vector<1x10x10xf32> to vector<10x10xf32>
    %cst_186 = arith.constant dense<0.000000e+00> : vector<42x10xf32>
    %235 = tpu.matmul %232, %234, %cst_186 {dimension_numbers = #tpu.dot_dimension_numbers<[1], [0], [0], [1], [0, 0, 1, 1], [], []>} : vector<42x10xf32>, vector<10x10xf32>, vector<42x10xf32> -> vector<42x10xf32>
    %236 = arith.addf %231, %235 : vector<42x10xf32>
    %237 = vector.extract_strided_slice %203 {offsets = [6, 0], sizes = [42, 10], strides = [1, 1]} : vector<52x45xf32> to vector<42x10xf32>
    %c6_187 = arith.constant 6 : index
    %c0_188 = arith.constant 0 : index
    %c0_189 = arith.constant 0 : index
    %238 = vector.load %arg7[%c6_187, %c0_188, %c0_189] : memref<11x10x10xf32, #tpu.memory_space<vmem>>, vector<1x10x10xf32>
    %239 = vector.shape_cast %238 : vector<1x10x10xf32> to vector<10x10xf32>
    %cst_190 = arith.constant dense<0.000000e+00> : vector<42x10xf32>
    %240 = tpu.matmul %237, %239, %cst_190 {dimension_numbers = #tpu.dot_dimension_numbers<[1], [0], [0], [1], [0, 0, 1, 1], [], []>} : vector<42x10xf32>, vector<10x10xf32>, vector<42x10xf32> -> vector<42x10xf32>
    %241 = arith.addf %236, %240 : vector<42x10xf32>
    %242 = vector.extract_strided_slice %203 {offsets = [7, 0], sizes = [42, 10], strides = [1, 1]} : vector<52x45xf32> to vector<42x10xf32>
    %c7_191 = arith.constant 7 : index
    %c0_192 = arith.constant 0 : index
    %c0_193 = arith.constant 0 : index
    %243 = vector.load %arg7[%c7_191, %c0_192, %c0_193] : memref<11x10x10xf32, #tpu.memory_space<vmem>>, vector<1x10x10xf32>
    %244 = vector.shape_cast %243 : vector<1x10x10xf32> to vector<10x10xf32>
    %cst_194 = arith.constant dense<0.000000e+00> : vector<42x10xf32>
    %245 = tpu.matmul %242, %244, %cst_194 {dimension_numbers = #tpu.dot_dimension_numbers<[1], [0], [0], [1], [0, 0, 1, 1], [], []>} : vector<42x10xf32>, vector<10x10xf32>, vector<42x10xf32> -> vector<42x10xf32>
    %246 = arith.addf %241, %245 : vector<42x10xf32>
    %247 = vector.extract_strided_slice %203 {offsets = [8, 0], sizes = [42, 10], strides = [1, 1]} : vector<52x45xf32> to vector<42x10xf32>
    %c8_195 = arith.constant 8 : index
    %c0_196 = arith.constant 0 : index
    %c0_197 = arith.constant 0 : index
    %248 = vector.load %arg7[%c8_195, %c0_196, %c0_197] : memref<11x10x10xf32, #tpu.memory_space<vmem>>, vector<1x10x10xf32>
    %249 = vector.shape_cast %248 : vector<1x10x10xf32> to vector<10x10xf32>
    %cst_198 = arith.constant dense<0.000000e+00> : vector<42x10xf32>
    %250 = tpu.matmul %247, %249, %cst_198 {dimension_numbers = #tpu.dot_dimension_numbers<[1], [0], [0], [1], [0, 0, 1, 1], [], []>} : vector<42x10xf32>, vector<10x10xf32>, vector<42x10xf32> -> vector<42x10xf32>
    %251 = arith.addf %246, %250 : vector<42x10xf32>
    %252 = vector.extract_strided_slice %203 {offsets = [9, 0], sizes = [42, 10], strides = [1, 1]} : vector<52x45xf32> to vector<42x10xf32>
    %c9_199 = arith.constant 9 : index
    %c0_200 = arith.constant 0 : index
    %c0_201 = arith.constant 0 : index
    %253 = vector.load %arg7[%c9_199, %c0_200, %c0_201] : memref<11x10x10xf32, #tpu.memory_space<vmem>>, vector<1x10x10xf32>
    %254 = vector.shape_cast %253 : vector<1x10x10xf32> to vector<10x10xf32>
    %cst_202 = arith.constant dense<0.000000e+00> : vector<42x10xf32>
    %255 = tpu.matmul %252, %254, %cst_202 {dimension_numbers = #tpu.dot_dimension_numbers<[1], [0], [0], [1], [0, 0, 1, 1], [], []>} : vector<42x10xf32>, vector<10x10xf32>, vector<42x10xf32> -> vector<42x10xf32>
    %256 = arith.addf %251, %255 : vector<42x10xf32>
    %257 = vector.extract_strided_slice %203 {offsets = [10, 0], sizes = [42, 10], strides = [1, 1]} : vector<52x45xf32> to vector<42x10xf32>
    %c10_203 = arith.constant 10 : index
    %c0_204 = arith.constant 0 : index
    %c0_205 = arith.constant 0 : index
    %258 = vector.load %arg7[%c10_203, %c0_204, %c0_205] : memref<11x10x10xf32, #tpu.memory_space<vmem>>, vector<1x10x10xf32>
    %259 = vector.shape_cast %258 : vector<1x10x10xf32> to vector<10x10xf32>
    %cst_206 = arith.constant dense<0.000000e+00> : vector<42x10xf32>
    %260 = tpu.matmul %257, %259, %cst_206 {dimension_numbers = #tpu.dot_dimension_numbers<[1], [0], [0], [1], [0, 0, 1, 1], [], []>} : vector<42x10xf32>, vector<10x10xf32>, vector<42x10xf32> -> vector<42x10xf32>
    %261 = arith.addf %256, %260 : vector<42x10xf32>
    %cst_207 = arith.constant 0.000000e+00 : f32
    %262 = vector.broadcast %cst_207 : f32 to vector<42x10xf32>
    %263 = arith.maximumf %261, %262 : vector<42x10xf32>
    %264 = vector.extract_strided_slice %263 {offsets = [0, 0], sizes = [16, 10], strides = [1, 1]} : vector<42x10xf32> to vector<16x10xf32>
    %c5_208 = arith.constant 5 : index
    %c0_209 = arith.constant 0 : index
    %265 = vector.load %arg12[%c5_208, %c0_209] : memref<52x45xf32, #tpu.memory_space<vmem>>, vector<16x10xf32>
    tpu.vector_store %arg12[%c5_208, %c0_209], %264 {strides = array<i32>} : memref<52x45xf32, #tpu.memory_space<vmem>>, vector<16x10xf32>,
    %266 = vector.extract_strided_slice %263 {offsets = [26, 0], sizes = [16, 10], strides = [1, 1]} : vector<42x10xf32> to vector<16x10xf32>
    %c31_210 = arith.constant 31 : index
    %c0_211 = arith.constant 0 : index
    %267 = vector.load %arg12[%c31_210, %c0_211] : memref<52x45xf32, #tpu.memory_space<vmem>>, vector<16x10xf32>
    tpu.vector_store %arg12[%c31_210, %c0_211], %266 {strides = array<i32>} : memref<52x45xf32, #tpu.memory_space<vmem>>, vector<16x10xf32>,
    %c0_212 = arith.constant 0 : index
    %c0_213 = arith.constant 0 : index
    %268 = vector.load %arg12[%c0_212, %c0_213] : memref<52x45xf32, #tpu.memory_space<vmem>>, vector<52x45xf32>
    %c0_214 = arith.constant 0 : index
    %c0_215 = arith.constant 0 : index
    %269 = vector.load %arg10[%c0_214, %c0_215] : memref<1x3xf32, #tpu.memory_space<vmem>>, vector<1x3xf32>
    %270 = vector.shape_cast %269 : vector<1x3xf32> to vector<1x3xf32>
    %271 = vector.broadcast %270 : vector<1x3xf32> to vector<42x3xf32>
    %272 = vector.extract_strided_slice %268 {offsets = [0, 0], sizes = [42, 10], strides = [1, 1]} : vector<52x45xf32> to vector<42x10xf32>
    %c0_216 = arith.constant 0 : index
    %c0_217 = arith.constant 0 : index
    %c0_218 = arith.constant 0 : index
    %273 = vector.load %arg9[%c0_216, %c0_217, %c0_218] : memref<11x10x3xf32, #tpu.memory_space<vmem>>, vector<1x10x3xf32>
    %274 = vector.shape_cast %273 : vector<1x10x3xf32> to vector<10x3xf32>
    %cst_219 = arith.constant dense<0.000000e+00> : vector<42x3xf32>
    %275 = tpu.matmul %272, %274, %cst_219 {dimension_numbers = #tpu.dot_dimension_numbers<[1], [0], [0], [1], [0, 0, 1, 1], [], []>} : vector<42x10xf32>, vector<10x3xf32>, vector<42x3xf32> -> vector<42x3xf32>
    %276 = arith.addf %271, %275 : vector<42x3xf32>
    %277 = vector.extract_strided_slice %268 {offsets = [1, 0], sizes = [42, 10], strides = [1, 1]} : vector<52x45xf32> to vector<42x10xf32>
    %c1_220 = arith.constant 1 : index
    %c0_221 = arith.constant 0 : index
    %c0_222 = arith.constant 0 : index
    %278 = vector.load %arg9[%c1_220, %c0_221, %c0_222] : memref<11x10x3xf32, #tpu.memory_space<vmem>>, vector<1x10x3xf32>
    %279 = vector.shape_cast %278 : vector<1x10x3xf32> to vector<10x3xf32>
    %cst_223 = arith.constant dense<0.000000e+00> : vector<42x3xf32>
    %280 = tpu.matmul %277, %279, %cst_223 {dimension_numbers = #tpu.dot_dimension_numbers<[1], [0], [0], [1], [0, 0, 1, 1], [], []>} : vector<42x10xf32>, vector<10x3xf32>, vector<42x3xf32> -> vector<42x3xf32>
    %281 = arith.addf %276, %280 : vector<42x3xf32>
    %282 = vector.extract_strided_slice %268 {offsets = [2, 0], sizes = [42, 10], strides = [1, 1]} : vector<52x45xf32> to vector<42x10xf32>
    %c2_224 = arith.constant 2 : index
    %c0_225 = arith.constant 0 : index
    %c0_226 = arith.constant 0 : index
    %283 = vector.load %arg9[%c2_224, %c0_225, %c0_226] : memref<11x10x3xf32, #tpu.memory_space<vmem>>, vector<1x10x3xf32>
    %284 = vector.shape_cast %283 : vector<1x10x3xf32> to vector<10x3xf32>
    %cst_227 = arith.constant dense<0.000000e+00> : vector<42x3xf32>
    %285 = tpu.matmul %282, %284, %cst_227 {dimension_numbers = #tpu.dot_dimension_numbers<[1], [0], [0], [1], [0, 0, 1, 1], [], []>} : vector<42x10xf32>, vector<10x3xf32>, vector<42x3xf32> -> vector<42x3xf32>
    %286 = arith.addf %281, %285 : vector<42x3xf32>
    %287 = vector.extract_strided_slice %268 {offsets = [3, 0], sizes = [42, 10], strides = [1, 1]} : vector<52x45xf32> to vector<42x10xf32>
    %c3_228 = arith.constant 3 : index
    %c0_229 = arith.constant 0 : index
    %c0_230 = arith.constant 0 : index
    %288 = vector.load %arg9[%c3_228, %c0_229, %c0_230] : memref<11x10x3xf32, #tpu.memory_space<vmem>>, vector<1x10x3xf32>
    %289 = vector.shape_cast %288 : vector<1x10x3xf32> to vector<10x3xf32>
    %cst_231 = arith.constant dense<0.000000e+00> : vector<42x3xf32>
    %290 = tpu.matmul %287, %289, %cst_231 {dimension_numbers = #tpu.dot_dimension_numbers<[1], [0], [0], [1], [0, 0, 1, 1], [], []>} : vector<42x10xf32>, vector<10x3xf32>, vector<42x3xf32> -> vector<42x3xf32>
    %291 = arith.addf %286, %290 : vector<42x3xf32>
    %292 = vector.extract_strided_slice %268 {offsets = [4, 0], sizes = [42, 10], strides = [1, 1]} : vector<52x45xf32> to vector<42x10xf32>
    %c4_232 = arith.constant 4 : index
    %c0_233 = arith.constant 0 : index
    %c0_234 = arith.constant 0 : index
    %293 = vector.load %arg9[%c4_232, %c0_233, %c0_234] : memref<11x10x3xf32, #tpu.memory_space<vmem>>, vector<1x10x3xf32>
    %294 = vector.shape_cast %293 : vector<1x10x3xf32> to vector<10x3xf32>
    %cst_235 = arith.constant dense<0.000000e+00> : vector<42x3xf32>
    %295 = tpu.matmul %292, %294, %cst_235 {dimension_numbers = #tpu.dot_dimension_numbers<[1], [0], [0], [1], [0, 0, 1, 1], [], []>} : vector<42x10xf32>, vector<10x3xf32>, vector<42x3xf32> -> vector<42x3xf32>
    %296 = arith.addf %291, %295 : vector<42x3xf32>
    %297 = vector.extract_strided_slice %268 {offsets = [5, 0], sizes = [42, 10], strides = [1, 1]} : vector<52x45xf32> to vector<42x10xf32>
    %c5_236 = arith.constant 5 : index
    %c0_237 = arith.constant 0 : index
    %c0_238 = arith.constant 0 : index
    %298 = vector.load %arg9[%c5_236, %c0_237, %c0_238] : memref<11x10x3xf32, #tpu.memory_space<vmem>>, vector<1x10x3xf32>
    %299 = vector.shape_cast %298 : vector<1x10x3xf32> to vector<10x3xf32>
    %cst_239 = arith.constant dense<0.000000e+00> : vector<42x3xf32>
    %300 = tpu.matmul %297, %299, %cst_239 {dimension_numbers = #tpu.dot_dimension_numbers<[1], [0], [0], [1], [0, 0, 1, 1], [], []>} : vector<42x10xf32>, vector<10x3xf32>, vector<42x3xf32> -> vector<42x3xf32>
    %301 = arith.addf %296, %300 : vector<42x3xf32>
    %302 = vector.extract_strided_slice %268 {offsets = [6, 0], sizes = [42, 10], strides = [1, 1]} : vector<52x45xf32> to vector<42x10xf32>
    %c6_240 = arith.constant 6 : index
    %c0_241 = arith.constant 0 : index
    %c0_242 = arith.constant 0 : index
    %303 = vector.load %arg9[%c6_240, %c0_241, %c0_242] : memref<11x10x3xf32, #tpu.memory_space<vmem>>, vector<1x10x3xf32>
    %304 = vector.shape_cast %303 : vector<1x10x3xf32> to vector<10x3xf32>
    %cst_243 = arith.constant dense<0.000000e+00> : vector<42x3xf32>
    %305 = tpu.matmul %302, %304, %cst_243 {dimension_numbers = #tpu.dot_dimension_numbers<[1], [0], [0], [1], [0, 0, 1, 1], [], []>} : vector<42x10xf32>, vector<10x3xf32>, vector<42x3xf32> -> vector<42x3xf32>
    %306 = arith.addf %301, %305 : vector<42x3xf32>
    %307 = vector.extract_strided_slice %268 {offsets = [7, 0], sizes = [42, 10], strides = [1, 1]} : vector<52x45xf32> to vector<42x10xf32>
    %c7_244 = arith.constant 7 : index
    %c0_245 = arith.constant 0 : index
    %c0_246 = arith.constant 0 : index
    %308 = vector.load %arg9[%c7_244, %c0_245, %c0_246] : memref<11x10x3xf32, #tpu.memory_space<vmem>>, vector<1x10x3xf32>
    %309 = vector.shape_cast %308 : vector<1x10x3xf32> to vector<10x3xf32>
    %cst_247 = arith.constant dense<0.000000e+00> : vector<42x3xf32>
    %310 = tpu.matmul %307, %309, %cst_247 {dimension_numbers = #tpu.dot_dimension_numbers<[1], [0], [0], [1], [0, 0, 1, 1], [], []>} : vector<42x10xf32>, vector<10x3xf32>, vector<42x3xf32> -> vector<42x3xf32>
    %311 = arith.addf %306, %310 : vector<42x3xf32>
    %312 = vector.extract_strided_slice %268 {offsets = [8, 0], sizes = [42, 10], strides = [1, 1]} : vector<52x45xf32> to vector<42x10xf32>
    %c8_248 = arith.constant 8 : index
    %c0_249 = arith.constant 0 : index
    %c0_250 = arith.constant 0 : index
    %313 = vector.load %arg9[%c8_248, %c0_249, %c0_250] : memref<11x10x3xf32, #tpu.memory_space<vmem>>, vector<1x10x3xf32>
    %314 = vector.shape_cast %313 : vector<1x10x3xf32> to vector<10x3xf32>
    %cst_251 = arith.constant dense<0.000000e+00> : vector<42x3xf32>
    %315 = tpu.matmul %312, %314, %cst_251 {dimension_numbers = #tpu.dot_dimension_numbers<[1], [0], [0], [1], [0, 0, 1, 1], [], []>} : vector<42x10xf32>, vector<10x3xf32>, vector<42x3xf32> -> vector<42x3xf32>
    %316 = arith.addf %311, %315 : vector<42x3xf32>
    %317 = vector.extract_strided_slice %268 {offsets = [9, 0], sizes = [42, 10], strides = [1, 1]} : vector<52x45xf32> to vector<42x10xf32>
    %c9_252 = arith.constant 9 : index
    %c0_253 = arith.constant 0 : index
    %c0_254 = arith.constant 0 : index
    %318 = vector.load %arg9[%c9_252, %c0_253, %c0_254] : memref<11x10x3xf32, #tpu.memory_space<vmem>>, vector<1x10x3xf32>
    %319 = vector.shape_cast %318 : vector<1x10x3xf32> to vector<10x3xf32>
    %cst_255 = arith.constant dense<0.000000e+00> : vector<42x3xf32>
    %320 = tpu.matmul %317, %319, %cst_255 {dimension_numbers = #tpu.dot_dimension_numbers<[1], [0], [0], [1], [0, 0, 1, 1], [], []>} : vector<42x10xf32>, vector<10x3xf32>, vector<42x3xf32> -> vector<42x3xf32>
    %321 = arith.addf %316, %320 : vector<42x3xf32>
    %322 = vector.extract_strided_slice %268 {offsets = [10, 0], sizes = [42, 10], strides = [1, 1]} : vector<52x45xf32> to vector<42x10xf32>
    %c10_256 = arith.constant 10 : index
    %c0_257 = arith.constant 0 : index
    %c0_258 = arith.constant 0 : index
    %323 = vector.load %arg9[%c10_256, %c0_257, %c0_258] : memref<11x10x3xf32, #tpu.memory_space<vmem>>, vector<1x10x3xf32>
    %324 = vector.shape_cast %323 : vector<1x10x3xf32> to vector<10x3xf32>
    %cst_259 = arith.constant dense<0.000000e+00> : vector<42x3xf32>
    %325 = tpu.matmul %322, %324, %cst_259 {dimension_numbers = #tpu.dot_dimension_numbers<[1], [0], [0], [1], [0, 0, 1, 1], [], []>} : vector<42x10xf32>, vector<10x3xf32>, vector<42x3xf32> -> vector<42x3xf32>
    %326 = arith.addf %321, %325 : vector<42x3xf32>
    %cst_260 = arith.constant 0.000000e+00 : f32
    %327 = vector.broadcast %cst_260 : f32 to vector<42x3xf32>
    %328 = arith.maximumf %326, %327 : vector<42x3xf32>
    %329 = vector.extract_strided_slice %328 {offsets = [0, 0], sizes = [16, 3], strides = [1, 1]} : vector<42x3xf32> to vector<16x3xf32>
    %c0_261 = arith.constant 0 : index
    %c0_262 = arith.constant 0 : index
    %c0_263 = arith.constant 0 : index
    %330 = vector.load %arg11[%c0_261, %c0_262, %c0_263] : memref<2x16x3xf32, #tpu.memory_space<vmem>>, vector<1x16x3xf32>
    %331 = vector.shape_cast %330 : vector<1x16x3xf32> to vector<16x3xf32>
    %332 = vector.shape_cast %329 : vector<16x3xf32> to vector<1x16x3xf32>
    tpu.vector_store %arg11[%c0_261, %c0_262, %c0_263], %332 {strides = array<i32>} : memref<2x16x3xf32, #tpu.memory_space<vmem>>, vector<1x16x3xf32>,
    %333 = vector.extract_strided_slice %328 {offsets = [26, 0], sizes = [16, 3], strides = [1, 1]} : vector<42x3xf32> to vector<16x3xf32>
    %c1_264 = arith.constant 1 : index
    %c0_265 = arith.constant 0 : index
    %c0_266 = arith.constant 0 : index
    %334 = vector.load %arg11[%c1_264, %c0_265, %c0_266] : memref<2x16x3xf32, #tpu.memory_space<vmem>>, vector<1x16x3xf32>
    %335 = vector.shape_cast %334 : vector<1x16x3xf32> to vector<16x3xf32>
    %336 = vector.shape_cast %333 : vector<16x3xf32> to vector<1x16x3xf32>
    tpu.vector_store %arg11[%c1_264, %c0_265, %c0_266], %336 {strides = array<i32>} : memref<2x16x3xf32, #tpu.memory_space<vmem>>, vector<1x16x3xf32>,
    return
  }
}

</mosaic_0001>

<bundles_post_ra>
// kernel: cnn_model_forward.1
= control target key start
LH: loop header
LB: loop body
LE: loop exit
PB: predicated region body
PF: predicated region fallthrough
CT: control target
= control target key end

     0   :  { %vm94_vm0 = vcmask 1044480   ;;  %vm38_vm1 = vcmask 367616   ;;  %v8782_v3 = vmov 0.0   ;;  %vm45_vm2 = vcmask 363520   ;;  %s10561_s1 = inlined_call_operand.vmem [shape: f32[11,45,16], index: 1, kind: input, shape index: {}]   ;;  %s10562_s0 = inlined_call_operand.vmem [shape: f32[2,16,45], index: 0, kind: input, shape index: {}]   ;;  %s10563_s3 = inlined_call_operand.vmem [shape: f32[11,16,10], index: 3, kind: input, shape index: {}]   ;;  %s10564_s2 = inlined_call_operand.vmem [shape: f32[1,16], index: 2, kind: input, shape index: {}]   ;;  %s10565_s5 = inlined_call_operand.vmem [shape: f32[11,10,10], index: 5, kind: input, shape index: {}]   ;;  %s10566_s4 = inlined_call_operand.vmem [shape: f32[1,10], index: 4, kind: input, shape index: {}]   ;;  %s10567_s7 = inlined_call_operand.vmem [shape: f32[11,10,10], index: 7, kind: input, shape index: {}]   ;;  %s10568_s6 = inlined_call_operand.vmem [shape: f32[1,10], index: 6, kind: input, shape index: {}]   ;;  %s10569_s9 = inlined_call_operand.vmem [shape: f32[11,10,3], index: 9, kind: input, shape index: {}]   ;;  %s10570_s8 = inlined_call_operand.vmem [shape: f32[1,10], index: 8, kind: input, shape index: {}]   ;;  %s10571_s10 = inlined_call_operand.vmem [shape: f32[1,3], index: 10, kind: input, shape index: {}]   ;;  %s10572_s11 = inlined_call_operand.vmem [shape: f32[2,16,3], index: 11, kind: output, shape index: {}]  }
   0x1   :  { %v75_v0 = vld [vmem:[%s10561_s1 + $0x28] sm:$0x1f]  ;;  %v6973_v1 = vld [vmem:[%s10561_s1 + $0x58] sm:$0x1f]  ;;  %v74_v2 = vld [vmem:[%s10561_s1 + $0x20] sm:$0xff]  ;;  %39 = vst.msk [vmem:[#allocation2] sm:$0xff] %vm38_vm1, %v8782_v3 }
   0x2   :  { %40 = vst.msk [vmem:[#allocation2 + $0x8] sm:$0xff] %vm38_vm1, %v8782_v3  ;;  %41 = vst.msk [vmem:[#allocation2 + $0x10] sm:$0xff] %vm38_vm1, %v8782_v3  ;;  %7966 = vmatprep.subr.msk.mxu0 %vm94_vm0, %v75_v0  ;;  %7987 = vmatprep.subr.msk.mxu1 %vm94_vm0, %v6973_v1  ;;  %v6972_v4 = vld [vmem:[%s10561_s1 + $0x50] sm:$0xff]  ;;  %v73_v5 = vld [vmem:[%s10561_s1 + $0x18] sm:$0xff]  ;;  %vm204_vm3 = vcmask 1046528   ;;  %vm337_vm4 = vcmask 1045504  }
   0x3   :  { %43 = vst.msk [vmem:[#allocation2 + $0x20] sm:$0xff] %vm38_vm1, %v8782_v3  ;;  %44 = vst.msk [vmem:[#allocation2 + $0x28] sm:$0xff] %vm38_vm1, %v8782_v3  ;;  %7967 = vmatpush3.msk.msra.mxu0 %vm94_vm0, %v75_v0  ;;  %7988 = vmatpush3.msk.msra.mxu1 %vm94_vm0, %v6973_v1  ;;  %v6971_v6 = vld [vmem:[%s10561_s1 + $0x48] sm:$0xff]  ;;  %v72_v7 = vld [vmem:[%s10561_s1 + $0x10] sm:$0xff]  ;;  %vm602_vm5 = vcmask 1043456   ;;  %vm735_vm6 = vcmask 1042432  }
   0x4   :  { %42 = vst.msk [vmem:[#allocation2 + $0x18] sm:$0xff] %vm38_vm1, %v8782_v3  ;;  %7968 = vmatprep.subr.mxu0 %v74_v2  ;;  %7989 = vmatprep.subr.mxu1 %v6972_v4  ;;  %v6970_v8 = vld [vmem:[%s10561_s1 + $0x40] sm:$0xff]  ;;  %v48_v10 = vld [vmem:[%s10562_s0 + $0x8] sm:$0xff]  ;;  %v6958_v11 = vld [vmem:[%s10562_s0 + $0x10] sm:$0xff]  ;;  %vm868_vm7 = vcmask 1041408   ;;  %vm1002_vm8 = vcmask 1040384  }
   0x5   :  { %46 = vst.msk [vmem:[#allocation2 + $0x30] sm:$0xf] %vm45_vm2, %v8782_v3  ;;  %7969 = vmatpush3.msra.mxu0 %v74_v2  ;;  %7990 = vmatpush3.msra.mxu1 %v6972_v4  ;;  %v47_v9 = vld [vmem:[%s10562_s0] sm:$0xff]  ;;  %v6959_v12 = vld [vmem:[%s10562_s0 + $0x18] sm:$0xff]  ;;  %v71_v13 = vld [vmem:[%s10561_s1 + $0x8] sm:$0xff]  ;;  %vm1476_vm9 = vcmask 130048  }
   0x6   :  { %7970 = vmatprep.subr.mxu0 %v73_v5  ;;  %7991 = vmatprep.subr.mxu1 %v6971_v6  ;;  %49 = vst.msk [vmem:[#allocation2 + $0x5] sm:$0xff] %vm38_vm1, %v47_v9  ;;  %50 = vst.msk [vmem:[#allocation2 + $0xd] sm:$0xff] %vm38_vm1, %v48_v10  ;;  %v6969_v14 = vld [vmem:[%s10561_s1 + $0x38] sm:$0xff]  ;;  %v70_v15 = vld [vmem:[%s10561_s1] sm:$0xff]  ;;  %vm1479_vm10 = vcmask 130050   ;;  %vm1482_vm11 = vcmask 123904  }
   0x7   :  { %54 = vst.msk [vmem:[#allocation2 + $0x1f] sm:$0xff] %vm38_vm1, %v6958_v11  ;;  %7971 = vmatpush3.msra.mxu0 %v73_v5  ;;  %7992 = vmatpush3.msra.mxu1 %v6971_v6  ;;  %55 = vst.msk [vmem:[#allocation2 + $0x27] sm:$0xff] %vm38_vm1, %v6959_v12  ;;  %v6968_v16 = vld [vmem:[%s10561_s1 + $0x30] sm:$0xff]  ;;  %v6986_v17 = vld [vmem:[%s10561_s1 + $0x88] sm:$0x1f]  ;;  %vm2820_vm12 = vcmask 80896  }
   0x8   :  { %7972 = vmatprep.subr.mxu0 %v72_v7  ;;  %7993 = vmatprep.subr.mxu1 %v6970_v8  ;;  %v6999_v18 = vld [vmem:[%s10561_s1 + $0xb8] sm:$0x1f]  ;;  %v6985_v25 = vld [vmem:[%s10561_s1 + $0x80] sm:$0xff]  ;;  %v6998_v33 = vld [vmem:[%s10561_s1 + $0xb0] sm:$0xff]  ;;  %vm2823_vm13 = vcmask 80898   ;;  %vm2826_vm14 = vcmask 74752  }
   0x9   :  { %7973 = vmatpush3.msra.mxu0 %v72_v7  ;;  %7994 = vmatpush3.msra.mxu1 %v6970_v8  ;;  %v6984_v35 = vld [vmem:[%s10561_s1 + $0x78] sm:$0xff]  ;;  %v6997_v38 = vld [vmem:[%s10561_s1 + $0xa8] sm:$0xff]  ;;  %v6983_v39 = vld [vmem:[%s10561_s1 + $0x70] sm:$0xff]  ;;  %vm6945_vm15 = vcmask 23552  }
   0xa   :  { %7974 = vmatprep.subr.mxu0 %v71_v13  ;;  %7995 = vmatprep.subr.mxu1 %v6969_v14  ;;  %v6996_v40 = vld [vmem:[%s10561_s1 + $0xa0] sm:$0xff]  ;;  %v6982_v44 = vld [vmem:[%s10561_s1 + $0x68] sm:$0xff]  ;;  %v6995_v45 = vld [vmem:[%s10561_s1 + $0x98] sm:$0xff] }
   0xb   :  { %7975 = vmatpush3.msra.mxu0 %v71_v13  ;;  %7996 = vmatpush3.msra.mxu1 %v6969_v14  ;;  %v6981_v50 = vld [vmem:[%s10561_s1 + $0x60] sm:$0xff]  ;;  %v6994_v51 = vld [vmem:[%s10561_s1 + $0x90] sm:$0xff]  ;;  %v7012_v58 = vld [vmem:[%s10561_s1 + $0xe8] sm:$0x1f] }
   0xc   :  { %7976 = vmatprep.subr.mxu0 %v70_v15  ;;  %7997 = vmatprep.subr.mxu1 %v6968_v16  ;;  %v7025_v59 = vld [vmem:[%s10561_s1 + $0x118] sm:$0x1f]  ;;  %v7011_v62 = vld [vmem:[%s10561_s1 + $0xe0] sm:$0xff]  ;;  %v7024_v63 = vld [vmem:[%s10561_s1 + $0x110] sm:$0xff] }
   0xd   :  { %7977 = vmatpush3.msra.mxu0 %v70_v15  ;;  %v8911_v19 = vld [vmem:[#allocation2] sm:$0xff]  ;;  %7998 = vmatpush3.msra.mxu1 %v6968_v16  ;;  %v8913_v20 = vld [vmem:[#allocation2 + $0x8] sm:$0xff]  ;;  %v8915_v21 = vld [vmem:[#allocation2 + $0x10] sm:$0xff] }
   0xe   :  { %7978 = vmatprep.mubr.msk.f32.mxu0 %vm38_vm1, %v8911_v19  ;;  %v205_v22 = vrot.slane %v8911_v19, 1  ;;  %v206_v23 = vrot.slane %v8913_v20, 1  ;;  %v208_v24 = vrot.slane %v8915_v21, 1  ;;  %8008 = vmatprep.subr.msk.mxu0 %vm94_vm0, %v6986_v17  ;;  %v8926_v26 = vld [vmem:[#allocation2 + $0x18] sm:$0xff]  ;;  %v8928_v27 = vld [vmem:[#allocation2 + $0x20] sm:$0xff]  ;;  %v8935_v30 = vld [vmem:[#allocation2 + $0x28] sm:$0xff] }
   0xf   :  { %7979 = vmatmul.mubr.msk.f32.vlgmr.msra.gmra.mxu0 %vm38_vm1, %v8913_v20  ;;  %8029 = vmatprep.subr.msk.mxu1 %vm94_vm0, %v6999_v18  ;;  %v210_v28 = vrot.slane %v8926_v26, 1  ;;  %v212_v29 = vrot.slane %v8928_v27, 1  ;;  %v8957_v36 = vrot.slane %v8935_v30, 1  ;;  %v338_v42 = vrot.slane %v8911_v19, 2  ;;  %v7010_v6 = vld [vmem:[%s10561_s1 + $0xd8] sm:$0xff]  ;;  %v7023_v7 = vld [vmem:[%s10561_s1 + $0x108] sm:$0xff] }
  0x10   :  { %v207_v31 = vsel %vm204_vm3, %v205_v22, %v206_v23  ;;  %v8939_v32 = vsel %vm204_vm3, %v206_v23, %v208_v24  ;;  %8009 = vmatpush3.msk.msra.mxu0 %vm94_vm0, %v6986_v17  ;;  %7981 = vmatprep.mubr.msk.f32.mxu0 %vm38_vm1, %v8915_v21  ;;  %v339_v43 = vrot.slane %v8913_v20, 2  ;;  %v470_v46 = vrot.slane %v8911_v19, 3  ;;  %v7009_v8 = vld [vmem:[%s10561_s1 + $0xd0] sm:$0xff]  ;;  %v7022_v9 = vld [vmem:[%s10561_s1 + $0x100] sm:$0xff]  ;;  %v7008_v14 = vld [vmem:[%s10561_s1 + $0xc8] sm:$0xff] }
  0x11   :  { %7999 = vmatprep.mubr.msk.f32.mxu1 %vm38_vm1, %v207_v31  ;;  %8010 = vmatprep.subr.mxu0 %v6985_v25  ;;  %v8949_v34 = vsel %vm204_vm3, %v208_v24, %v210_v28  ;;  %v8963_v37 = vsel %vm204_vm3, %v210_v28, %v212_v29  ;;  %v8980_v41 = vsel %vm204_vm3, %v212_v29, %v8957_v36  ;;  %v471_v47 = vrot.slane %v8913_v20, 3  ;;  %v7021_v15 = vld [vmem:[%s10561_s1 + $0xf8] sm:$0xff]  ;;  %v7007_v23 = vld [vmem:[%s10561_s1 + $0xc0] sm:$0xff]  ;;  %v7020_v24 = vld [vmem:[%s10561_s1 + $0xf0] sm:$0xff] }
  0x12   :  { %8000 = vmatmul.mubr.msk.f32.vlgmr.msra.gmra.mxu1 %vm38_vm1, %v8939_v32  ;;  %8011 = vmatpush3.msra.mxu0 %v6985_v25  ;;  %v341_v48 = vrot.slane %v8915_v21, 2  ;;  %v473_v49 = vrot.slane %v8915_v21, 3  ;;  %v340_v52 = vsel %vm337_vm4, %v338_v42, %v339_v43  ;;  %v343_v56 = vrot.slane %v8926_v26, 2 }
  0x13   :  { %8030 = vmatpush3.msk.msra.mxu1 %vm94_vm0, %v6999_v18  ;;  %8002 = vmatprep.mubr.msk.f32.mxu1 %vm38_vm1, %v8949_v34  ;;  %v472_v53 = vsel %vm94_vm0, %v470_v46, %v471_v47  ;;  %v475_v57 = vrot.slane %v8926_v26, 3  ;;  %v345_v60 = vrot.slane %v8928_v27, 2  ;;  %v477_v61 = vrot.slane %v8928_v27, 3 }
  0x14   :  { %8031 = vmatprep.subr.mxu1 %v6998_v33  ;;  %7982 = vmatmul.mubr.msk.f32.gmra.mxu0 %vm38_vm1, %v8926_v26  ;;  %v9011_v54 = vsel %vm337_vm4, %v339_v43, %v341_v48  ;;  %v474_v55 = vsel %vm94_vm0, %v471_v47, %v473_v49  ;;  %v9038_v0 = vsel %vm337_vm4, %v341_v48, %v343_v56  ;;  %v9048_v4 = vrot.slane %v8935_v30, 2  ;;  %v7037_v43 = vld [vmem:[%s10561_s1 + $0x140] sm:$0xff] }
  0x15   :  { %8032 = vmatpush3.msra.mxu1 %v6998_v33  ;;  %8012 = vmatprep.subr.mxu0 %v6984_v35  ;;  %v476_v1 = vsel %vm94_vm0, %v473_v49, %v475_v57  ;;  %v9044_v2 = vsel %vm337_vm4, %v343_v56, %v345_v60  ;;  %v478_v3 = vsel %vm94_vm0, %v475_v57, %v477_v61  ;;  %v479_v5 = vrot.slane %v8935_v30, 3 }
  0x16   :  { %8003 = vmatmul.mubr.msk.f32.gmra.mxu1 %vm38_vm1, %v8963_v37  ;;  %8033 = vmatprep.subr.mxu1 %v6997_v38  ;;  %v9071_v10 = vsel %vm337_vm4, %v345_v60, %v9048_v4  ;;  %v603_v12 = vrot.slane %v8911_v19, 4  ;;  %v604_v13 = vrot.slane %v8913_v20, 4  ;;  %v736_v16 = vrot.slane %v8911_v19, 5  ;;  %v7034_v60 = vld [vmem:[%s10561_s1 + $0x128] sm:$0xff] }
  0x17   :  { %8013 = vmatpush3.msra.mxu0 %v6984_v35  ;;  %8034 = vmatpush3.msra.mxu1 %v6997_v38  ;;  %v480_v11 = vsel %vm94_vm0, %v477_v61, %v479_v5  ;;  %v737_v17 = vrot.slane %v8913_v20, 5  ;;  %v606_v18 = vrot.slane %v8915_v21, 4  ;;  %v739_v22 = vrot.slane %v8915_v21, 5  ;;  %v7038_v38 = vld [vmem:[%s10561_s1 + $0x148] sm:$0x1f]  ;;  %v7047_v61 = vld [vmem:[%s10561_s1 + $0x158] sm:$0xff] }
  0x18   :  { %8014 = vmatprep.subr.mxu0 %v6983_v39  ;;  %8035 = vmatprep.subr.mxu1 %v6996_v40  ;;  %v605_v25 = vsel %vm602_vm5, %v603_v12, %v604_v13  ;;  %v608_v33 = vrot.slane %v8926_v26, 4  ;;  %v741_v35 = vrot.slane %v8926_v26, 5  ;;  %v743_v42 = vrot.slane %v8928_v27, 5 }
  0x19   :  { %7984 = vmatprep.mubr.msk.f32.mxu0 %vm38_vm1, %v8928_v27  ;;  %8005 = vmatprep.mubr.msk.f32.mxu1 %vm38_vm1, %v8980_v41  ;;  %v738_v28 = vsel %vm735_vm6, %v736_v16, %v737_v17  ;;  %v607_v29 = vsel %vm602_vm5, %v604_v13, %v606_v18  ;;  %v740_v31 = vsel %vm735_vm6, %v737_v17, %v739_v22  ;;  %v612_v49 = vrot.slane %v8935_v30, 4  ;;  %v7064_v13 = vld [vmem:[%s10561_s1 + $0x1a8] sm:$0x1f]  ;;  %v7063_v17 = vld [vmem:[%s10561_s1 + $0x1a0] sm:$0xff] }
  0x1a   :  { %8015 = vmatpush3.msra.mxu0 %v6983_v39  ;;  %8036 = vmatpush3.msra.mxu1 %v6996_v40  ;;  %v7051_v39 = vld [vmem:[%s10561_s1 + $0x178] sm:$0x1f]  ;;  %v610_v40 = vrot.slane %v8928_v27, 4  ;;  %v742_v46 = vsel %vm735_vm6, %v739_v22, %v741_v35  ;;  %v744_v48 = vsel %vm735_vm6, %v741_v35, %v743_v42  ;;  %v1008_v12 = vrot.slane %v8926_v26, 7  ;;  %v7075_v35 = vld [vmem:[%s10561_s1 + $0x1c8] sm:$0xff] }
  0x1b   :  { %7985 = vmatmul.mubr.msk.f32.gmra.mxu0 %vm38_vm1, %v8935_v30  ;;  %8006 = vmatmul.mubr.msk.f32.gmra.mxu1 %vm38_vm1, %v8957_v36  ;;  %v1010_v16 = vrot.slane %v8928_v27, 7 }
  0x1c   :  { %8016 = vmatprep.subr.mxu0 %v6982_v44  ;;  %8037 = vmatprep.subr.mxu1 %v6995_v45  ;;  %v611_v47 = vsel %vm602_vm5, %v608_v33, %v610_v40  ;;  %v613_v56 = vsel %vm602_vm5, %v610_v40, %v612_v49  ;;  %v7074_v40 = vld [vmem:[%s10561_s1 + $0x1c0] sm:$0xff] }
  0x1d   :  { %8017 = vmatpush3.msra.mxu0 %v6982_v44  ;;  %8038 = vmatpush3.msra.mxu1 %v6995_v45  ;;  %v7050_v44 = vld [vmem:[%s10561_s1 + $0x170] sm:$0xff]  ;;  %v609_v45 = vsel %vm602_vm5, %v606_v18, %v608_v33  ;;  %v7062_v33 = vld [vmem:[%s10561_s1 + $0x198] sm:$0xff] }
  0x1e   :  { %8018 = vmatprep.subr.mxu0 %v6981_v50  ;;  %8039 = vmatprep.subr.mxu1 %v6994_v51  ;;  %v7076_v18 = vld [vmem:[%s10561_s1 + $0x1d0] sm:$0xff] }
  0x1f   :  { %8019 = vmatpush3.msra.mxu0 %v6981_v50  ;;  %8020 = vmatprep.mubr.msk.f32.mxu0 %vm38_vm1, %v340_v52  ;;  %v745_v50 = vrot.slane %v8935_v30, 5  ;;  %v7049_v52 = vld [vmem:[%s10561_s1 + $0x168] sm:$0xff] }
  0x20   :  { %8040 = vmatpush3.msra.mxu1 %v6994_v51  ;;  %8041 = vmatprep.mubr.msk.f32.mxu1 %vm38_vm1, %v472_v53  ;;  %v7036_v51 = vld [vmem:[%s10561_s1 + $0x138] sm:$0xff]  ;;  %v7035_v53 = vld [vmem:[%s10561_s1 + $0x130] sm:$0xff] }
  0x21   :  { %8021 = vmatmul.mubr.msk.f32.vlgmr.msra.gmra.mxu0 %vm38_vm1, %v9011_v54  ;;  %8042 = vmatmul.mubr.msk.f32.vlgmr.msra.gmra.mxu1 %vm38_vm1, %v474_v55  ;;  %v7048_v55 = vld [vmem:[%s10561_s1 + $0x160] sm:$0xff]  ;;  %v746_v57 = vsel %vm735_vm6, %v743_v42, %v745_v50 }
  0x22   :  { %8050 = vmatprep.subr.msk.mxu0 %vm94_vm0, %v7012_v58  ;;  %8071 = vmatprep.subr.msk.mxu1 %vm94_vm0, %v7025_v59 }
  0x23   :  { %8051 = vmatpush3.msk.msra.mxu0 %vm94_vm0, %v7012_v58  ;;  %8072 = vmatpush3.msk.msra.mxu1 %vm94_vm0, %v7025_v59  ;;  %v869_v58 = vrot.slane %v8911_v19, 6  ;;  %v870_v59 = vrot.slane %v8913_v20, 6 }
  0x24   :  { %8052 = vmatprep.subr.mxu0 %v7011_v62  ;;  %8073 = vmatprep.subr.mxu1 %v7024_v63 }
  0x25   :  { %8023 = vmatprep.mubr.msk.f32.mxu0 %vm38_vm1, %v9038_v0  ;;  %8044 = vmatprep.mubr.msk.f32.mxu1 %vm38_vm1, %v476_v1  ;;  %v872_v1 = vrot.slane %v8915_v21, 6 }
  0x26   :  { %8053 = vmatpush3.msra.mxu0 %v7011_v62  ;;  %8074 = vmatpush3.msra.mxu1 %v7024_v63  ;;  %v1003_v62 = vrot.slane %v8911_v19, 7  ;;  %v1004_v63 = vrot.slane %v8913_v20, 7  ;;  %v7046_v19 = vld [vmem:[%s10561_s1 + $0x150] sm:$0xff] }
  0x27   :  { %8024 = vmatmul.mubr.msk.f32.gmra.mxu0 %vm38_vm1, %v9044_v2  ;;  %8045 = vmatmul.mubr.msk.f32.gmra.mxu1 %vm38_vm1, %v478_v3  ;;  %v1006_v3 = vrot.slane %v8915_v21, 7 }
  0x28   :  { %8054 = vmatprep.subr.mxu0 %v7010_v6  ;;  %8075 = vmatprep.subr.mxu1 %v7023_v7 }
  0x29   :  { %8055 = vmatpush3.msra.mxu0 %v7010_v6  ;;  %8076 = vmatpush3.msra.mxu1 %v7023_v7  ;;  %v871_v6 = vsel %vm868_vm7, %v869_v58, %v870_v59  ;;  %v1005_v7 = vsel %vm1002_vm8, %v1003_v62, %v1004_v63 }
  0x2a   :  { %8056 = vmatprep.subr.mxu0 %v7009_v8  ;;  %8077 = vmatprep.subr.mxu1 %v7022_v9 }
  0x2b   :  { %8026 = vmatprep.mubr.msk.f32.mxu0 %vm38_vm1, %v9071_v10  ;;  %8047 = vmatprep.mubr.msk.f32.mxu1 %vm38_vm1, %v480_v11  ;;  %v874_v11 = vrot.slane %v8926_v26, 6 }
  0x2c   :  { %8057 = vmatpush3.msra.mxu0 %v7009_v8  ;;  %8078 = vmatpush3.msra.mxu1 %v7022_v9  ;;  %v873_v8 = vsel %vm868_vm7, %v870_v59, %v872_v1  ;;  %v1007_v9 = vsel %vm1002_vm8, %v1004_v63, %v1006_v3 }
  0x2d   :  { %8027 = vmatmul.mubr.msk.f32.gmra.mxu0 %vm38_vm1, %v9048_v4  ;;  %8048 = vmatmul.mubr.msk.f32.gmra.mxu1 %vm38_vm1, %v479_v5  ;;  %v7033_v5 = vld [vmem:[%s10561_s1 + $0x120] sm:$0xff]  ;;  %v875_v22 = vsel %vm868_vm7, %v872_v1, %v874_v11 }
  0x2e   :  { %8058 = vmatprep.subr.mxu0 %v7008_v14  ;;  %8079 = vmatprep.subr.mxu1 %v7021_v15 }
  0x2f   :  { %8059 = vmatpush3.msra.mxu0 %v7008_v14  ;;  %8080 = vmatpush3.msra.mxu1 %v7021_v15  ;;  %v7077_v14 = vld [vmem:[%s10561_s1 + $0x1d8] sm:$0x1f]  ;;  %v876_v15 = vrot.slane %v8928_v27, 6 }
  0x30   :  { %8060 = vmatprep.subr.mxu0 %v7007_v23  ;;  %8081 = vmatprep.subr.mxu1 %v7020_v24 }
  0x31   :  { %8061 = vmatpush3.msra.mxu0 %v7007_v23  ;;  %8062 = vmatprep.mubr.msk.f32.mxu0 %vm38_vm1, %v605_v25  ;;  %v1009_v23 = vsel %vm1002_vm8, %v1006_v3, %v1008_v12  ;;  %v877_v25 = vsel %vm868_vm7, %v874_v11, %v876_v15 }
  0x32   :  { %8082 = vmatpush3.msra.mxu1 %v7020_v24  ;;  %8083 = vmatprep.mubr.msk.f32.mxu1 %vm38_vm1, %v738_v28  ;;  %v9202_v24 = vld [vmem:[#allocation2 + $0x30] sm:$0xf]  ;;  %v1011_v28 = vsel %vm1002_vm8, %v1008_v12, %v1010_v16 }
  0x33   :  { %8063 = vmatmul.mubr.msk.f32.vlgmr.msra.gmra.mxu0 %vm38_vm1, %v607_v29  ;;  %8084 = vmatmul.mubr.msk.f32.vlgmr.msra.gmra.mxu1 %vm38_vm1, %v740_v31  ;;  %v878_v29 = vrot.slane %v8935_v30, 6  ;;  %v1012_v31 = vrot.slane %v8935_v30, 7 }
  0x34   :  { %8092 = vmatprep.subr.msk.mxu0 %vm94_vm0, %v7038_v38  ;;  %8113 = vmatprep.subr.msk.mxu1 %vm94_vm0, %v7051_v39 }
  0x35   :  { %8093 = vmatpush3.msk.msra.mxu0 %vm94_vm0, %v7038_v38  ;;  %8114 = vmatpush3.msk.msra.mxu1 %vm94_vm0, %v7051_v39  ;;  %v1014_v38 = vrot.slane %v9202_v24, 7  ;;  %v7061_v39 = vld [vmem:[%s10561_s1 + $0x190] sm:$0xff]  ;;  %v879_v42 = vsel %vm868_vm7, %v876_v15, %v878_v29 }
  0x36   :  { %8094 = vmatprep.subr.mxu0 %v7037_v43  ;;  %8115 = vmatprep.subr.mxu1 %v7050_v44 }
  0x37   :  { %8065 = vmatprep.mubr.msk.f32.mxu0 %vm38_vm1, %v609_v45  ;;  %8086 = vmatprep.mubr.msk.f32.mxu1 %vm38_vm1, %v742_v46  ;;  %v7060_v45 = vld [vmem:[%s10561_s1 + $0x188] sm:$0xff]  ;;  %v7073_v46 = vld [vmem:[%s10561_s1 + $0x1b8] sm:$0xff] }
  0x38   :  { %8095 = vmatpush3.msra.mxu0 %v7037_v43  ;;  %8116 = vmatpush3.msra.mxu1 %v7050_v44  ;;  %v1013_v43 = vsel %vm1002_vm8, %v1010_v16, %v1012_v31  ;;  %v1015_v44 = vsel %vm1002_vm8, %v1012_v31, %v1014_v38 }
  0x39   :  { %8066 = vmatmul.mubr.msk.f32.gmra.mxu0 %vm38_vm1, %v611_v47  ;;  %8087 = vmatmul.mubr.msk.f32.gmra.mxu1 %vm38_vm1, %v744_v48  ;;  %v7059_v47 = vld [vmem:[%s10561_s1 + $0x180] sm:$0xff]  ;;  %v7072_v48 = vld [vmem:[%s10561_s1 + $0x1b0] sm:$0xff] }
  0x3a   :  { %8096 = vmatprep.subr.mxu0 %v7036_v51  ;;  %8117 = vmatprep.subr.mxu1 %v7049_v52 }
  0x3b   :  { %8097 = vmatpush3.msra.mxu0 %v7036_v51  ;;  %8118 = vmatpush3.msra.mxu1 %v7049_v52 }
  0x3c   :  { %8098 = vmatprep.subr.mxu0 %v7035_v53  ;;  %8119 = vmatprep.subr.mxu1 %v7048_v55 }
  0x3d   :  { %8068 = vmatprep.mubr.msk.f32.mxu0 %vm38_vm1, %v613_v56  ;;  %8089 = vmatprep.mubr.msk.f32.mxu1 %vm38_vm1, %v746_v57 }
  0x3e   :  { %8099 = vmatpush3.msra.mxu0 %v7035_v53  ;;  %8120 = vmatpush3.msra.mxu1 %v7048_v55 }
  0x3f   :  { %8069 = vmatmul.mubr.msk.f32.gmra.mxu0 %vm38_vm1, %v612_v49  ;;  %8090 = vmatmul.mubr.msk.f32.gmra.mxu1 %vm38_vm1, %v745_v50  ;;  %v7090_v49 = vld [vmem:[%s10561_s1 + $0x208] sm:$0x1f]  ;;  %v7089_v50 = vld [vmem:[%s10561_s1 + $0x200] sm:$0xff] }
  0x40   :  { %8100 = vmatprep.subr.mxu0 %v7034_v60  ;;  %8121 = vmatprep.subr.mxu1 %v7047_v61 }
  0x41   :  { %8101 = vmatpush3.msra.mxu0 %v7034_v60  ;;  %8122 = vmatpush3.msra.mxu1 %v7047_v61 }
  0x42   :  { %8102 = vmatprep.subr.mxu0 %v7033_v5  ;;  %8123 = vmatprep.subr.mxu1 %v7046_v19 }
  0x43   :  { %8103 = vmatpush3.msra.mxu0 %v7033_v5  ;;  %8104 = vmatprep.mubr.msk.f32.mxu0 %vm38_vm1, %v871_v6 }
  0x44   :  { %8124 = vmatpush3.msra.mxu1 %v7046_v19  ;;  %8125 = vmatprep.mubr.msk.f32.mxu1 %vm38_vm1, %v1005_v7 }
  0x45   :  { %8105 = vmatmul.mubr.msk.f32.vlgmr.msra.gmra.mxu0 %vm38_vm1, %v873_v8  ;;  %8126 = vmatmul.mubr.msk.f32.vlgmr.msra.gmra.mxu1 %vm38_vm1, %v1007_v9 }
  0x46   :  { %8134 = vmatprep.subr.msk.mxu0 %vm94_vm0, %v7064_v13  ;;  %8155 = vmatprep.subr.msk.mxu1 %vm94_vm0, %v7077_v14 }
  0x47   :  { %8135 = vmatpush3.msk.msra.mxu0 %vm94_vm0, %v7064_v13  ;;  %8156 = vmatpush3.msk.msra.mxu1 %vm94_vm0, %v7077_v14 }
  0x48   :  { %8136 = vmatprep.subr.mxu0 %v7063_v17  ;;  %8157 = vmatprep.subr.mxu1 %v7076_v18 }
  0x49   :  { %8107 = vmatprep.mubr.msk.f32.mxu0 %vm38_vm1, %v875_v22  ;;  %8128 = vmatprep.mubr.msk.f32.mxu1 %vm38_vm1, %v1009_v23 }
  0x4a   :  { %8137 = vmatpush3.msra.mxu0 %v7063_v17  ;;  %8158 = vmatpush3.msra.mxu1 %v7076_v18 }
  0x4b   :  { %8108 = vmatmul.mubr.msk.f32.gmra.mxu0 %vm38_vm1, %v877_v25  ;;  %8129 = vmatmul.mubr.msk.f32.gmra.mxu1 %vm38_vm1, %v1011_v28 }
  0x4c   :  { %8138 = vmatprep.subr.mxu0 %v7062_v33  ;;  %8159 = vmatprep.subr.mxu1 %v7075_v35 }
  0x4d   :  { %8139 = vmatpush3.msra.mxu0 %v7062_v33  ;;  %8160 = vmatpush3.msra.mxu1 %v7075_v35 }
  0x4e   :  { %8140 = vmatprep.subr.mxu0 %v7061_v39  ;;  %8161 = vmatprep.subr.mxu1 %v7074_v40 }
  0x4f   :  { %8110 = vmatprep.mubr.msk.f32.mxu0 %vm38_vm1, %v879_v42  ;;  %8131 = vmatprep.mubr.msk.f32.mxu1 %vm38_vm1, %v1013_v43 }
  0x50   :  { %8141 = vmatpush3.msra.mxu0 %v7061_v39  ;;  %8162 = vmatpush3.msra.mxu1 %v7074_v40 }
  0x51   :  { %8111 = vmatmul.mubr.msk.f32.gmra.mxu0 %vm38_vm1, %v878_v29  ;;  %8132 = vmatmul.mubr.msk.f32.gmra.mxu1 %vm38_vm1, %v1015_v44 }
  0x52   :  { %8142 = vmatprep.subr.mxu0 %v7060_v45  ;;  %8163 = vmatprep.subr.mxu1 %v7073_v46 }
  0x53   :  { %8143 = vmatpush3.msra.mxu0 %v7060_v45  ;;  %8164 = vmatpush3.msra.mxu1 %v7073_v46 }
  0x54   :  { %8144 = vmatprep.subr.mxu0 %v7059_v47  ;;  %8165 = vmatprep.subr.mxu1 %v7072_v48 }
  0x55   :  { %8145 = vmatpush3.msra.mxu0 %v7059_v47  ;;  %8146 = vmatprep.mubr.msk.f32.mxu0 %vm38_vm1, %v8913_v20  ;;  %v1248_v20 = vrot.slane %v9202_v24, 1 }
  0x56   :  { %8166 = vmatpush3.msra.mxu1 %v7072_v48  ;;  %8167 = vmatprep.mubr.msk.f32.mxu1 %vm38_vm1, %v8939_v32  ;;  %v7087_v32 = vld [vmem:[%s10561_s1 + $0x1f0] sm:$0xff] }
  0x57   :  { %8147 = vmatmul.mubr.msk.f32.vlgmr.msra.gmra.mxu0 %vm38_vm1, %v8915_v21  ;;  %8168 = vmatmul.mubr.msk.f32.vlgmr.msra.gmra.mxu1 %vm38_vm1, %v8949_v34  ;;  %v7088_v21 = vld [vmem:[%s10561_s1 + $0x1f8] sm:$0xff]  ;;  %v7085_v34 = vld [vmem:[%s10561_s1 + $0x1e0] sm:$0xff] }
  0x58   :  { %8176 = vmatprep.subr.msk.mxu0 %vm94_vm0, %v7090_v49  ;;  %8769 = vmatprep.subr.msk.mxu1 %vm94_vm0, %v7090_v49 }
  0x59   :  { %8177 = vmatpush3.msk.msra.mxu0 %vm94_vm0, %v7090_v49  ;;  %8775 = vmatpush3.msk.msra.mxu1 %vm94_vm0, %v7090_v49 }
  0x5a   :  { %8178 = vmatprep.subr.mxu0 %v7089_v50  ;;  %8770 = vmatprep.subr.mxu1 %v7089_v50 }
  0x5b   :  { %8149 = vmatprep.mubr.msk.f32.mxu0 %vm38_vm1, %v8926_v26  ;;  %8170 = vmatprep.mubr.msk.f32.mxu1 %vm38_vm1, %v8963_v37  ;;  %v1249_v26 = vsel %vm204_vm3, %v8957_v36, %v1248_v20  ;;  %v1363_v36 = vrot.slane %v9202_v24, 2  ;;  %v1499_v37 = vld [vmem:[%s10563_s3 + $0x8] sm:$0xff] }
  0x5c   :  { %8179 = vmatpush3.msra.mxu0 %v7089_v50  ;;  %8776 = vmatpush3.msra.mxu1 %v7089_v50 }
  0x5d   :  { %8150 = vmatmul.mubr.msk.f32.gmra.mxu0 %vm38_vm1, %v8928_v27  ;;  %8171 = vmatmul.mubr.msk.f32.gmra.mxu1 %vm38_vm1, %v8980_v41  ;;  %v7086_v27 = vld [vmem:[%s10561_s1 + $0x1e8] sm:$0xff]  ;;  %v1498_v41 = vld [vmem:[%s10563_s3] sm:$0xff] }
  0x5e   :  { %8180 = vmatprep.subr.mxu0 %v7088_v21  ;;  %8771 = vmatprep.subr.mxu1 %v7088_v21 }
  0x5f   :  { %8181 = vmatpush3.msra.mxu0 %v7088_v21  ;;  %8777 = vmatpush3.msra.mxu1 %v7088_v21 }
  0x60   :  { %8182 = vmatprep.subr.mxu0 %v7087_v32  ;;  %8772 = vmatprep.subr.mxu1 %v7087_v32 }
  0x61   :  { %8152 = vmatprep.mubr.msk.f32.mxu0 %vm38_vm1, %v8935_v30  ;;  %8173 = vmatprep.mubr.msk.f32.mxu1 %vm38_vm1, %v1249_v26  ;;  %v1364_v30 = vsel %vm337_vm4, %v9048_v4, %v1363_v36  ;;  %v9325_v4 = vld [vmem:[%s10563_s3 + $0x38] sm:$0xff] }
  0x62   :  { %8183 = vmatpush3.msra.mxu0 %v7087_v32  ;;  %8778 = vmatpush3.msra.mxu1 %v7087_v32 }
  0x63   :  { %8153 = vmatmul.mubr.msk.f32.gmra.mxu0 %vm38_vm1, %v9202_v24  ;;  %8174 = vmatmul.mubr.msk.f32.gmra.mxu1 %vm38_vm1, %v1248_v20 }
  0x64   :  { %8184 = vmatprep.subr.mxu0 %v7086_v27  ;;  %8773 = vmatprep.subr.mxu1 %v7086_v27 }
  0x65   :  { %8185 = vmatpush3.msra.mxu0 %v7086_v27  ;;  %8779 = vmatpush3.msra.mxu1 %v7086_v27 }
  0x66   :  { %8186 = vmatprep.subr.mxu0 %v7085_v34  ;;  %8774 = vmatprep.subr.mxu1 %v7085_v34 }
  0x67   :  { %8187 = vmatpush3.msra.mxu0 %v7085_v34  ;;  %8780 = vmatpush3.msra.mxu1 %v7085_v34 }
  0x68   :  { %8188 = vmatprep.mubr.msk.f32.mxu0 %vm38_vm1, %v9011_v54  ;;  %8191 = vmatprep.mubr.msk.f32.mxu1 %vm38_vm1, %v9044_v2  ;;  %v7106_v54 = vld [vmem:[%s10563_s3 + $0x18] sm:$0xff]  ;;  %v9319_v2 = vld [vmem:[%s10563_s3 + $0x28] sm:$0xff] }
  0x69   :  { %8189 = vmatmul.mubr.msk.f32.vlgmr.msra.gmra.mxu0 %vm38_vm1, %v9038_v0  ;;  %8192 = vmatmul.mubr.msk.f32.vlgmr.msra.gmra.mxu1 %vm38_vm1, %v9071_v10  ;;  %v7105_v0 = vld [vmem:[%s10563_s3 + $0x10] sm:$0xff]  ;;  %v6960_v10 = vld [vmem:[%s10564_s2] ss:$0 sm:$0xff] }
  0x6a   :  { %8194 = vmatprep.mubr.msk.f32.mxu1 %vm38_vm1, %v1364_v30  ;;  %8197 = vmatprep.subr.mxu1 %v1499_v37 }
  0x6b   :  { %8198 = vmatpush3.msra.mxu1 %v1499_v37  ;;  %8210 = vmatprep.subr.mxu0 %v7106_v54 }
  0x6c   :  { %8199 = vmatprep.subr.mxu1 %v1498_v41  ;;  %8211 = vmatpush3.msra.mxu0 %v7106_v54 }
  0x6d   :  { %8195 = vmatmul.mubr.msk.f32.gmra.mxu1 %vm38_vm1, %v1363_v36  ;;  %8212 = vmatprep.subr.mxu0 %v7105_v0  ;;  %vm6952_vm1 = vcmask 17408  }
  0x6e   :  { %8200 = vmatpush3.msra.mxu1 %v1498_v41  ;;  %8213 = vmatpush3.msra.mxu0 %v7105_v0 }
  0x6f   :  { %8223 = vmatprep.subr.mxu1 %v9319_v2  ;;  %8236 = vmatprep.subr.mxu0 %v9325_v4 }
  0xcf   :  { %v7980_v51 = vpop.f32.mrf.mxu0 }
  0xd0   :  { %v193_v52 = vadd.f32 %v7980_v51, %v6960_v10 }
  0xd1   :  { %v164_v53 = vpop.f32.mrf.mxu0 }
  0xd2   :  { %v8001_v55 = vpop.f32.mrf.mxu1  ;;  %v192_v50 = vadd.f32 %v6960_v10, %v164_v53 }
  0xd3   :  { %v326_v56 = vadd.f32 %v8001_v55, %v193_v52 }
  0xd4   :  { %v297_v57 = vpop.f32.mrf.mxu1  ;;  %v7983_v58 = vpop.f32.mrf.mxu0 }
  0xd5   :  { %v194_v59 = vadd.f32 %v7983_v58, %v6960_v10  ;;  %v325_v26 = vadd.f32 %v297_v57, %v192_v50 }
  0xd6   :  { %v8004_v60 = vpop.f32.mrf.mxu1  ;;  %v174_v61 = vpop.f32.mrf.mxu0 }
  0xd7   :  { %v327_v62 = vadd.f32 %v8004_v60, %v194_v59 }
  0xd8   :  { %v307_v63 = vpop.f32.mrf.mxu1 }
  0xdb   :  { %v7986_v1 = vpop.f32.mrf.mxu0  ;;  %v8007_v3 = vpop.f32.mrf.mxu1 }
  0xdc   :  { %v196_v20 = vadd.f32 %v7986_v1, %v6960_v10 }
  0xdd   :  { %v183_v5 = vpop.f32.mrf.mxu0  ;;  %v316_v19 = vpop.f32.mrf.mxu1 }
  0xde   :  { %v195_v27 = vadd.f32 %v6960_v10, %v183_v5  ;;  %v329_v41 = vadd.f32 %v8007_v3, %v196_v20 }
  0xe0   :  { %v328_v0 = vadd.f32 %v316_v19, %v195_v27 }
  0xe1   :  { %v8022_v6 = vpop.f32.mrf.mxu0  ;;  %v8043_v7 = vpop.f32.mrf.mxu1 }
  0xe2   :  { %v459_v34 = vadd.f32 %v8022_v6, %v326_v56 }
  0xe3   :  { %v430_v8 = vpop.f32.mrf.mxu0  ;;  %v562_v9 = vpop.f32.mrf.mxu1 }
  0xe4   :  { %v458_v54 = vadd.f32 %v430_v8, %v325_v26  ;;  %v591_v51 = vadd.f32 %v8043_v7, %v459_v34 }
  0xe6   :  { %v590_v60 = vadd.f32 %v562_v9, %v458_v54 }
  0xe7   :  { %v8025_v11 = vpop.f32.mrf.mxu0  ;;  %v8046_v12 = vpop.f32.mrf.mxu1 }
  0xe8   :  { %v460_v36 = vadd.f32 %v8025_v11, %v327_v62 }
  0xe9   :  { %v440_v13 = vpop.f32.mrf.mxu0  ;;  %v572_v14 = vpop.f32.mrf.mxu1 }
  0xea   :  { %v592_v52 = vadd.f32 %v8046_v12, %v460_v36 }
  0xed   :  { %v8028_v15 = vpop.f32.mrf.mxu0  ;;  %v8049_v16 = vpop.f32.mrf.mxu1 }
  0xee   :  { %v462_v55 = vadd.f32 %v8028_v15, %v329_v41 }
  0xef   :  { %v449_v17 = vpop.f32.mrf.mxu0  ;;  %v581_v18 = vpop.f32.mrf.mxu1 }
  0xf0   :  { %v461_v61 = vadd.f32 %v449_v17, %v328_v0  ;;  %v594_v57 = vadd.f32 %v8049_v16, %v462_v55 }
  0xf2   :  { %v593_v56 = vadd.f32 %v581_v18, %v461_v61 }
  0xf3   :  { %v8064_v22 = vpop.f32.mrf.mxu0  ;;  %v8085_v23 = vpop.f32.mrf.mxu1 }
  0xf4   :  { %v724_v53 = vadd.f32 %v8064_v22, %v591_v51 }
  0xf5   :  { %v695_v24 = vpop.f32.mrf.mxu0  ;;  %v828_v25 = vpop.f32.mrf.mxu1 }
  0xf6   :  { %v723_v10 = vadd.f32 %v695_v24, %v590_v60  ;;  %v857_v62 = vadd.f32 %v8085_v23, %v724_v53 }
  0xf8   :  { %v856_v19 = vadd.f32 %v828_v25, %v723_v10 }
  0xf9   :  { %v8067_v28 = vpop.f32.mrf.mxu0  ;;  %v8088_v29 = vpop.f32.mrf.mxu1 }
  0xfa   :  { %v725_v63 = vadd.f32 %v8067_v28, %v592_v52 }
  0xfb   :  { %v705_v31 = vpop.f32.mrf.mxu0  ;;  %v838_v33 = vpop.f32.mrf.mxu1 }
  0xfc   :  { %v858_v5 = vadd.f32 %v8088_v29, %v725_v63 }
  0xff   :  { %v8070_v35 = vpop.f32.mrf.mxu0  ;;  %v8091_v38 = vpop.f32.mrf.mxu1 }
 0x100   :  { %v727_v6 = vadd.f32 %v8070_v35, %v594_v57  ;;  %v7113_v57 = vld [vmem:[%s10563_s3 + $0x20] sm:$0xff] }
 0x101   :  { %v714_v39 = vpop.f32.mrf.mxu0  ;;  %v847_v40 = vpop.f32.mrf.mxu1 }
 0x102   :  { %v726_v7 = vadd.f32 %v714_v39, %v593_v56  ;;  %v860_v9 = vadd.f32 %v8091_v38, %v727_v6 }
 0x104   :  { %v859_v22 = vadd.f32 %v847_v40, %v726_v7 }
 0x105   :  { %v8106_v42 = vpop.f32.mrf.mxu0  ;;  %v8127_v43 = vpop.f32.mrf.mxu1 }
 0x106   :  { %v990_v11 = vadd.f32 %v8106_v42, %v857_v62 }
 0x107   :  { %v961_v44 = vpop.f32.mrf.mxu0  ;;  %v1097_v45 = vpop.f32.mrf.mxu1 }
 0x108   :  { %v989_v17 = vadd.f32 %v961_v44, %v856_v19  ;;  %v1126_v28 = vadd.f32 %v8127_v43, %v990_v11  ;;  %v7121_v19 = vld [vmem:[%s10563_s3 + $0x30] sm:$0xff] }
 0x10a   :  { %v1125_v18 = vadd.f32 %v1097_v45, %v989_v17  ;;  %v7138_v17 = vld [vmem:[%s10563_s3 + $0x58] sm:$0xff] }
 0x10b   :  { %v8109_v46 = vpop.f32.mrf.mxu0  ;;  %v8130_v47 = vpop.f32.mrf.mxu1 }
 0x10c   :  { %v991_v12 = vadd.f32 %v8109_v46, %v858_v5 }
 0x10d   :  { %v971_v48 = vpop.f32.mrf.mxu0  ;;  %v1107_v49 = vpop.f32.mrf.mxu1 }
 0x10e   :  { %v1127_v31 = vadd.f32 %v8130_v47, %v991_v12 }
 0x111   :  { %v8112_v21 = vpop.f32.mrf.mxu0  ;;  %v8133_v32 = vpop.f32.mrf.mxu1 }
 0x112   :  { %v993_v33 = vadd.f32 %v8112_v21, %v860_v9 }
 0x113   :  { %v980_v30 = vpop.f32.mrf.mxu0  ;;  %v1116_v37 = vpop.f32.mrf.mxu1 }
 0x114   :  { %v992_v23 = vadd.f32 %v980_v30, %v859_v22  ;;  %v1129_v25 = vadd.f32 %v8133_v32, %v993_v33 }
 0x116   :  { %v1128_v42 = vadd.f32 %v1116_v37, %v992_v23  ;;  %v7129_v23 = vld [vmem:[%s10563_s3 + $0x40] sm:$0xff] }
 0x117   :  { %v8148_v58 = vpop.f32.mrf.mxu0  ;;  %v8169_v59 = vpop.f32.mrf.mxu1 }
 0x118   :  { %v1237_v29 = vadd.f32 %v8148_v58, %v1126_v28 }
 0x119   :  { %v1208_v1 = vpop.f32.mrf.mxu0  ;;  %v1323_v13 = vpop.f32.mrf.mxu1 }
 0x11a   :  { %v1236_v39 = vadd.f32 %v1208_v1, %v1125_v18  ;;  %v1352_v46 = vadd.f32 %v8169_v59, %v1237_v29 }
 0x11c   :  { %v1351_v40 = vadd.f32 %v1323_v13, %v1236_v39 }
 0x11d   :  { %v8151_v3 = vpop.f32.mrf.mxu0  ;;  %v8172_v8 = vpop.f32.mrf.mxu1 }
 0x11e   :  { %v1238_v35 = vadd.f32 %v8151_v3, %v1127_v31 }
 0x11f   :  { %v1218_v14 = vpop.f32.mrf.mxu0  ;;  %v1333_v15 = vpop.f32.mrf.mxu1 }
 0x120   :  { %v1353_v50 = vadd.f32 %v8172_v8, %v1238_v35  ;;  %v7130_v8 = vld [vmem:[%s10563_s3 + $0x48] sm:$0xff] }
 0x123   :  { %v8154_v16 = vpop.f32.mrf.mxu0  ;;  %v8175_v24 = vpop.f32.mrf.mxu1 }
 0x124   :  { %v1240_v20 = vadd.f32 %v8154_v16, %v1129_v25 }
 0x125   :  { %v1227_v48 = vpop.f32.mrf.mxu0  ;;  %v1342_v49 = vpop.f32.mrf.mxu1 }
 0x126   :  { %v1239_v43 = vadd.f32 %v1227_v48, %v1128_v42  ;;  %v1355_v27 = vadd.f32 %v8175_v24, %v1240_v20 }
 0x128   :  { %v1354_v41 = vadd.f32 %v1342_v49, %v1239_v43 }
 0x129   :  { %v8190_v38 = vpop.f32.mrf.mxu0  ;;  %v8193_v44 = vpop.f32.mrf.mxu1 }
 0x12a   :  { %v1467_v47 = vadd.f32 %v8190_v38, %v1352_v46  ;;  %v1468_v21 = vadd.f32 %v8193_v44, %v1353_v50  ;;  %v7146_v46 = vld [vmem:[%s10563_s3 + $0x68] sm:$0xff]  ;;  %v7137_v50 = vld [vmem:[%s10563_s3 + $0x50] sm:$0xff] }
 0x12b   :  { %v1438_v45 = vpop.f32.mrf.mxu0  ;;  %v1448_v26 = vpop.f32.mrf.mxu1 }
 0x12c   :  { %v1472_v34 = vmax.f32 %v1467_v47, 0.0  ;;  %v1473_v36 = vmax.f32 %v1468_v21, 0.0  ;;  %v1466_v30 = vadd.f32 %v1438_v45, %v1351_v40  ;;  %v7154_v45 = vld [vmem:[%s10563_s3 + $0x78] sm:$0xff] }
 0x12d   :  { %v8196_v32 = vpop.f32.mrf.mxu1 }
 0x12e   :  { %1478 = vst.msk [vmem:[#allocation2 + $0xd] sm:$0xff] %vm1476_vm9, %v1472_v34  ;;  %v1471_v37 = vmax.f32 %v1466_v30, 0.0  ;;  %v1470_v54 = vadd.f32 %v8196_v32, %v1355_v27 }
 0x12f   :  { %1480 = vst.msk [vmem:[#allocation2 + $0x1d] sm:$0xfc] %vm1479_vm10, %v1473_v36  ;;  %v1457_v0 = vpop.f32.mrf.mxu1 }
 0x130   :  { %1477 = vst.msk [vmem:[#allocation2 + $0x5] sm:$0xff] %vm1476_vm9, %v1471_v37  ;;  %v1475_v51 = vmax.f32 %v1470_v54, 0.0  ;;  %v1469_v52 = vadd.f32 %v1457_v0, %v1354_v41  ;;  %v7145_v54 = vld [vmem:[%s10563_s3 + $0x60] sm:$0xff] }
 0x132   :  { %1483 = vst.msk [vmem:[#allocation2 + $0x2d] sm:$0x3] %vm1482_vm11, %v1475_v51  ;;  %v1474_v55 = vmax.f32 %v1469_v52, 0.0 }
 0x134   :  { %1481 = vst.msk [vmem:[#allocation2 + $0x25] sm:$0xff] %vm1476_vm9, %v1474_v55 }
 0x135   :  { %v9334_v58 = vld [vmem:[#allocation2 + $0x10] sm:$0xff] }
 0x136   :  { %v9336_v59 = vld [vmem:[#allocation2 + $0x18] sm:$0xff]  ;;  %v1623_v1 = vrot.slane %v9334_v58, 1  ;;  %v1748_v22 = vrot.slane %v9334_v58, 2  ;;  %v1873_v31 = vrot.slane %v9334_v58, 3  ;;  %v1998_v27 = vrot.slane %v9334_v58, 4 }
 0x137   :  { %v9338_v60 = vld [vmem:[#allocation2 + $0x8] sm:$0xff]  ;;  %v9340_v61 = vld [vmem:[#allocation2] sm:$0xff]  ;;  %v1625_v13 = vrot.slane %v9336_v59, 1  ;;  %v1750_v28 = vrot.slane %v9336_v59, 2  ;;  %v1875_v18 = vrot.slane %v9336_v59, 3  ;;  %v2000_v34 = vrot.slane %v9336_v59, 4 }
 0x138   :  { %8201 = vmatprep.mubr.msk.f32.mxu1 %vm1476_vm9, %v9340_v61  ;;  %v1620_v53 = vrot.slane %v9340_v61, 1  ;;  %v1621_v63 = vrot.slane %v9338_v60, 1  ;;  %v1745_v7 = vrot.slane %v9340_v61, 2  ;;  %v1746_v11 = vrot.slane %v9338_v60, 2 }
 0x139   :  { %8202 = vmatmul.mubr.msk.f32.vlgmr.msra.gmra.mxu1 %vm1476_vm9, %v9338_v60  ;;  %v9368_v6 = vsel %vm204_vm3, %v1623_v1, %v1625_v13  ;;  %v1870_v15 = vrot.slane %v9340_v61, 3  ;;  %v1871_v9 = vrot.slane %v9338_v60, 3  ;;  %v9427_v29 = vsel %vm337_vm4, %v1748_v22, %v1750_v28 }
 0x13a   :  { %8204 = vmatprep.mubr.msk.f32.mxu1 %vm1476_vm9, %v9334_v58  ;;  %8224 = vmatpush3.msra.mxu1 %v9319_v2  ;;  %v1622_v10 = vsel %vm204_vm3, %v1620_v53, %v1621_v63  ;;  %v9358_v56 = vsel %vm204_vm3, %v1621_v63, %v1623_v1  ;;  %v9415_v33 = vsel %vm337_vm4, %v1746_v11, %v1748_v22  ;;  %v1995_v38 = vrot.slane %v9340_v61, 4 }
 0x13b   :  { %v9360_v62 = vld [vmem:[#allocation2 + $0x20] sm:$0xff]  ;;  %v9362_v5 = vld [vmem:[#allocation2 + $0x28] sm:$0xff]  ;;  %8214 = vmatprep.mubr.msk.f32.mxu0 %vm1476_vm9, %v1622_v10  ;;  %8225 = vmatprep.subr.mxu1 %v7113_v57  ;;  %v1872_v16 = vsel %vm94_vm0, %v1870_v15, %v1871_v9  ;;  %v1874_v48 = vsel %vm94_vm0, %v1871_v9, %v1873_v31  ;;  %v1876_v39 = vsel %vm94_vm0, %v1873_v31, %v1875_v18  ;;  %v1996_v44 = vrot.slane %v9338_v60, 4  ;;  %v7170_v9 = vld [vmem:[%s10563_s3 + $0x98] sm:$0xff] }
 0x13c   :  { %8215 = vmatmul.mubr.msk.f32.vlgmr.msra.gmra.mxu0 %vm1476_vm9, %v9358_v56  ;;  %v1627_v2 = vrot.slane %v9360_v62, 1  ;;  %8226 = vmatpush3.msra.mxu1 %v7113_v57  ;;  %v9372_v3 = vrot.slane %v9362_v5, 1  ;;  %v1752_v24 = vrot.slane %v9360_v62, 2  ;;  %v9430_v35 = vrot.slane %v9362_v5, 2  ;;  %v7153_v57 = vld [vmem:[%s10563_s3 + $0x70] sm:$0xff] }
 0x13d   :  { %8205 = vmatmul.mubr.msk.f32.gmra.mxu1 %vm1476_vm9, %v9336_v59  ;;  %8217 = vmatprep.mubr.msk.f32.mxu0 %vm1476_vm9, %v9368_v6  ;;  %v1877_v49 = vrot.slane %v9360_v62, 3  ;;  %v1879_v42 = vrot.slane %v9362_v5, 3  ;;  %v2120_v47 = vrot.slane %v9340_v61, 5  ;;  %v2121_v21 = vrot.slane %v9338_v60, 5 }
 0x13e   :  { %8207 = vmatprep.mubr.msk.f32.mxu1 %vm1476_vm9, %v9360_v62  ;;  %v9389_v12 = vsel %vm204_vm3, %v1625_v13, %v1627_v2  ;;  %8237 = vmatpush3.msra.mxu0 %v9325_v4  ;;  %v9396_v14 = vsel %vm204_vm3, %v1627_v2, %v9372_v3  ;;  %v1747_v4 = vsel %vm337_vm4, %v1745_v7, %v1746_v11  ;;  %v2123_v32 = vrot.slane %v9334_v58, 5  ;;  %v7162_v13 = vld [vmem:[%s10563_s3 + $0x88] sm:$0xff] }
 0x13f   :  { %8249 = vmatprep.subr.mxu1 %v7130_v8  ;;  %8238 = vmatprep.subr.mxu0 %v7121_v19  ;;  %v9438_v25 = vsel %vm337_vm4, %v1750_v28, %v1752_v24  ;;  %v9453_v20 = vsel %vm337_vm4, %v1752_v24, %v9430_v35  ;;  %v1878_v40 = vsel %vm94_vm0, %v1875_v18, %v1877_v49  ;;  %v2002_v41 = vrot.slane %v9360_v62, 4  ;;  %v7161_v18 = vld [vmem:[%s10563_s3 + $0x80] sm:$0xff] }
 0x140   :  { %8218 = vmatmul.mubr.msk.f32.gmra.mxu0 %vm1476_vm9, %v9389_v12  ;;  %v1880_v43 = vsel %vm94_vm0, %v1877_v49, %v1879_v42  ;;  %v1997_v26 = vsel %vm602_vm5, %v1995_v38, %v1996_v44  ;;  %v1999_v36 = vsel %vm602_vm5, %v1996_v44, %v1998_v27  ;;  %v2122_v30 = vsel %vm735_vm6, %v2120_v47, %v2121_v21  ;;  %v1490_v38 = vld [vmem:[#allocation2 + $0x30] sm:$0xf]  ;;  %v7178_v44 = vld [vmem:[%s10563_s3 + $0xa8] sm:$0xff] }
 0x141   :  { %8208 = vmatmul.mubr.msk.f32.gmra.mxu1 %vm1476_vm9, %v9362_v5  ;;  %8220 = vmatprep.mubr.msk.f32.mxu0 %vm1476_vm9, %v9396_v14  ;;  %v2125_v37 = vrot.slane %v9336_v59, 5  ;;  %v2001_v0 = vsel %vm602_vm5, %v1998_v27, %v2000_v34  ;;  %v2004_v51 = vrot.slane %v9362_v5, 4  ;;  %v2124_v52 = vsel %vm735_vm6, %v2121_v21, %v2123_v32  ;;  %v7177_v27 = vld [vmem:[%s10563_s3 + $0xa0] sm:$0xff] }
 0x142   :  { %8227 = vmatprep.mubr.msk.f32.mxu1 %vm1476_vm9, %v1747_v4  ;;  %8239 = vmatpush3.msra.mxu0 %v7121_v19  ;;  %v2127_v55 = vrot.slane %v9360_v62, 5  ;;  %v2003_v53 = vsel %vm602_vm5, %v2000_v34, %v2002_v41  ;;  %v2129_v1 = vrot.slane %v9362_v5, 5  ;;  %v2245_v2 = vrot.slane %v9340_v61, 6 }
 0x143   :  { %8262 = vmatprep.subr.mxu0 %v7138_v17  ;;  %v2126_v63 = vsel %vm735_vm6, %v2123_v32, %v2125_v37  ;;  %v2005_v10 = vsel %vm602_vm5, %v2002_v41, %v2004_v51  ;;  %v2371_v11 = vrot.slane %v9340_v61, 7  ;;  %v2372_v15 = vrot.slane %v9338_v60, 7 }
 0x144   :  { %8221 = vmatmul.mubr.msk.f32.gmra.mxu0 %vm1476_vm9, %v9372_v3  ;;  %v2128_v19 = vsel %vm735_vm6, %v2125_v37, %v2127_v55  ;;  %v2130_v7 = vsel %vm735_vm6, %v2127_v55, %v2129_v1  ;;  %v2248_v4 = vrot.slane %v9334_v58, 6  ;;  %v2250_v22 = vrot.slane %v9336_v59, 6 }
 0x145   :  { %8228 = vmatmul.mubr.msk.f32.vlgmr.msra.gmra.mxu1 %vm1476_vm9, %v9415_v33  ;;  %8240 = vmatprep.mubr.msk.f32.mxu0 %vm1476_vm9, %v1872_v16  ;;  %v2374_v61 = vrot.slane %v9334_v58, 7  ;;  %v2373_v31 = vsel %vm1002_vm8, %v2371_v11, %v2372_v15  ;;  %v2252_v16 = vrot.slane %v9360_v62, 6  ;;  %v2376_v24 = vrot.slane %v9336_v59, 7 }
 0x146   :  { %8230 = vmatprep.mubr.msk.f32.mxu1 %vm1476_vm9, %v9427_v29  ;;  %8250 = vmatpush3.msra.mxu1 %v7130_v8  ;;  %v2246_v8 = vrot.slane %v9338_v60, 6  ;;  %v2382_v21 = vrot.slane %v1490_v38, 7 }
 0x147   :  { %8251 = vmatprep.subr.mxu1 %v7129_v23  ;;  %v2375_v49 = vsel %vm1002_vm8, %v2372_v15, %v2374_v61  ;;  %v7098_v15 = vld [vmem:[%s10566_s4] ss:$0 sm:$0xff] }
 0x148   :  { %8241 = vmatmul.mubr.msk.f32.vlgmr.msra.gmra.mxu0 %vm1476_vm9, %v1874_v48  ;;  %8252 = vmatpush3.msra.mxu1 %v7129_v23  ;;  %v2249_v28 = vsel %vm868_vm7, %v2246_v8, %v2248_v4  ;;  %v2251_v23 = vsel %vm868_vm7, %v2248_v4, %v2250_v22  ;;  %v2254_v48 = vrot.slane %v9362_v5, 6 }
 0x149   :  { %8231 = vmatmul.mubr.msk.f32.gmra.mxu1 %vm1476_vm9, %v9438_v25  ;;  %8243 = vmatprep.mubr.msk.f32.mxu0 %vm1476_vm9, %v1876_v39  ;;  %v2378_v39 = vrot.slane %v9360_v62, 7 }
 0x14a   :  { %8233 = vmatprep.mubr.msk.f32.mxu1 %vm1476_vm9, %v9453_v20  ;;  %8263 = vmatpush3.msra.mxu0 %v7138_v17  ;;  %v2247_v17 = vsel %vm868_vm7, %v2245_v2, %v2246_v8 }
 0x14b   :  { %8275 = vmatprep.subr.mxu1 %v7146_v46  ;;  %8264 = vmatprep.subr.mxu0 %v7137_v50  ;;  %v2379_v47 = vsel %vm1002_vm8, %v2376_v24, %v2378_v39 }
 0x14c   :  { %8244 = vmatmul.mubr.msk.f32.gmra.mxu0 %vm1476_vm9, %v1878_v40  ;;  %v7169_v40 = vld [vmem:[%s10563_s3 + $0x90] sm:$0xff] }
 0x14d   :  { %8234 = vmatmul.mubr.msk.f32.gmra.mxu1 %vm1476_vm9, %v9430_v35  ;;  %8246 = vmatprep.mubr.msk.f32.mxu0 %vm1476_vm9, %v1880_v43  ;;  %v2255_v43 = vsel %vm868_vm7, %v2252_v16, %v2254_v48 }
 0x14e   :  { %8253 = vmatprep.mubr.msk.f32.mxu1 %vm1476_vm9, %v1997_v26  ;;  %8265 = vmatpush3.msra.mxu0 %v7137_v50  ;;  %v2380_v50 = vrot.slane %v9362_v5, 7 }
 0x14f   :  { %8288 = vmatprep.subr.mxu0 %v7154_v45 }
 0x150   :  { %8247 = vmatmul.mubr.msk.f32.gmra.mxu0 %vm1476_vm9, %v1879_v42  ;;  %v2253_v42 = vsel %vm868_vm7, %v2250_v22, %v2252_v16  ;;  %v2383_v26 = vsel %vm1002_vm8, %v2380_v50, %v2382_v21 }
 0x151   :  { %8254 = vmatmul.mubr.msk.f32.vlgmr.msra.gmra.mxu1 %vm1476_vm9, %v1999_v36  ;;  %8266 = vmatprep.mubr.msk.f32.mxu0 %vm1476_vm9, %v2122_v30 }
 0x152   :  { %8256 = vmatprep.mubr.msk.f32.mxu1 %vm1476_vm9, %v2001_v0  ;;  %8276 = vmatpush3.msra.mxu1 %v7146_v46  ;;  %v2377_v46 = vsel %vm1002_vm8, %v2374_v61, %v2376_v24 }
 0x153   :  { %8277 = vmatprep.subr.mxu1 %v7145_v54 }
 0x154   :  { %8267 = vmatmul.mubr.msk.f32.vlgmr.msra.gmra.mxu0 %vm1476_vm9, %v2124_v52  ;;  %8278 = vmatpush3.msra.mxu1 %v7145_v54 }
 0x155   :  { %8257 = vmatmul.mubr.msk.f32.gmra.mxu1 %vm1476_vm9, %v2003_v53  ;;  %8269 = vmatprep.mubr.msk.f32.mxu0 %vm1476_vm9, %v2126_v63 }
 0x156   :  { %8259 = vmatprep.mubr.msk.f32.mxu1 %vm1476_vm9, %v2005_v10  ;;  %8289 = vmatpush3.msra.mxu0 %v7154_v45  ;;  %v2381_v45 = vsel %vm1002_vm8, %v2378_v39, %v2380_v50 }
 0x157   :  { %8301 = vmatprep.subr.mxu1 %v7162_v13  ;;  %8290 = vmatprep.subr.mxu0 %v7153_v57 }
 0x158   :  { %8270 = vmatmul.mubr.msk.f32.gmra.mxu0 %vm1476_vm9, %v2128_v19 }
 0x159   :  { %8260 = vmatmul.mubr.msk.f32.gmra.mxu1 %vm1476_vm9, %v2004_v51  ;;  %8272 = vmatprep.mubr.msk.f32.mxu0 %vm1476_vm9, %v2130_v7 }
 0x15a   :  { %8279 = vmatprep.mubr.msk.f32.mxu1 %vm1476_vm9, %v2247_v17  ;;  %8291 = vmatpush3.msra.mxu0 %v7153_v57 }
 0x15b   :  { %8314 = vmatprep.subr.mxu0 %v7170_v9 }
 0x15c   :  { %8273 = vmatmul.mubr.msk.f32.gmra.mxu0 %vm1476_vm9, %v2129_v1 }
 0x15d   :  { %8280 = vmatmul.mubr.msk.f32.vlgmr.msra.gmra.mxu1 %vm1476_vm9, %v2249_v28  ;;  %8292 = vmatprep.mubr.msk.f32.mxu0 %vm1476_vm9, %v2373_v31 }
 0x15e   :  { %8282 = vmatprep.mubr.msk.f32.mxu1 %vm1476_vm9, %v2251_v23  ;;  %8302 = vmatpush3.msra.mxu1 %v7162_v13 }
 0x15f   :  { %8303 = vmatprep.subr.mxu1 %v7161_v18 }
 0x160   :  { %8293 = vmatmul.mubr.msk.f32.vlgmr.msra.gmra.mxu0 %vm1476_vm9, %v2375_v49  ;;  %8304 = vmatpush3.msra.mxu1 %v7161_v18 }
 0x161   :  { %8283 = vmatmul.mubr.msk.f32.gmra.mxu1 %vm1476_vm9, %v2253_v42  ;;  %8295 = vmatprep.mubr.msk.f32.mxu0 %vm1476_vm9, %v2377_v46 }
 0x162   :  { %8285 = vmatprep.mubr.msk.f32.mxu1 %vm1476_vm9, %v2255_v43  ;;  %8315 = vmatpush3.msra.mxu0 %v7170_v9 }
 0x163   :  { %8327 = vmatprep.subr.mxu1 %v7178_v44  ;;  %8316 = vmatprep.subr.mxu0 %v7169_v40 }
 0x164   :  { %8296 = vmatmul.mubr.msk.f32.gmra.mxu0 %vm1476_vm9, %v2379_v47 }
 0x165   :  { %8286 = vmatmul.mubr.msk.f32.gmra.mxu1 %vm1476_vm9, %v2254_v48  ;;  %8298 = vmatprep.mubr.msk.f32.mxu0 %vm1476_vm9, %v2381_v45 }
 0x166   :  { %8305 = vmatprep.mubr.msk.f32.mxu1 %vm1476_vm9, %v9338_v60  ;;  %8317 = vmatpush3.msra.mxu0 %v7169_v40  ;;  %v2602_v60 = vrot.slane %v1490_v38, 1 }
 0x168   :  { %8299 = vmatmul.mubr.msk.f32.gmra.mxu0 %vm1476_vm9, %v2383_v26 }
 0x169   :  { %8306 = vmatmul.mubr.msk.f32.vlgmr.msra.gmra.mxu1 %vm1476_vm9, %v9334_v58  ;;  %8318 = vmatprep.mubr.msk.f32.mxu0 %vm1476_vm9, %v9358_v56  ;;  %v2603_v58 = vsel %vm204_vm3, %v9372_v3, %v2602_v60  ;;  %v9610_v3 = vld [vmem:[%s10565_s5 + $0x28] sm:$0x3] }
 0x16a   :  { %8308 = vmatprep.mubr.msk.f32.mxu1 %vm1476_vm9, %v9336_v59  ;;  %8328 = vmatpush3.msra.mxu1 %v7178_v44  ;;  %v2710_v59 = vrot.slane %v1490_v38, 2 }
 0x16b   :  { %8329 = vmatprep.subr.mxu1 %v7177_v27 }
 0x16c   :  { %8319 = vmatmul.mubr.msk.f32.vlgmr.msra.gmra.mxu0 %vm1476_vm9, %v9368_v6  ;;  %8330 = vmatpush3.msra.mxu1 %v7177_v27  ;;  %v2711_v56 = vsel %vm337_vm4, %v9430_v35, %v2710_v59  ;;  %v7194_v6 = vld [vmem:[%s10565_s5 + $0x18] sm:$0x3] }
 0x16d   :  { %8309 = vmatmul.mubr.msk.f32.gmra.mxu1 %vm1476_vm9, %v9360_v62  ;;  %8321 = vmatprep.mubr.msk.f32.mxu0 %vm1476_vm9, %v9389_v12  ;;  %v2843_v62 = vld [vmem:[%s10565_s5 + $0x8] sm:$0x3]  ;;  %v7193_v12 = vld [vmem:[%s10565_s5 + $0x10] sm:$0xff] }
 0x16e   :  { %8311 = vmatprep.mubr.msk.f32.mxu1 %vm1476_vm9, %v9362_v5  ;;  %8340 = vmatprep.subr.msk.mxu0 %vm868_vm7, %v2843_v62  ;;  %v2842_v5 = vld [vmem:[%s10565_s5] sm:$0xff] }
 0x16f   :  { %8341 = vmatpush3.msk.msra.mxu0 %vm868_vm7, %v2843_v62  ;;  %8353 = vmatprep.subr.msk.mxu1 %vm868_vm7, %v7194_v6 }
 0x170   :  { %8322 = vmatmul.mubr.msk.f32.gmra.mxu0 %vm1476_vm9, %v9396_v14  ;;  %8342 = vmatprep.subr.mxu0 %v2842_v5  ;;  %v9621_v14 = vld [vmem:[%s10565_s5 + $0x38] sm:$0x3] }
 0x171   :  { %8312 = vmatmul.mubr.msk.f32.gmra.mxu1 %vm1476_vm9, %v1490_v38  ;;  %8324 = vmatprep.mubr.msk.f32.mxu0 %vm1476_vm9, %v2603_v58 }
 0x172   :  { %8331 = vmatprep.mubr.msk.f32.mxu1 %vm1476_vm9, %v9415_v33  ;;  %8343 = vmatpush3.msra.mxu0 %v2842_v5 }
 0x173   :  { %8366 = vmatprep.subr.msk.mxu0 %vm868_vm7, %v9610_v3 }
 0x174   :  { %8325 = vmatmul.mubr.msk.f32.gmra.mxu0 %vm1476_vm9, %v2602_v60 }
 0x175   :  { %8332 = vmatmul.mubr.msk.f32.vlgmr.msra.gmra.mxu1 %vm1476_vm9, %v9427_v29 }
 0x176   :  { %8334 = vmatprep.mubr.msk.f32.mxu1 %vm1476_vm9, %v9438_v25  ;;  %8354 = vmatpush3.msk.msra.mxu1 %vm868_vm7, %v7194_v6 }
 0x177   :  { %8355 = vmatprep.subr.mxu1 %v7193_v12 }
 0x178   :  { %8356 = vmatpush3.msra.mxu1 %v7193_v12 }
 0x179   :  { %8335 = vmatmul.mubr.msk.f32.gmra.mxu1 %vm1476_vm9, %v9453_v20  ;;  %8379 = vmatprep.subr.msk.mxu1 %vm868_vm7, %v9621_v14 }
 0x17a   :  { %8337 = vmatprep.mubr.msk.f32.mxu1 %vm1476_vm9, %v2711_v56 }
 0x17d   :  { %8338 = vmatmul.mubr.msk.f32.gmra.mxu1 %vm1476_vm9, %v2710_v59 }
 0x1f9   :  { %v8203_v33 = vpop.f32.mrf.mxu1 }
 0x1fa   :  { %v1613_v22 = vadd.f32 %v8203_v33, %v7098_v15 }
 0x1fb   :  { %v1584_v29 = vpop.f32.mrf.mxu1 }
 0x1fc   :  { %v8216_v35 = vpop.f32.mrf.mxu0  ;;  %v1612_v31 = vadd.f32 %v7098_v15, %v1584_v29 }
 0x1fd   :  { %v8206_v25 = vpop.f32.mrf.mxu1  ;;  %v1738_v18 = vadd.f32 %v8216_v35, %v1613_v22 }
 0x1fe   :  { %v1709_v20 = vpop.f32.mrf.mxu0  ;;  %v1614_v23 = vadd.f32 %v8206_v25, %v7098_v15 }
 0x1ff   :  { %v1594_v34 = vpop.f32.mrf.mxu1  ;;  %v1737_v39 = vadd.f32 %v1709_v20, %v1612_v31 }
 0x200   :  { %v8219_v36 = vpop.f32.mrf.mxu0 }
 0x201   :  { %v8209_v30 = vpop.f32.mrf.mxu1  ;;  %v1739_v38 = vadd.f32 %v8219_v36, %v1614_v23 }
 0x202   :  { %v1719_v32 = vpop.f32.mrf.mxu0  ;;  %v1616_v44 = vadd.f32 %v8209_v30, %v7098_v15 }
 0x203   :  { %v1603_v41 = vpop.f32.mrf.mxu1 }
 0x204   :  { %v8222_v37 = vpop.f32.mrf.mxu0  ;;  %v1615_v47 = vadd.f32 %v7098_v15, %v1603_v41 }
 0x205   :  { %v8229_v54 = vpop.f32.mrf.mxu1  ;;  %v1741_v58 = vadd.f32 %v8222_v37, %v1616_v44 }
 0x206   :  { %v1728_v0 = vpop.f32.mrf.mxu0  ;;  %v1863_v42 = vadd.f32 %v8229_v54, %v1738_v18 }
 0x207   :  { %v1834_v51 = vpop.f32.mrf.mxu1  ;;  %v1740_v5 = vadd.f32 %v1728_v0, %v1615_v47 }
 0x208   :  { %v8242_v52 = vpop.f32.mrf.mxu0  ;;  %v1862_v40 = vadd.f32 %v1834_v51, %v1737_v39 }
 0x209   :  { %v8232_v55 = vpop.f32.mrf.mxu1  ;;  %v1988_v45 = vadd.f32 %v8242_v52, %v1863_v42 }
 0x20a   :  { %v1959_v53 = vpop.f32.mrf.mxu0  ;;  %v1864_v26 = vadd.f32 %v8232_v55, %v1739_v38 }
 0x20b   :  { %v1844_v63 = vpop.f32.mrf.mxu1  ;;  %v1987_v59 = vadd.f32 %v1959_v53, %v1862_v40 }
 0x20c   :  { %v8245_v1 = vpop.f32.mrf.mxu0 }
 0x20d   :  { %v8235_v13 = vpop.f32.mrf.mxu1  ;;  %v1989_v12 = vadd.f32 %v8245_v1, %v1864_v26 }
 0x20e   :  { %v1969_v57 = vpop.f32.mrf.mxu0  ;;  %v1866_v33 = vadd.f32 %v8235_v13, %v1741_v58 }
 0x20f   :  { %v1853_v10 = vpop.f32.mrf.mxu1 }
 0x210   :  { %v8248_v2 = vpop.f32.mrf.mxu0  ;;  %v1865_v25 = vadd.f32 %v1853_v10, %v1740_v5 }
 0x211   :  { %v8255_v8 = vpop.f32.mrf.mxu1  ;;  %v1991_v41 = vadd.f32 %v8248_v2, %v1866_v33 }
 0x212   :  { %v1978_v19 = vpop.f32.mrf.mxu0  ;;  %v2113_v56 = vadd.f32 %v8255_v8, %v1988_v45 }
 0x213   :  { %v2084_v7 = vpop.f32.mrf.mxu1  ;;  %v1990_v37 = vadd.f32 %v1978_v19, %v1865_v25 }
 0x214   :  { %v8268_v11 = vpop.f32.mrf.mxu0  ;;  %v2112_v29 = vadd.f32 %v2084_v7, %v1987_v59 }
 0x215   :  { %v8258_v9 = vpop.f32.mrf.mxu1  ;;  %v2238_v34 = vadd.f32 %v8268_v11, %v2113_v56 }
 0x216   :  { %v2209_v17 = vpop.f32.mrf.mxu0  ;;  %v2114_v36 = vadd.f32 %v8258_v9, %v1989_v12 }
 0x217   :  { %v2094_v4 = vpop.f32.mrf.mxu1  ;;  %v2237_v54 = vadd.f32 %v2209_v17, %v2112_v29 }
 0x218   :  { %v8271_v61 = vpop.f32.mrf.mxu0 }
 0x219   :  { %v8261_v28 = vpop.f32.mrf.mxu1  ;;  %v2239_v53 = vadd.f32 %v8271_v61, %v2114_v36 }
 0x21a   :  { %v2219_v16 = vpop.f32.mrf.mxu0  ;;  %v2116_v63 = vadd.f32 %v8261_v28, %v1991_v41  ;;  %v7202_v41 = vld [vmem:[%s10565_s5 + $0x20] sm:$0xff] }
 0x21b   :  { %v2103_v24 = vpop.f32.mrf.mxu1 }
 0x21c   :  { %v8274_v48 = vpop.f32.mrf.mxu0  ;;  %v2115_v1 = vadd.f32 %v2103_v24, %v1990_v37 }
 0x21d   :  { %v8281_v49 = vpop.f32.mrf.mxu1  ;;  %v2241_v11 = vadd.f32 %v8274_v48, %v2116_v63 }
 0x21e   :  { %v2228_v46 = vpop.f32.mrf.mxu0  ;;  %v2363_v51 = vadd.f32 %v8281_v49, %v2238_v34 }
 0x21f   :  { %v2334_v50 = vpop.f32.mrf.mxu1  ;;  %v2240_v2 = vadd.f32 %v2228_v46, %v2115_v1 }
 0x220   :  { %v8294_v43 = vpop.f32.mrf.mxu0  ;;  %v2362_v0 = vadd.f32 %v2334_v50, %v2237_v54 }
 0x221   :  { %v8284_v21 = vpop.f32.mrf.mxu1  ;;  %v2491_v8 = vadd.f32 %v8294_v43, %v2363_v51 }
 0x222   :  { %v2462_v27 = vpop.f32.mrf.mxu0  ;;  %v2364_v7 = vadd.f32 %v8284_v21, %v2239_v53 }
 0x223   :  { %v2344_v60 = vpop.f32.mrf.mxu1  ;;  %v2490_v9 = vadd.f32 %v2462_v27, %v2362_v0 }
 0x224   :  { %v8297_v62 = vpop.f32.mrf.mxu0 }
 0x225   :  { %v8287_v6 = vpop.f32.mrf.mxu1  ;;  %v2492_v31 = vadd.f32 %v8297_v62, %v2364_v7 }
 0x226   :  { %v2472_v35 = vpop.f32.mrf.mxu0  ;;  %v2366_v16 = vadd.f32 %v8287_v6, %v2241_v11 }
 0x227   :  { %v2353_v20 = vpop.f32.mrf.mxu1 }
 0x228   :  { %v8300_v30 = vpop.f32.mrf.mxu0  ;;  %v2365_v61 = vadd.f32 %v2353_v20, %v2240_v2 }
 0x229   :  { %v8307_v32 = vpop.f32.mrf.mxu1  ;;  %v2494_v39 = vadd.f32 %v8300_v30, %v2366_v16 }
 0x22a   :  { %v2481_v52 = vpop.f32.mrf.mxu0  ;;  %v2595_v4 = vadd.f32 %v8307_v32, %v2491_v8 }
 0x22b   :  { %v2566_v55 = vpop.f32.mrf.mxu1  ;;  %v2493_v38 = vadd.f32 %v2481_v52, %v2365_v61 }
 0x22c   :  { %v8320_v57 = vpop.f32.mrf.mxu0  ;;  %v2594_v19 = vadd.f32 %v2566_v55, %v2490_v9  ;;  %v7221_v55 = vld [vmem:[%s10565_s5 + $0x48] sm:$0x3] }
 0x22d   :  { %v8310_v13 = vpop.f32.mrf.mxu1  ;;  %v2703_v23 = vadd.f32 %v8320_v57, %v2595_v4  ;;  %v7230_v57 = vld [vmem:[%s10565_s5 + $0x58] sm:$0x3] }
 0x22e   :  { %v2674_v10 = vpop.f32.mrf.mxu0  ;;  %v2596_v49 = vadd.f32 %v8310_v13, %v2492_v31  ;;  %v7220_v31 = vld [vmem:[%s10565_s5 + $0x40] sm:$0xff] }
 0x22f   :  { %v2576_v15 = vpop.f32.mrf.mxu1  ;;  %v2702_v42 = vadd.f32 %v2674_v10, %v2594_v19 }
 0x230   :  { %v8323_v22 = vpop.f32.mrf.mxu0 }
 0x231   :  { %v8313_v17 = vpop.f32.mrf.mxu1  ;;  %v2704_v40 = vadd.f32 %v8323_v22, %v2596_v49 }
 0x232   :  { %v2684_v18 = vpop.f32.mrf.mxu0  ;;  %v2598_v43 = vadd.f32 %v8313_v17, %v2494_v39 }
 0x233   :  { %v2585_v28 = vpop.f32.mrf.mxu1  ;;  %v7239_v18 = vld [vmem:[%s10565_s5 + $0x68] sm:$0x3] }
 0x234   :  { %v8326_v44 = vpop.f32.mrf.mxu0  ;;  %v2597_v45 = vadd.f32 %v2585_v28, %v2493_v38 }
 0x235   :  { %v8333_v24 = vpop.f32.mrf.mxu1  ;;  %v2706_v59 = vadd.f32 %v8326_v44, %v2598_v43  ;;  %v7229_v44 = vld [vmem:[%s10565_s5 + $0x50] sm:$0xff]  ;;  %v7248_v43 = vld [vmem:[%s10565_s5 + $0x78] sm:$0x3] }
 0x236   :  { %v2811_v50 = vadd.f32 %v8333_v24, %v2703_v23  ;;  %v2693_v60 = vpop.f32.mrf.mxu0 }
 0x237   :  { %v2782_v48 = vpop.f32.mrf.mxu1  ;;  %v2705_v5 = vadd.f32 %v2693_v60, %v2597_v45 }
 0x238   :  { %v2816_v46 = vmax.f32 %v2811_v50, 0.0  ;;  %v2810_v47 = vadd.f32 %v2782_v48, %v2702_v42 }
 0x239   :  { %v8336_v21 = vpop.f32.mrf.mxu1 }
 0x23a   :  { %2822 = vst.msk [vmem:[#allocation2 + $0xd] sm:$0xff] %vm2820_vm12, %v2816_v46  ;;  %v2815_v26 = vmax.f32 %v2810_v47, 0.0  ;;  %v2812_v27 = vadd.f32 %v8336_v21, %v2704_v40 }
 0x23b   :  { %v2792_v58 = vpop.f32.mrf.mxu1 }
 0x23c   :  { %2821 = vst.msk [vmem:[#allocation2 + $0x5] sm:$0xff] %vm2820_vm12, %v2815_v26  ;;  %v2817_v56 = vmax.f32 %v2812_v27, 0.0 }
 0x23d   :  { %v8339_v62 = vpop.f32.mrf.mxu1 }
 0x23e   :  { %2824 = vst.msk [vmem:[#allocation2 + $0x1d] sm:$0xfc] %vm2823_vm13, %v2817_v56  ;;  %v2814_v6 = vadd.f32 %v8339_v62, %v2706_v59  ;;  %v7238_v56 = vld [vmem:[%s10565_s5 + $0x60] sm:$0xff] }
 0x23f   :  { %v2801_v12 = vpop.f32.mrf.mxu1 }
 0x240   :  { %v2819_v33 = vmax.f32 %v2814_v6, 0.0  ;;  %v2813_v29 = vadd.f32 %v2801_v12, %v2705_v5  ;;  %v7257_v6 = vld [vmem:[%s10565_s5 + $0x88] sm:$0x3] }
 0x241   :  { %v9631_v35 = vld [vmem:[#allocation2 + $0x10] sm:$0xff] }
 0x242   :  { %2827 = vst.msk [vmem:[#allocation2 + $0x2d] sm:$0x3] %vm2826_vm14, %v2819_v33  ;;  %v2818_v25 = vmax.f32 %v2813_v29, 0.0  ;;  %v2970_v32 = vrot.slane %v9631_v35, 1  ;;  %v3098_v9 = vrot.slane %v9631_v35, 2  ;;  %v3226_v49 = vrot.slane %v9631_v35, 3 }
 0x243   :  { %v9634_v20 = vld [vmem:[#allocation2] sm:$0xff]  ;;  %v9636_v34 = vld [vmem:[#allocation2 + $0x8] sm:$0xff]  ;;  %v3354_v45 = vrot.slane %v9631_v35, 4 }
 0x244   :  { %2825 = vst.msk [vmem:[#allocation2 + $0x25] sm:$0xff] %vm2820_vm12, %v2818_v25  ;;  %8344 = vmatprep.mubr.msk.f32.mxu0 %vm2820_vm12, %v9634_v20  ;;  %v2967_v36 = vrot.slane %v9634_v20, 1  ;;  %v2968_v30 = vrot.slane %v9636_v34, 1  ;;  %v3095_v63 = vrot.slane %v9634_v20, 2  ;;  %v3096_v0 = vrot.slane %v9636_v34, 2 }
 0x245   :  { %8345 = vmatmul.mubr.msk.f32.vlgmr.msra.gmra.mxu0 %vm2820_vm12, %v9636_v34  ;;  %v9649_v54 = vld [vmem:[#allocation2 + $0x18] sm:$0xff]  ;;  %v3223_v4 = vrot.slane %v9634_v20, 3  ;;  %v3224_v22 = vrot.slane %v9636_v34, 3  ;;  %v3351_v39 = vrot.slane %v9634_v20, 4  ;;  %v3352_v42 = vrot.slane %v9636_v34, 4 }
 0x246   :  { %8347 = vmatprep.mubr.msk.f32.mxu0 %vm2820_vm12, %v9631_v35  ;;  %8367 = vmatpush3.msk.msra.mxu0 %vm868_vm7, %v9610_v3  ;;  %v2969_v51 = vsel %vm204_vm3, %v2967_v36, %v2968_v30  ;;  %v9657_v52 = vsel %vm204_vm3, %v2968_v30, %v2970_v32  ;;  %v2972_v37 = vrot.slane %v9649_v54, 1  ;;  %v7211_v3 = vld [vmem:[%s10565_s5 + $0x30] sm:$0xff]  ;;  %v3100_v10 = vrot.slane %v9649_v54, 2 }
 0x247   :  { %8357 = vmatprep.mubr.msk.f32.mxu1 %vm2820_vm12, %v2969_v51  ;;  %8368 = vmatprep.subr.mxu0 %v7202_v41  ;;  %v9715_v2 = vsel %vm337_vm4, %v3096_v0, %v3098_v9  ;;  %v3225_v61 = vsel %vm94_vm0, %v3223_v4, %v3224_v22  ;;  %v3228_v28 = vrot.slane %v9649_v54, 3  ;;  %v3227_v50 = vsel %vm94_vm0, %v3224_v22, %v3226_v49 }
 0x248   :  { %8358 = vmatmul.mubr.msk.f32.vlgmr.msra.gmra.mxu1 %vm2820_vm12, %v9657_v52  ;;  %v9667_v53 = vsel %vm204_vm3, %v2970_v32, %v2972_v37  ;;  %8369 = vmatpush3.msra.mxu0 %v7202_v41  ;;  %v9724_v16 = vsel %vm337_vm4, %v3098_v9, %v3100_v10  ;;  %v3353_v46 = vsel %vm602_vm5, %v3351_v39, %v3352_v42  ;;  %v3356_v47 = vrot.slane %v9649_v54, 4 }
 0x249   :  { %8348 = vmatmul.mubr.msk.f32.gmra.mxu0 %vm2820_vm12, %v9649_v54  ;;  %8360 = vmatprep.mubr.msk.f32.mxu1 %vm2820_vm12, %v9667_v53  ;;  %v3229_v48 = vsel %vm94_vm0, %v3226_v49, %v3228_v28  ;;  %v3479_v27 = vrot.slane %v9634_v20, 5  ;;  %v3480_v60 = vrot.slane %v9636_v34, 5  ;;  %v3355_v58 = vsel %vm602_vm5, %v3352_v42, %v3354_v45 }
 0x24a   :  { %8380 = vmatpush3.msk.msra.mxu1 %vm868_vm7, %v9621_v14  ;;  %8392 = vmatprep.subr.msk.mxu0 %vm868_vm7, %v7221_v55  ;;  %v3097_v14 = vsel %vm337_vm4, %v3095_v63, %v3096_v0  ;;  %v3357_v62 = vsel %vm602_vm5, %v3354_v45, %v3356_v47  ;;  %v3484_v33 = vrot.slane %v9649_v54, 5  ;;  %v3482_v25 = vrot.slane %v9631_v35, 5  ;;  %v7266_v63 = vld [vmem:[%s10565_s5 + $0x98] sm:$0x3] }
 0x24b   :  { %v9684_v1 = vld [vmem:[#allocation2 + $0x20] sm:$0xff]  ;;  %v9686_v13 = vld [vmem:[#allocation2 + $0x28] sm:$0xff]  ;;  %8381 = vmatprep.subr.mxu1 %v7211_v3  ;;  %v3481_v12 = vsel %vm735_vm6, %v3479_v27, %v3480_v60  ;;  %v3607_v30 = vrot.slane %v9634_v20, 6  ;;  %v3608_v32 = vrot.slane %v9636_v34, 6  ;;  %v3736_v9 = vrot.slane %v9634_v20, 7 }
 0x24c   :  { %8350 = vmatprep.mubr.msk.f32.mxu0 %vm2820_vm12, %v9684_v1  ;;  %v2974_v8 = vrot.slane %v9684_v1, 1  ;;  %v9692_v7 = vrot.slane %v9686_v13, 1  ;;  %8382 = vmatpush3.msra.mxu1 %v7211_v3  ;;  %v3102_v17 = vrot.slane %v9684_v1, 2  ;;  %v9727_v19 = vrot.slane %v9686_v13, 2 }
 0x24d   :  { %8351 = vmatmul.mubr.msk.f32.gmra.mxu0 %vm2820_vm12, %v9686_v13  ;;  %8405 = vmatprep.subr.msk.mxu1 %vm868_vm7, %v7230_v57  ;;  %v3230_v38 = vrot.slane %v9684_v1, 3  ;;  %v3232_v40 = vrot.slane %v9686_v13, 3  ;;  %v3358_v59 = vrot.slane %v9684_v1, 4  ;;  %v3360_v5 = vrot.slane %v9686_v13, 4 }
 0x24e   :  { %8370 = vmatprep.mubr.msk.f32.mxu0 %vm2820_vm12, %v3097_v14  ;;  %v9701_v15 = vsel %vm204_vm3, %v2972_v37, %v2974_v8  ;;  %v9705_v11 = vsel %vm204_vm3, %v2974_v8, %v9692_v7  ;;  %v9741_v23 = vsel %vm337_vm4, %v3100_v10, %v3102_v17  ;;  %v9748_v24 = vsel %vm337_vm4, %v3102_v17, %v9727_v19  ;;  %v7247_v37 = vld [vmem:[%s10565_s5 + $0x70] sm:$0xff] }
 0x24f   :  { %8361 = vmatmul.mubr.msk.f32.gmra.mxu1 %vm2820_vm12, %v9701_v15  ;;  %v3231_v21 = vsel %vm94_vm0, %v3228_v28, %v3230_v38  ;;  %v3233_v26 = vsel %vm94_vm0, %v3230_v38, %v3232_v40  ;;  %v3359_v29 = vsel %vm602_vm5, %v3356_v47, %v3358_v59  ;;  %v3361_v36 = vsel %vm602_vm5, %v3358_v59, %v3360_v5 }
 0x250   :  { %8363 = vmatprep.mubr.msk.f32.mxu1 %vm2820_vm12, %v9705_v11  ;;  %v3483_v41 = vsel %vm735_vm6, %v3480_v60, %v3482_v25  ;;  %v3486_v51 = vrot.slane %v9684_v1, 5  ;;  %v3488_v3 = vrot.slane %v9686_v13, 5  ;;  %v3609_v0 = vsel %vm868_vm7, %v3607_v30, %v3608_v32 }
 0x251   :  { %8371 = vmatmul.mubr.msk.f32.vlgmr.msra.gmra.mxu0 %vm2820_vm12, %v9715_v2  ;;  %v3610_v14 = vrot.slane %v9631_v35, 6  ;;  %v3737_v4 = vrot.slane %v9636_v34, 7  ;;  %v3614_v17 = vrot.slane %v9684_v1, 6  ;;  %v3616_v20 = vrot.slane %v9686_v13, 6 }
 0x252   :  { %8373 = vmatprep.mubr.msk.f32.mxu0 %vm2820_vm12, %v9724_v16  ;;  %8393 = vmatpush3.msk.msra.mxu0 %vm868_vm7, %v7221_v55  ;;  %v3485_v55 = vsel %vm735_vm6, %v3482_v25, %v3484_v33  ;;  %v3487_v8 = vsel %vm735_vm6, %v3484_v33, %v3486_v51  ;;  %v3489_v10 = vsel %vm735_vm6, %v3486_v51, %v3488_v3  ;;  %v3741_v49 = vrot.slane %v9649_v54, 7 }
 0x253   :  { %8364 = vmatmul.mubr.msk.f32.gmra.mxu1 %vm2820_vm12, %v9692_v7  ;;  %8394 = vmatprep.subr.mxu0 %v7220_v31  ;;  %v3611_v22 = vsel %vm868_vm7, %v3608_v32, %v3610_v14  ;;  %v3738_v28 = vsel %vm1002_vm8, %v3736_v9, %v3737_v4  ;;  %v3739_v42 = vrot.slane %v9631_v35, 7 }
 0x254   :  { %8383 = vmatprep.mubr.msk.f32.mxu1 %vm2820_vm12, %v3225_v61  ;;  %8395 = vmatpush3.msra.mxu0 %v7220_v31  ;;  %v7256_v31 = vld [vmem:[%s10565_s5 + $0x80] sm:$0xff]  ;;  %v7275_v61 = vld [vmem:[%s10565_s5 + $0xa8] sm:$0x3] }
 0x255   :  { %8374 = vmatmul.mubr.msk.f32.gmra.mxu0 %vm2820_vm12, %v9741_v23  ;;  %8418 = vmatprep.subr.msk.mxu0 %vm868_vm7, %v7239_v18  ;;  %v3740_v38 = vsel %vm1002_vm8, %v3737_v4, %v3739_v42 }
 0x256   :  { %8376 = vmatprep.mubr.msk.f32.mxu0 %vm2820_vm12, %v9748_v24 }
 0x257   :  { %8384 = vmatmul.mubr.msk.f32.vlgmr.msra.gmra.mxu1 %vm2820_vm12, %v3227_v50  ;;  %v3617_v50 = vsel %vm868_vm7, %v3614_v17, %v3616_v20 }
 0x258   :  { %8386 = vmatprep.mubr.msk.f32.mxu1 %vm2820_vm12, %v3229_v48  ;;  %8406 = vmatpush3.msk.msra.mxu1 %vm868_vm7, %v7230_v57  ;;  %v3612_v57 = vrot.slane %v9649_v54, 6  ;;  %v7265_v48 = vld [vmem:[%s10565_s5 + $0x90] sm:$0xff] }
 0x259   :  { %8377 = vmatmul.mubr.msk.f32.gmra.mxu0 %vm2820_vm12, %v9727_v19  ;;  %8407 = vmatprep.subr.mxu1 %v7229_v44 }
 0x25a   :  { %8396 = vmatprep.mubr.msk.f32.mxu0 %vm2820_vm12, %v3353_v46  ;;  %8408 = vmatpush3.msra.mxu1 %v7229_v44  ;;  %v3615_v39 = vsel %vm868_vm7, %v3612_v57, %v3614_v17  ;;  %v3743_v44 = vrot.slane %v9684_v1, 7  ;;  %v2834_v46 = vld [vmem:[#allocation2 + $0x30] sm:$0xf]  ;;  %v7185_v17 = vld [vmem:[%s10568_s6] ss:$0 sm:$0xff] }
 0x25b   :  { %8387 = vmatmul.mubr.msk.f32.gmra.mxu1 %vm2820_vm12, %v3231_v21  ;;  %8431 = vmatprep.subr.msk.mxu1 %vm868_vm7, %v7248_v43  ;;  %v3747_v21 = vrot.slane %v2834_v46, 7 }
 0x25c   :  { %8389 = vmatprep.mubr.msk.f32.mxu1 %vm2820_vm12, %v3233_v26  ;;  %v3744_v47 = vsel %vm1002_vm8, %v3741_v49, %v3743_v44  ;;  %v7274_v26 = vld [vmem:[%s10565_s5 + $0xa0] sm:$0xff] }
 0x25d   :  { %8397 = vmatmul.mubr.msk.f32.vlgmr.msra.gmra.mxu0 %vm2820_vm12, %v3355_v58 }
 0x25e   :  { %8399 = vmatprep.mubr.msk.f32.mxu0 %vm2820_vm12, %v3357_v62  ;;  %8419 = vmatpush3.msk.msra.mxu0 %vm868_vm7, %v7239_v18  ;;  %v3613_v18 = vsel %vm868_vm7, %v3610_v14, %v3612_v57 }
 0x25f   :  { %8390 = vmatmul.mubr.msk.f32.gmra.mxu1 %vm2820_vm12, %v3232_v40  ;;  %8420 = vmatprep.subr.mxu0 %v7238_v56  ;;  %v3742_v40 = vsel %vm1002_vm8, %v3739_v42, %v3741_v49 }
 0x260   :  { %8409 = vmatprep.mubr.msk.f32.mxu1 %vm2820_vm12, %v3481_v12  ;;  %8421 = vmatpush3.msra.mxu0 %v7238_v56 }
 0x261   :  { %8400 = vmatmul.mubr.msk.f32.gmra.mxu0 %vm2820_vm12, %v3359_v29  ;;  %8444 = vmatprep.subr.msk.mxu0 %vm868_vm7, %v7257_v6 }
 0x262   :  { %8402 = vmatprep.mubr.msk.f32.mxu0 %vm2820_vm12, %v3361_v36 }
 0x263   :  { %8410 = vmatmul.mubr.msk.f32.vlgmr.msra.gmra.mxu1 %vm2820_vm12, %v3483_v41 }
 0x264   :  { %8412 = vmatprep.mubr.msk.f32.mxu1 %vm2820_vm12, %v3485_v55  ;;  %8432 = vmatpush3.msk.msra.mxu1 %vm868_vm7, %v7248_v43  ;;  %v3745_v43 = vrot.slane %v9686_v13, 7 }
 0x265   :  { %8403 = vmatmul.mubr.msk.f32.gmra.mxu0 %vm2820_vm12, %v3360_v5  ;;  %8433 = vmatprep.subr.mxu1 %v7247_v37 }
 0x266   :  { %8422 = vmatprep.mubr.msk.f32.mxu0 %vm2820_vm12, %v3609_v0  ;;  %8434 = vmatpush3.msra.mxu1 %v7247_v37  ;;  %v3746_v45 = vsel %vm1002_vm8, %v3743_v44, %v3745_v43 }
 0x267   :  { %8413 = vmatmul.mubr.msk.f32.gmra.mxu1 %vm2820_vm12, %v3487_v8  ;;  %8457 = vmatprep.subr.msk.mxu1 %vm868_vm7, %v7266_v63 }
 0x268   :  { %8415 = vmatprep.mubr.msk.f32.mxu1 %vm2820_vm12, %v3489_v10 }
 0x269   :  { %8423 = vmatmul.mubr.msk.f32.vlgmr.msra.gmra.mxu0 %vm2820_vm12, %v3611_v22 }
 0x26a   :  { %8425 = vmatprep.mubr.msk.f32.mxu0 %vm2820_vm12, %v3613_v18  ;;  %8445 = vmatpush3.msk.msra.mxu0 %vm868_vm7, %v7257_v6 }
 0x26b   :  { %8416 = vmatmul.mubr.msk.f32.gmra.mxu1 %vm2820_vm12, %v3488_v3  ;;  %8446 = vmatprep.subr.mxu0 %v7256_v31 }
 0x26c   :  { %8435 = vmatprep.mubr.msk.f32.mxu1 %vm2820_vm12, %v3738_v28  ;;  %8447 = vmatpush3.msra.mxu0 %v7256_v31 }
 0x26d   :  { %8426 = vmatmul.mubr.msk.f32.gmra.mxu0 %vm2820_vm12, %v3615_v39  ;;  %8470 = vmatprep.subr.msk.mxu0 %vm868_vm7, %v7275_v61 }
 0x26e   :  { %8428 = vmatprep.mubr.msk.f32.mxu0 %vm2820_vm12, %v3617_v50 }
 0x26f   :  { %8436 = vmatmul.mubr.msk.f32.vlgmr.msra.gmra.mxu1 %vm2820_vm12, %v3740_v38 }
 0x270   :  { %8438 = vmatprep.mubr.msk.f32.mxu1 %vm2820_vm12, %v3742_v40  ;;  %8458 = vmatpush3.msk.msra.mxu1 %vm868_vm7, %v7266_v63 }
 0x271   :  { %8429 = vmatmul.mubr.msk.f32.gmra.mxu0 %vm2820_vm12, %v3616_v20  ;;  %8459 = vmatprep.subr.mxu1 %v7265_v48 }
 0x272   :  { %8448 = vmatprep.mubr.msk.f32.mxu0 %vm2820_vm12, %v9636_v34  ;;  %8460 = vmatpush3.msra.mxu1 %v7265_v48  ;;  %v3748_v34 = vsel %vm1002_vm8, %v3745_v43, %v3747_v21 }
 0x273   :  { %8439 = vmatmul.mubr.msk.f32.gmra.mxu1 %vm2820_vm12, %v3744_v47 }
 0x274   :  { %8441 = vmatprep.mubr.msk.f32.mxu1 %vm2820_vm12, %v3746_v45 }
 0x275   :  { %8449 = vmatmul.mubr.msk.f32.vlgmr.msra.gmra.mxu0 %vm2820_vm12, %v9631_v35  ;;  %v3973_v35 = vrot.slane %v2834_v46, 1 }
 0x276   :  { %8451 = vmatprep.mubr.msk.f32.mxu0 %vm2820_vm12, %v9649_v54  ;;  %8471 = vmatpush3.msk.msra.mxu0 %vm868_vm7, %v7275_v61 }
 0x277   :  { %8442 = vmatmul.mubr.msk.f32.gmra.mxu1 %vm2820_vm12, %v3748_v34  ;;  %8472 = vmatprep.subr.mxu0 %v7274_v26  ;;  %v3974_v54 = vsel %vm204_vm3, %v9692_v7, %v3973_v35  ;;  %v7292_v7 = vld [vmem:[%s10567_s7 + $0x18] sm:$0x3] }
 0x278   :  { %8461 = vmatprep.mubr.msk.f32.mxu1 %vm2820_vm12, %v9657_v52  ;;  %8473 = vmatpush3.msra.mxu0 %v7274_v26  ;;  %v4084_v52 = vrot.slane %v2834_v46, 2 }
 0x279   :  { %8452 = vmatmul.mubr.msk.f32.gmra.mxu0 %vm2820_vm12, %v9684_v1  ;;  %v4217_v1 = vld [vmem:[%s10567_s7 + $0x8] sm:$0x3]  ;;  %8496 = vmatprep.subr.msk.mxu0 %vm868_vm7, %v7292_v7 }
 0x27a   :  { %8454 = vmatprep.mubr.msk.f32.mxu0 %vm2820_vm12, %v9686_v13  ;;  %8483 = vmatprep.subr.msk.mxu1 %vm868_vm7, %v4217_v1  ;;  %v4216_v13 = vld [vmem:[%s10567_s7] sm:$0xff] }
 0x27b   :  { %8462 = vmatmul.mubr.msk.f32.vlgmr.msra.gmra.mxu1 %vm2820_vm12, %v9667_v53  ;;  %v4085_v53 = vsel %vm337_vm4, %v9727_v19, %v4084_v52 }
 0x27c   :  { %8464 = vmatprep.mubr.msk.f32.mxu1 %vm2820_vm12, %v9701_v15  ;;  %8484 = vmatpush3.msk.msra.mxu1 %vm868_vm7, %v4217_v1  ;;  %v9925_v15 = vld [vmem:[%s10567_s7 + $0x28] sm:$0x3] }
 0x27d   :  { %8455 = vmatmul.mubr.msk.f32.gmra.mxu0 %vm2820_vm12, %v2834_v46  ;;  %8485 = vmatprep.subr.mxu1 %v4216_v13 }
 0x27e   :  { %8474 = vmatprep.mubr.msk.f32.mxu0 %vm2820_vm12, %v9715_v2  ;;  %8486 = vmatpush3.msra.mxu1 %v4216_v13  ;;  %v9936_v2 = vld [vmem:[%s10567_s7 + $0x38] sm:$0x3] }
 0x27f   :  { %8465 = vmatmul.mubr.msk.f32.gmra.mxu1 %vm2820_vm12, %v9705_v11  ;;  %v7291_v11 = vld [vmem:[%s10567_s7 + $0x10] sm:$0xff]  ;;  %8509 = vmatprep.subr.msk.mxu1 %vm868_vm7, %v9925_v15 }
 0x280   :  { %8467 = vmatprep.mubr.msk.f32.mxu1 %vm2820_vm12, %v3974_v54 }
 0x281   :  { %8475 = vmatmul.mubr.msk.f32.vlgmr.msra.gmra.mxu0 %vm2820_vm12, %v9724_v16 }
 0x282   :  { %8477 = vmatprep.mubr.msk.f32.mxu0 %vm2820_vm12, %v9741_v23  ;;  %8497 = vmatpush3.msk.msra.mxu0 %vm868_vm7, %v7292_v7 }
 0x283   :  { %8468 = vmatmul.mubr.msk.f32.gmra.mxu1 %vm2820_vm12, %v3973_v35  ;;  %8498 = vmatprep.subr.mxu0 %v7291_v11 }
 0x284   :  { %8499 = vmatpush3.msra.mxu0 %v7291_v11 }
 0x285   :  { %8478 = vmatmul.mubr.msk.f32.gmra.mxu0 %vm2820_vm12, %v9748_v24  ;;  %8522 = vmatprep.subr.msk.mxu0 %vm868_vm7, %v9936_v2 }
 0x286   :  { %8480 = vmatprep.mubr.msk.f32.mxu0 %vm2820_vm12, %v4085_v53 }
 0x289   :  { %8481 = vmatmul.mubr.msk.f32.gmra.mxu0 %vm2820_vm12, %v4084_v52 }
 0x305   :  { %v8346_v16 = vpop.f32.mrf.mxu0 }
 0x306   :  { %v2960_v28 = vadd.f32 %v8346_v16, %v7185_v17 }
 0x307   :  { %v2931_v19 = vpop.f32.mrf.mxu0 }
 0x308   :  { %v8359_v23 = vpop.f32.mrf.mxu1  ;;  %v2959_v42 = vadd.f32 %v7185_v17, %v2931_v19 }
 0x309   :  { %v8349_v24 = vpop.f32.mrf.mxu0  ;;  %v3088_v44 = vadd.f32 %v8359_v23, %v2960_v28 }
 0x30a   :  { %v3059_v60 = vpop.f32.mrf.mxu1  ;;  %v2961_v43 = vadd.f32 %v8349_v24, %v7185_v17 }
 0x30b   :  { %v2941_v27 = vpop.f32.mrf.mxu0  ;;  %v3087_v46 = vadd.f32 %v3059_v60, %v2959_v42 }
 0x30d   :  { %v8352_v58 = vpop.f32.mrf.mxu0 }
 0x30e   :  { %v2963_v53 = vadd.f32 %v8352_v58, %v7185_v17 }
 0x30f   :  { %v2950_v59 = vpop.f32.mrf.mxu0  ;;  %v8362_v56 = vpop.f32.mrf.mxu1 }
 0x310   :  { %v3089_v26 = vadd.f32 %v8362_v56, %v2961_v43  ;;  %v2962_v11 = vadd.f32 %v7185_v17, %v2950_v59 }
 0x311   :  { %v3069_v62 = vpop.f32.mrf.mxu1  ;;  %v8372_v5 = vpop.f32.mrf.mxu0 }
 0x312   :  { %v3216_v47 = vadd.f32 %v8372_v5, %v3088_v44 }
 0x313   :  { %v8365_v6 = vpop.f32.mrf.mxu1  ;;  %v3187_v12 = vpop.f32.mrf.mxu0 }
 0x314   :  { %v3215_v34 = vadd.f32 %v3187_v12, %v3087_v46  ;;  %v3091_v23 = vadd.f32 %v8365_v6, %v2963_v53 }
 0x315   :  { %v3078_v33 = vpop.f32.mrf.mxu1  ;;  %v8375_v29 = vpop.f32.mrf.mxu0 }
 0x316   :  { %v3217_v1 = vadd.f32 %v8375_v29, %v3089_v26  ;;  %v3090_v60 = vadd.f32 %v3078_v33, %v2962_v11 }
 0x317   :  { %v3197_v25 = vpop.f32.mrf.mxu0  ;;  %v8385_v36 = vpop.f32.mrf.mxu1 }
 0x318   :  { %v3344_v35 = vadd.f32 %v8385_v36, %v3216_v47 }
 0x319   :  { %v8378_v30 = vpop.f32.mrf.mxu0  ;;  %v3315_v32 = vpop.f32.mrf.mxu1 }
 0x31a   :  { %v3343_v13 = vadd.f32 %v3315_v32, %v3215_v34 }
 0x31b   :  { %v3206_v41 = vpop.f32.mrf.mxu0  ;;  %v8388_v51 = vpop.f32.mrf.mxu1 }
 0x31c   :  { %v3345_v27 = vadd.f32 %v8388_v51, %v3217_v1 }
 0x31d   :  { %v3325_v37 = vpop.f32.mrf.mxu1  ;;  %v8398_v55 = vpop.f32.mrf.mxu0 }
 0x31e   :  { %v3472_v7 = vadd.f32 %v8398_v55, %v3344_v35  ;;  %v3219_v37 = vadd.f32 %v8378_v30, %v3091_v23 }
 0x31f   :  { %v8391_v3 = vpop.f32.mrf.mxu1  ;;  %v3443_v63 = vpop.f32.mrf.mxu0 }
 0x320   :  { %v3471_v62 = vadd.f32 %v3443_v63, %v3343_v13  ;;  %v3347_v29 = vadd.f32 %v8391_v3, %v3219_v37  ;;  %v7300_v37 = vld [vmem:[%s10567_s7 + $0x20] sm:$0xff] }
 0x321   :  { %v3334_v0 = vpop.f32.mrf.mxu1  ;;  %v8401_v57 = vpop.f32.mrf.mxu0 }
 0x322   :  { %v3473_v56 = vadd.f32 %v8401_v57, %v3345_v27 }
 0x323   :  { %v3453_v8 = vpop.f32.mrf.mxu0  ;;  %v8411_v14 = vpop.f32.mrf.mxu1 }
 0x324   :  { %v3600_v24 = vadd.f32 %v8411_v14, %v3472_v7  ;;  %v3218_v8 = vadd.f32 %v3206_v41, %v3090_v60 }
 0x325   :  { %v8404_v10 = vpop.f32.mrf.mxu0  ;;  %v3571_v9 = vpop.f32.mrf.mxu1 }
 0x326   :  { %v3599_v12 = vadd.f32 %v3571_v9, %v3471_v62  ;;  %v3346_v17 = vadd.f32 %v3334_v0, %v3218_v8  ;;  %v3475_v51 = vadd.f32 %v8404_v10, %v3347_v29 }
 0x327   :  { %v3462_v4 = vpop.f32.mrf.mxu0  ;;  %v8414_v22 = vpop.f32.mrf.mxu1 }
 0x328   :  { %v3601_v32 = vadd.f32 %v8414_v22, %v3473_v56  ;;  %v3474_v42 = vadd.f32 %v3462_v4, %v3346_v17 }
 0x329   :  { %v3581_v31 = vpop.f32.mrf.mxu1  ;;  %v8424_v18 = vpop.f32.mrf.mxu0 }
 0x32a   :  { %v3728_v36 = vadd.f32 %v8424_v18, %v3600_v24 }
 0x32b   :  { %v8417_v20 = vpop.f32.mrf.mxu1  ;;  %v3699_v61 = vpop.f32.mrf.mxu0 }
 0x32c   :  { %v3727_v55 = vadd.f32 %v3699_v61, %v3599_v12  ;;  %v3603_v57 = vadd.f32 %v8417_v20, %v3475_v51 }
 0x32d   :  { %v3590_v49 = vpop.f32.mrf.mxu1  ;;  %v8427_v39 = vpop.f32.mrf.mxu0 }
 0x32e   :  { %v3729_v63 = vadd.f32 %v8427_v39, %v3601_v32  ;;  %v3602_v44 = vadd.f32 %v3590_v49, %v3474_v42 }
 0x32f   :  { %v3709_v50 = vpop.f32.mrf.mxu0  ;;  %v8437_v38 = vpop.f32.mrf.mxu1 }
 0x330   :  { %v3859_v59 = vadd.f32 %v8437_v38, %v3728_v36 }
 0x331   :  { %v8430_v48 = vpop.f32.mrf.mxu0  ;;  %v3830_v40 = vpop.f32.mrf.mxu1 }
 0x332   :  { %v3858_v14 = vadd.f32 %v3830_v40, %v3727_v55  ;;  %v3731_v22 = vadd.f32 %v8430_v48, %v3603_v57  ;;  %v7328_v55 = vld [vmem:[%s10567_s7 + $0x58] sm:$0x3] }
 0x333   :  { %v3718_v21 = vpop.f32.mrf.mxu0  ;;  %v8440_v45 = vpop.f32.mrf.mxu1 }
 0x334   :  { %v3860_v9 = vadd.f32 %v8440_v45, %v3729_v63  ;;  %v3730_v46 = vadd.f32 %v3718_v21, %v3602_v44  ;;  %v7337_v44 = vld [vmem:[%s10567_s7 + $0x68] sm:$0x3] }
 0x335   :  { %v3840_v54 = vpop.f32.mrf.mxu1  ;;  %v8450_v52 = vpop.f32.mrf.mxu0 }
 0x336   :  { %v3966_v33 = vadd.f32 %v8450_v52, %v3859_v59 }
 0x337   :  { %v8443_v16 = vpop.f32.mrf.mxu1  ;;  %v3937_v19 = vpop.f32.mrf.mxu0 }
 0x338   :  { %v3965_v18 = vadd.f32 %v3937_v19, %v3858_v14  ;;  %v3862_v39 = vadd.f32 %v8443_v16, %v3731_v22 }
 0x339   :  { %v3849_v5 = vpop.f32.mrf.mxu1  ;;  %v8453_v25 = vpop.f32.mrf.mxu0 }
 0x33a   :  { %v3967_v61 = vadd.f32 %v8453_v25, %v3860_v9  ;;  %v3861_v35 = vadd.f32 %v3849_v5, %v3730_v46  ;;  %v7318_v9 = vld [vmem:[%s10567_s7 + $0x40] sm:$0xff] }
 0x33b   :  { %v3947_v31 = vpop.f32.mrf.mxu0  ;;  %v8463_v58 = vpop.f32.mrf.mxu1 }
 0x33c   :  { %v4077_v41 = vadd.f32 %v8463_v58, %v3966_v33  ;;  %v7319_v31 = vld [vmem:[%s10567_s7 + $0x48] sm:$0x3] }
 0x33d   :  { %v8456_v28 = vpop.f32.mrf.mxu0  ;;  %v4048_v6 = vpop.f32.mrf.mxu1 }
 0x33e   :  { %v4076_v38 = vadd.f32 %v4048_v6, %v3965_v18  ;;  %v3969_v20 = vadd.f32 %v8456_v28, %v3862_v39  ;;  %v7327_v39 = vld [vmem:[%s10567_s7 + $0x50] sm:$0xff] }
 0x33f   :  { %v3956_v50 = vpop.f32.mrf.mxu0  ;;  %v8466_v30 = vpop.f32.mrf.mxu1 }
 0x340   :  { %v4078_v40 = vadd.f32 %v8466_v30, %v3967_v61  ;;  %v3968_v48 = vadd.f32 %v3956_v50, %v3861_v35 }
 0x341   :  { %v4058_v43 = vpop.f32.mrf.mxu1  ;;  %v8476_v3 = vpop.f32.mrf.mxu0 }
 0x342   :  { %v4188_v0 = vadd.f32 %v8476_v3, %v4077_v41 }
 0x343   :  { %v8469_v47 = vpop.f32.mrf.mxu1  ;;  %v4159_v10 = vpop.f32.mrf.mxu0 }
 0x344   :  { %v4193_v26 = vmax.f32 %v4188_v0, 0.0  ;;  %v4187_v4 = vadd.f32 %v4159_v10, %v4076_v38  ;;  %v4080_v53 = vadd.f32 %v8469_v47, %v3969_v20 }
 0x345   :  { %v8479_v34 = vpop.f32.mrf.mxu0  ;;  %v4067_v54 = vpop.f32.mrf.mxu1 }
 0x346   :  { %4198 = vst.msk [vmem:[#allocation2 + $0xd] sm:$0xff] %vm2820_vm12, %v4193_v26  ;;  %v4192_v45 = vmax.f32 %v4187_v4, 0.0  ;;  %v4189_v49 = vadd.f32 %v8479_v34, %v4078_v40  ;;  %v4079_v13 = vadd.f32 %v4067_v54, %v3968_v48  ;;  %v7346_v4 = vld [vmem:[%s10567_s7 + $0x78] sm:$0x3] }
 0x347   :  { %v4169_v52 = vpop.f32.mrf.mxu0 }
 0x348   :  { %4197 = vst.msk [vmem:[#allocation2 + $0x5] sm:$0xff] %vm2820_vm12, %v4192_v45  ;;  %v4194_v21 = vmax.f32 %v4189_v49, 0.0 }
 0x349   :  { %v8482_v1 = vpop.f32.mrf.mxu0 }
 0x34a   :  { %4199 = vst.msk [vmem:[#allocation2 + $0x1d] sm:$0xfc] %vm2823_vm13, %v4194_v21  ;;  %v4191_v7 = vadd.f32 %v8482_v1, %v4080_v53  ;;  %v7336_v21 = vld [vmem:[%s10567_s7 + $0x60] sm:$0xff] }
 0x34b   :  { %v4178_v11 = vpop.f32.mrf.mxu0 }
 0x34c   :  { %v4196_v16 = vmax.f32 %v4191_v7, 0.0  ;;  %v4190_v19 = vadd.f32 %v4178_v11, %v4079_v13  ;;  %v7355_v7 = vld [vmem:[%s10567_s7 + $0x88] sm:$0x3] }
 0x34d   :  { %v9946_v23 = vld [vmem:[#allocation2 + $0x10] sm:$0xff] }
 0x34e   :  { %4201 = vst.msk [vmem:[#allocation2 + $0x2d] sm:$0x3] %vm2826_vm14, %v4196_v16  ;;  %v4195_v27 = vmax.f32 %v4190_v19, 0.0  ;;  %v4344_v25 = vrot.slane %v9946_v23, 1  ;;  %v4472_v33 = vrot.slane %v9946_v23, 2  ;;  %v4600_v61 = vrot.slane %v9946_v23, 3 }
 0x34f   :  { %v9949_v62 = vld [vmem:[#allocation2] sm:$0xff]  ;;  %v9951_v24 = vld [vmem:[#allocation2 + $0x8] sm:$0xff]  ;;  %v4728_v45 = vrot.slane %v9946_v23, 4 }
 0x350   :  { %4200 = vst.msk [vmem:[#allocation2 + $0x25] sm:$0xff] %vm2820_vm12, %v4195_v27  ;;  %8487 = vmatprep.mubr.msk.f32.mxu1 %vm2820_vm12, %v9949_v62  ;;  %v4341_v60 = vrot.slane %v9949_v62, 1  ;;  %v4342_v5 = vrot.slane %v9951_v24, 1  ;;  %v4469_v29 = vrot.slane %v9949_v62, 2  ;;  %v4470_v32 = vrot.slane %v9951_v24, 2 }
 0x351   :  { %8488 = vmatmul.mubr.msk.f32.vlgmr.msra.gmra.mxu1 %vm2820_vm12, %v9951_v24  ;;  %v9964_v56 = vld [vmem:[#allocation2 + $0x18] sm:$0xff]  ;;  %v4597_v42 = vrot.slane %v9949_v62, 3  ;;  %v4598_v50 = vrot.slane %v9951_v24, 3  ;;  %v4725_v0 = vrot.slane %v9949_v62, 4  ;;  %v4726_v46 = vrot.slane %v9951_v24, 4 }
 0x352   :  { %8490 = vmatprep.mubr.msk.f32.mxu1 %vm2820_vm12, %v9946_v23  ;;  %8510 = vmatpush3.msk.msra.mxu1 %vm868_vm7, %v9925_v15  ;;  %v4343_v12 = vsel %vm204_vm3, %v4341_v60, %v4342_v5  ;;  %v9972_v36 = vsel %vm204_vm3, %v4342_v5, %v4344_v25  ;;  %v4346_v8 = vrot.slane %v9964_v56, 1  ;;  %v7309_v15 = vld [vmem:[%s10567_s7 + $0x30] sm:$0xff]  ;;  %v4474_v51 = vrot.slane %v9964_v56, 2 }
 0x353   :  { %8500 = vmatprep.mubr.msk.f32.mxu0 %vm2820_vm12, %v4343_v12  ;;  %8511 = vmatprep.subr.mxu1 %v7300_v37  ;;  %v10030_v30 = vsel %vm337_vm4, %v4470_v32, %v4472_v33  ;;  %v4599_v43 = vsel %vm94_vm0, %v4597_v42, %v4598_v50  ;;  %v4602_v3 = vrot.slane %v9964_v56, 3  ;;  %v4601_v47 = vsel %vm94_vm0, %v4598_v50, %v4600_v61 }
 0x354   :  { %8501 = vmatmul.mubr.msk.f32.vlgmr.msra.gmra.mxu0 %vm2820_vm12, %v9972_v36  ;;  %v9982_v58 = vsel %vm204_vm3, %v4344_v25, %v4346_v8  ;;  %8512 = vmatpush3.msra.mxu1 %v7300_v37  ;;  %v10039_v18 = vsel %vm337_vm4, %v4472_v33, %v4474_v51  ;;  %v4727_v34 = vsel %vm602_vm5, %v4725_v0, %v4726_v46  ;;  %v4730_v35 = vrot.slane %v9964_v56, 4 }
 0x355   :  { %8491 = vmatmul.mubr.msk.f32.gmra.mxu1 %vm2820_vm12, %v9964_v56  ;;  %8503 = vmatprep.mubr.msk.f32.mxu0 %vm2820_vm12, %v9982_v58  ;;  %v4603_v40 = vsel %vm94_vm0, %v4600_v61, %v4602_v3  ;;  %v4853_v54 = vrot.slane %v9949_v62, 5  ;;  %v4854_v52 = vrot.slane %v9951_v24, 5  ;;  %v4729_v48 = vsel %vm602_vm5, %v4726_v46, %v4728_v45 }
 0x356   :  { %8523 = vmatpush3.msk.msra.mxu0 %vm868_vm7, %v9936_v2  ;;  %8535 = vmatprep.subr.msk.mxu1 %vm868_vm7, %v7319_v31  ;;  %v4471_v2 = vsel %vm337_vm4, %v4469_v29, %v4470_v32  ;;  %v4731_v1 = vsel %vm602_vm5, %v4728_v45, %v4730_v35  ;;  %v4858_v16 = vrot.slane %v9964_v56, 5  ;;  %v4856_v27 = vrot.slane %v9946_v23, 5  ;;  %v7364_v29 = vld [vmem:[%s10567_s7 + $0x98] sm:$0x3] }
 0x357   :  { %v9999_v59 = vld [vmem:[#allocation2 + $0x20] sm:$0xff]  ;;  %v10001_v17 = vld [vmem:[#allocation2 + $0x28] sm:$0xff]  ;;  %8524 = vmatprep.subr.mxu0 %v7309_v15  ;;  %v4855_v11 = vsel %vm735_vm6, %v4853_v54, %v4854_v52  ;;  %v4981_v5 = vrot.slane %v9949_v62, 6  ;;  %v4982_v25 = vrot.slane %v9951_v24, 6  ;;  %v5110_v33 = vrot.slane %v9949_v62, 7 }
 0x358   :  { %8493 = vmatprep.mubr.msk.f32.mxu1 %vm2820_vm12, %v9999_v59  ;;  %v4348_v28 = vrot.slane %v9999_v59, 1  ;;  %v10007_v6 = vrot.slane %v10001_v17, 1  ;;  %8525 = vmatpush3.msra.mxu0 %v7309_v15  ;;  %v4476_v57 = vrot.slane %v9999_v59, 2  ;;  %v10042_v41 = vrot.slane %v10001_v17, 2 }
 0x359   :  { %8494 = vmatmul.mubr.msk.f32.gmra.mxu1 %vm2820_vm12, %v10001_v17  ;;  %8548 = vmatprep.subr.msk.mxu0 %vm868_vm7, %v7328_v55  ;;  %v4604_v10 = vrot.slane %v9999_v59, 3  ;;  %v4606_v26 = vrot.slane %v10001_v17, 3  ;;  %v4732_v53 = vrot.slane %v9999_v59, 4  ;;  %v4734_v13 = vrot.slane %v10001_v17, 4 }
 0x35a   :  { %8513 = vmatprep.mubr.msk.f32.mxu1 %vm2820_vm12, %v4471_v2  ;;  %v10016_v63 = vsel %vm204_vm3, %v4346_v8, %v4348_v28  ;;  %v10020_v14 = vsel %vm204_vm3, %v4348_v28, %v10007_v6  ;;  %v10056_v22 = vsel %vm337_vm4, %v4474_v51, %v4476_v57  ;;  %v10063_v38 = vsel %vm337_vm4, %v4476_v57, %v10042_v41  ;;  %v7345_v8 = vld [vmem:[%s10567_s7 + $0x70] sm:$0xff] }
 0x35b   :  { %8504 = vmatmul.mubr.msk.f32.gmra.mxu0 %vm2820_vm12, %v10016_v63  ;;  %v4605_v20 = vsel %vm94_vm0, %v4602_v3, %v4604_v10  ;;  %v4607_v49 = vsel %vm94_vm0, %v4604_v10, %v4606_v26  ;;  %v4733_v19 = vsel %vm602_vm5, %v4730_v35, %v4732_v53  ;;  %v4735_v60 = vsel %vm602_vm5, %v4732_v53, %v4734_v13 }
 0x35c   :  { %8506 = vmatprep.mubr.msk.f32.mxu0 %vm2820_vm12, %v10020_v14  ;;  %v4857_v37 = vsel %vm735_vm6, %v4854_v52, %v4856_v27  ;;  %v4860_v12 = vrot.slane %v9999_v59, 5  ;;  %v4862_v15 = vrot.slane %v10001_v17, 5  ;;  %v4983_v32 = vsel %vm868_vm7, %v4981_v5, %v4982_v25 }
 0x35d   :  { %8514 = vmatmul.mubr.msk.f32.vlgmr.msra.gmra.mxu1 %vm2820_vm12, %v10030_v30  ;;  %v4984_v2 = vrot.slane %v9946_v23, 6  ;;  %v5111_v42 = vrot.slane %v9951_v24, 7  ;;  %v4988_v57 = vrot.slane %v9999_v59, 6  ;;  %v4990_v62 = vrot.slane %v10001_v17, 6 }
 0x35e   :  { %8516 = vmatprep.mubr.msk.f32.mxu1 %vm2820_vm12, %v10039_v18  ;;  %8536 = vmatpush3.msk.msra.mxu1 %vm868_vm7, %v7319_v31  ;;  %v4859_v31 = vsel %vm735_vm6, %v4856_v27, %v4858_v16  ;;  %v4861_v28 = vsel %vm735_vm6, %v4858_v16, %v4860_v12  ;;  %v4863_v51 = vsel %vm735_vm6, %v4860_v12, %v4862_v15  ;;  %v5115_v61 = vrot.slane %v9964_v56, 7 }
 0x35f   :  { %8507 = vmatmul.mubr.msk.f32.gmra.mxu0 %vm2820_vm12, %v10007_v6  ;;  %8537 = vmatprep.subr.mxu1 %v7318_v9  ;;  %v4985_v50 = vsel %vm868_vm7, %v4982_v25, %v4984_v2  ;;  %v5112_v3 = vsel %vm1002_vm8, %v5110_v33, %v5111_v42  ;;  %v5113_v46 = vrot.slane %v9946_v23, 7 }
 0x360   :  { %8526 = vmatprep.mubr.msk.f32.mxu0 %vm2820_vm12, %v4599_v43  ;;  %8538 = vmatpush3.msra.mxu1 %v7318_v9  ;;  %v7354_v9 = vld [vmem:[%s10567_s7 + $0x80] sm:$0xff]  ;;  %v7373_v43 = vld [vmem:[%s10567_s7 + $0xa8] sm:$0x3] }
 0x361   :  { %8517 = vmatmul.mubr.msk.f32.gmra.mxu1 %vm2820_vm12, %v10056_v22  ;;  %8561 = vmatprep.subr.msk.mxu1 %vm868_vm7, %v7337_v44  ;;  %v5114_v10 = vsel %vm1002_vm8, %v5111_v42, %v5113_v46 }
 0x362   :  { %8519 = vmatprep.mubr.msk.f32.mxu1 %vm2820_vm12, %v10063_v38 }
 0x363   :  { %8527 = vmatmul.mubr.msk.f32.vlgmr.msra.gmra.mxu0 %vm2820_vm12, %v4601_v47  ;;  %v4991_v47 = vsel %vm868_vm7, %v4988_v57, %v4990_v62 }
 0x364   :  { %8529 = vmatprep.mubr.msk.f32.mxu0 %vm2820_vm12, %v4603_v40  ;;  %8549 = vmatpush3.msk.msra.mxu0 %vm868_vm7, %v7328_v55  ;;  %v4986_v55 = vrot.slane %v9964_v56, 6  ;;  %v7363_v40 = vld [vmem:[%s10567_s7 + $0x90] sm:$0xff] }
 0x365   :  { %8520 = vmatmul.mubr.msk.f32.gmra.mxu1 %vm2820_vm12, %v10042_v41  ;;  %8550 = vmatprep.subr.mxu0 %v7327_v39 }
 0x366   :  { %8539 = vmatprep.mubr.msk.f32.mxu1 %vm2820_vm12, %v4727_v34  ;;  %8551 = vmatpush3.msra.mxu0 %v7327_v39  ;;  %v4989_v0 = vsel %vm868_vm7, %v4986_v55, %v4988_v57  ;;  %v5117_v39 = vrot.slane %v9999_v59, 7  ;;  %v4208_v34 = vld [vmem:[#allocation2 + $0x30] sm:$0xf]  ;;  %v7283_v57 = vld [vmem:[%s10570_s8] ss:$0 sm:$0xff] }
 0x367   :  { %8530 = vmatmul.mubr.msk.f32.gmra.mxu0 %vm2820_vm12, %v4605_v20  ;;  %8574 = vmatprep.subr.msk.mxu0 %vm868_vm7, %v7346_v4  ;;  %v5121_v20 = vrot.slane %v4208_v34, 7 }
 0x368   :  { %8532 = vmatprep.mubr.msk.f32.mxu0 %vm2820_vm12, %v4607_v49  ;;  %v5118_v35 = vsel %vm1002_vm8, %v5115_v61, %v5117_v39  ;;  %v7372_v49 = vld [vmem:[%s10567_s7 + $0xa0] sm:$0xff] }
 0x369   :  { %8540 = vmatmul.mubr.msk.f32.vlgmr.msra.gmra.mxu1 %vm2820_vm12, %v4729_v48 }
 0x36a   :  { %8542 = vmatprep.mubr.msk.f32.mxu1 %vm2820_vm12, %v4731_v1  ;;  %8562 = vmatpush3.msk.msra.mxu1 %vm868_vm7, %v7337_v44  ;;  %v4987_v44 = vsel %vm868_vm7, %v4984_v2, %v4986_v55 }
 0x36b   :  { %8533 = vmatmul.mubr.msk.f32.gmra.mxu0 %vm2820_vm12, %v4606_v26  ;;  %8563 = vmatprep.subr.mxu1 %v7336_v21  ;;  %v5116_v26 = vsel %vm1002_vm8, %v5113_v46, %v5115_v61 }
 0x36c   :  { %8552 = vmatprep.mubr.msk.f32.mxu0 %vm2820_vm12, %v4855_v11  ;;  %8564 = vmatpush3.msra.mxu1 %v7336_v21 }
 0x36d   :  { %8543 = vmatmul.mubr.msk.f32.gmra.mxu1 %vm2820_vm12, %v4733_v19  ;;  %8587 = vmatprep.subr.msk.mxu1 %vm868_vm7, %v7355_v7 }
 0x36e   :  { %8545 = vmatprep.mubr.msk.f32.mxu1 %vm2820_vm12, %v4735_v60 }
 0x36f   :  { %8553 = vmatmul.mubr.msk.f32.vlgmr.msra.gmra.mxu0 %vm2820_vm12, %v4857_v37 }
 0x370   :  { %8555 = vmatprep.mubr.msk.f32.mxu0 %vm2820_vm12, %v4859_v31  ;;  %8575 = vmatpush3.msk.msra.mxu0 %vm868_vm7, %v7346_v4  ;;  %v5119_v4 = vrot.slane %v10001_v17, 7 }
 0x371   :  { %8546 = vmatmul.mubr.msk.f32.gmra.mxu1 %vm2820_vm12, %v4734_v13  ;;  %8576 = vmatprep.subr.mxu0 %v7345_v8 }
 0x372   :  { %8565 = vmatprep.mubr.msk.f32.mxu1 %vm2820_vm12, %v4983_v32  ;;  %8577 = vmatpush3.msra.mxu0 %v7345_v8  ;;  %v5120_v45 = vsel %vm1002_vm8, %v5117_v39, %v5119_v4 }
 0x373   :  { %8556 = vmatmul.mubr.msk.f32.gmra.mxu0 %vm2820_vm12, %v4861_v28  ;;  %8600 = vmatprep.subr.msk.mxu0 %vm868_vm7, %v7364_v29 }
 0x374   :  { %8558 = vmatprep.mubr.msk.f32.mxu0 %vm2820_vm12, %v4863_v51 }
 0x375   :  { %8566 = vmatmul.mubr.msk.f32.vlgmr.msra.gmra.mxu1 %vm2820_vm12, %v4985_v50 }
 0x376   :  { %8568 = vmatprep.mubr.msk.f32.mxu1 %vm2820_vm12, %v4987_v44  ;;  %8588 = vmatpush3.msk.msra.mxu1 %vm868_vm7, %v7355_v7 }
 0x377   :  { %8559 = vmatmul.mubr.msk.f32.gmra.mxu0 %vm2820_vm12, %v4862_v15  ;;  %8589 = vmatprep.subr.mxu1 %v7354_v9 }
 0x378   :  { %8578 = vmatprep.mubr.msk.f32.mxu0 %vm2820_vm12, %v5112_v3  ;;  %8590 = vmatpush3.msra.mxu1 %v7354_v9 }
 0x379   :  { %8569 = vmatmul.mubr.msk.f32.gmra.mxu1 %vm2820_vm12, %v4989_v0  ;;  %8613 = vmatprep.subr.msk.mxu1 %vm868_vm7, %v7373_v43 }
 0x37a   :  { %8571 = vmatprep.mubr.msk.f32.mxu1 %vm2820_vm12, %v4991_v47 }
 0x37b   :  { %8579 = vmatmul.mubr.msk.f32.vlgmr.msra.gmra.mxu0 %vm2820_vm12, %v5114_v10 }
 0x37c   :  { %8581 = vmatprep.mubr.msk.f32.mxu0 %vm2820_vm12, %v5116_v26  ;;  %8601 = vmatpush3.msk.msra.mxu0 %vm868_vm7, %v7364_v29 }
 0x37d   :  { %8572 = vmatmul.mubr.msk.f32.gmra.mxu1 %vm2820_vm12, %v4990_v62  ;;  %8602 = vmatprep.subr.mxu0 %v7363_v40 }
 0x37e   :  { %8591 = vmatprep.mubr.msk.f32.mxu1 %vm2820_vm12, %v9951_v24  ;;  %8603 = vmatpush3.msra.mxu0 %v7363_v40  ;;  %v5122_v24 = vsel %vm1002_vm8, %v5119_v4, %v5121_v20 }
 0x37f   :  { %8582 = vmatmul.mubr.msk.f32.gmra.mxu0 %vm2820_vm12, %v5118_v35 }
 0x380   :  { %8584 = vmatprep.mubr.msk.f32.mxu0 %vm2820_vm12, %v5120_v45 }
 0x381   :  { %8592 = vmatmul.mubr.msk.f32.vlgmr.msra.gmra.mxu1 %vm2820_vm12, %v9946_v23  ;;  %v5347_v23 = vrot.slane %v4208_v34, 1 }
 0x382   :  { %8594 = vmatprep.mubr.msk.f32.mxu1 %vm2820_vm12, %v9964_v56  ;;  %8614 = vmatpush3.msk.msra.mxu1 %vm868_vm7, %v7373_v43 }
 0x383   :  { %8585 = vmatmul.mubr.msk.f32.gmra.mxu0 %vm2820_vm12, %v5122_v24  ;;  %8615 = vmatprep.subr.mxu1 %v7372_v49  ;;  %v5348_v56 = vsel %vm204_vm3, %v10007_v6, %v5347_v23  ;;  %v7390_v6 = vld [vmem:[%s10569_s9 + $0x18] sm:$0x3] }
 0x384   :  { %8604 = vmatprep.mubr.msk.f32.mxu0 %vm2820_vm12, %v9972_v36  ;;  %8616 = vmatpush3.msra.mxu1 %v7372_v49  ;;  %v5458_v36 = vrot.slane %v4208_v34, 2 }
 0x385   :  { %8595 = vmatmul.mubr.msk.f32.gmra.mxu1 %vm2820_vm12, %v9999_v59  ;;  %v5591_v59 = vld [vmem:[%s10569_s9 + $0x8] sm:$0x3]  ;;  %8639 = vmatprep.subr.msk.mxu1 %vm868_vm7, %v7390_v6 }
 0x386   :  { %8597 = vmatprep.mubr.msk.f32.mxu1 %vm2820_vm12, %v10001_v17  ;;  %8626 = vmatprep.subr.msk.mxu0 %vm868_vm7, %v5591_v59  ;;  %v5590_v17 = vld [vmem:[%s10569_s9] sm:$0xff] }
 0x387   :  { %8605 = vmatmul.mubr.msk.f32.vlgmr.msra.gmra.mxu0 %vm2820_vm12, %v9982_v58  ;;  %v5459_v58 = vsel %vm337_vm4, %v10042_v41, %v5458_v36 }
 0x388   :  { %8607 = vmatprep.mubr.msk.f32.mxu0 %vm2820_vm12, %v10016_v63  ;;  %8627 = vmatpush3.msk.msra.mxu0 %vm868_vm7, %v5591_v59  ;;  %v10240_v63 = vld [vmem:[%s10569_s9 + $0x28] sm:$0x3] }
 0x389   :  { %8598 = vmatmul.mubr.msk.f32.gmra.mxu1 %vm2820_vm12, %v4208_v34  ;;  %8628 = vmatprep.subr.mxu0 %v5590_v17 }
 0x38a   :  { %8617 = vmatprep.mubr.msk.f32.mxu1 %vm2820_vm12, %v10030_v30  ;;  %8629 = vmatpush3.msra.mxu0 %v5590_v17  ;;  %v10251_v30 = vld [vmem:[%s10569_s9 + $0x38] sm:$0x3] }
 0x38b   :  { %8608 = vmatmul.mubr.msk.f32.gmra.mxu0 %vm2820_vm12, %v10020_v14  ;;  %v7389_v14 = vld [vmem:[%s10569_s9 + $0x10] sm:$0xff]  ;;  %8652 = vmatprep.subr.msk.mxu0 %vm868_vm7, %v10240_v63 }
 0x38c   :  { %8610 = vmatprep.mubr.msk.f32.mxu0 %vm2820_vm12, %v5348_v56 }
 0x38d   :  { %8618 = vmatmul.mubr.msk.f32.vlgmr.msra.gmra.mxu1 %vm2820_vm12, %v10039_v18 }
 0x38e   :  { %8620 = vmatprep.mubr.msk.f32.mxu1 %vm2820_vm12, %v10056_v22  ;;  %8640 = vmatpush3.msk.msra.mxu1 %vm868_vm7, %v7390_v6 }
 0x38f   :  { %8611 = vmatmul.mubr.msk.f32.gmra.mxu0 %vm2820_vm12, %v5347_v23  ;;  %8641 = vmatprep.subr.mxu1 %v7389_v14 }
 0x390   :  { %8642 = vmatpush3.msra.mxu1 %v7389_v14 }
 0x391   :  { %8621 = vmatmul.mubr.msk.f32.gmra.mxu1 %vm2820_vm12, %v10063_v38  ;;  %8665 = vmatprep.subr.msk.mxu1 %vm868_vm7, %v10251_v30 }
 0x392   :  { %8623 = vmatprep.mubr.msk.f32.mxu1 %vm2820_vm12, %v5459_v58 }
 0x395   :  { %8624 = vmatmul.mubr.msk.f32.gmra.mxu1 %vm2820_vm12, %v5458_v36 }
 0x411   :  { %v8489_v18 = vpop.f32.mrf.mxu1 }
 0x412   :  { %v4334_v3 = vadd.f32 %v8489_v18, %v7283_v57 }
 0x413   :  { %v4305_v41 = vpop.f32.mrf.mxu1 }
 0x414   :  { %v8502_v22 = vpop.f32.mrf.mxu0  ;;  %v4333_v46 = vadd.f32 %v7283_v57, %v4305_v41 }
 0x415   :  { %v8492_v38 = vpop.f32.mrf.mxu1  ;;  %v4462_v39 = vadd.f32 %v8502_v22, %v4334_v3 }
 0x416   :  { %v4433_v52 = vpop.f32.mrf.mxu0  ;;  %v4335_v4 = vadd.f32 %v8492_v38, %v7283_v57 }
 0x417   :  { %v4315_v54 = vpop.f32.mrf.mxu1  ;;  %v4461_v34 = vadd.f32 %v4433_v52, %v4333_v46 }
 0x419   :  { %v8495_v48 = vpop.f32.mrf.mxu1 }
 0x41a   :  { %v4337_v58 = vadd.f32 %v8495_v48, %v7283_v57 }
 0x41b   :  { %v4324_v53 = vpop.f32.mrf.mxu1  ;;  %v8505_v21 = vpop.f32.mrf.mxu0 }
 0x41c   :  { %v4463_v49 = vadd.f32 %v8505_v21, %v4335_v4  ;;  %v4336_v14 = vadd.f32 %v7283_v57, %v4324_v53 }
 0x41d   :  { %v4443_v1 = vpop.f32.mrf.mxu0  ;;  %v8515_v13 = vpop.f32.mrf.mxu1 }
 0x41e   :  { %v4590_v35 = vadd.f32 %v8515_v13, %v4462_v39 }
 0x41f   :  { %v8508_v7 = vpop.f32.mrf.mxu0  ;;  %v4561_v11 = vpop.f32.mrf.mxu1 }
 0x420   :  { %v4589_v24 = vadd.f32 %v4561_v11, %v4461_v34  ;;  %v4465_v22 = vadd.f32 %v8508_v7, %v4337_v58 }
 0x421   :  { %v4452_v16 = vpop.f32.mrf.mxu0  ;;  %v8518_v19 = vpop.f32.mrf.mxu1 }
 0x422   :  { %v4591_v59 = vadd.f32 %v8518_v19, %v4463_v49  ;;  %v4464_v52 = vadd.f32 %v4452_v16, %v4336_v14 }
 0x423   :  { %v4571_v27 = vpop.f32.mrf.mxu1  ;;  %v8528_v60 = vpop.f32.mrf.mxu0 }
 0x424   :  { %v4718_v23 = vadd.f32 %v8528_v60, %v4590_v35 }
 0x425   :  { %v8521_v5 = vpop.f32.mrf.mxu1  ;;  %v4689_v25 = vpop.f32.mrf.mxu0 }
 0x426   :  { %v4717_v17 = vadd.f32 %v4689_v25, %v4589_v24 }
 0x427   :  { %v4580_v37 = vpop.f32.mrf.mxu1  ;;  %v8531_v12 = vpop.f32.mrf.mxu0 }
 0x428   :  { %v4719_v54 = vadd.f32 %v8531_v12, %v4591_v59 }
 0x429   :  { %v4699_v8 = vpop.f32.mrf.mxu0  ;;  %v8541_v31 = vpop.f32.mrf.mxu1 }
 0x42a   :  { %v4846_v6 = vadd.f32 %v8541_v31, %v4718_v23  ;;  %v4593_v8 = vadd.f32 %v8521_v5, %v4465_v22 }
 0x42b   :  { %v8534_v15 = vpop.f32.mrf.mxu0  ;;  %v4817_v29 = vpop.f32.mrf.mxu1 }
 0x42c   :  { %v4845_v1 = vadd.f32 %v4817_v29, %v4717_v17  ;;  %v4721_v19 = vadd.f32 %v8534_v15, %v4593_v8  ;;  %v7398_v8 = vld [vmem:[%s10569_s9 + $0x20] sm:$0xff] }
 0x42d   :  { %v4708_v32 = vpop.f32.mrf.mxu0  ;;  %v8544_v55 = vpop.f32.mrf.mxu1 }
 0x42e   :  { %v4847_v21 = vadd.f32 %v8544_v55, %v4719_v54 }
 0x42f   :  { %v4827_v28 = vpop.f32.mrf.mxu1  ;;  %v8554_v2 = vpop.f32.mrf.mxu0 }
 0x430   :  { %v4974_v38 = vadd.f32 %v8554_v2, %v4846_v6  ;;  %v4592_v28 = vadd.f32 %v4580_v37, %v4464_v52 }
 0x431   :  { %v8547_v51 = vpop.f32.mrf.mxu1  ;;  %v4945_v33 = vpop.f32.mrf.mxu0 }
 0x432   :  { %v4973_v11 = vadd.f32 %v4945_v33, %v4845_v1  ;;  %v4720_v57 = vadd.f32 %v4708_v32, %v4592_v28  ;;  %v4849_v12 = vadd.f32 %v8547_v51, %v4721_v19 }
 0x433   :  { %v4836_v42 = vpop.f32.mrf.mxu1  ;;  %v8557_v50 = vpop.f32.mrf.mxu0 }
 0x434   :  { %v4975_v25 = vadd.f32 %v8557_v50, %v4847_v21  ;;  %v4848_v46 = vadd.f32 %v4836_v42, %v4720_v57 }
 0x435   :  { %v4955_v9 = vpop.f32.mrf.mxu0  ;;  %v8567_v44 = vpop.f32.mrf.mxu1 }
 0x436   :  { %v5102_v60 = vadd.f32 %v8567_v44, %v4974_v38 }
 0x437   :  { %v8560_v62 = vpop.f32.mrf.mxu0  ;;  %v5073_v43 = vpop.f32.mrf.mxu1 }
 0x438   :  { %v5101_v31 = vadd.f32 %v5073_v43, %v4973_v11  ;;  %v4977_v55 = vadd.f32 %v8560_v62, %v4849_v12 }
 0x439   :  { %v4964_v61 = vpop.f32.mrf.mxu0  ;;  %v8570_v0 = vpop.f32.mrf.mxu1 }
 0x43a   :  { %v5103_v29 = vadd.f32 %v8570_v0, %v4975_v25  ;;  %v4976_v39 = vadd.f32 %v4964_v61, %v4848_v46 }
 0x43b   :  { %v5083_v47 = vpop.f32.mrf.mxu1  ;;  %v8580_v10 = vpop.f32.mrf.mxu0 }
 0x43c   :  { %v5233_v53 = vadd.f32 %v8580_v10, %v5102_v60 }
 0x43d   :  { %v8573_v40 = vpop.f32.mrf.mxu1  ;;  %v5204_v26 = vpop.f32.mrf.mxu0 }
 0x43e   :  { %v5232_v2 = vadd.f32 %v5204_v26, %v5101_v31  ;;  %v5105_v50 = vadd.f32 %v8573_v40, %v4977_v55  ;;  %v7426_v31 = vld [vmem:[%s10569_s9 + $0x58] sm:$0x3] }
 0x43f   :  { %v5092_v20 = vpop.f32.mrf.mxu1  ;;  %v8583_v45 = vpop.f32.mrf.mxu0 }
 0x440   :  { %v5234_v33 = vadd.f32 %v8583_v45, %v5103_v29  ;;  %v5104_v34 = vadd.f32 %v5092_v20, %v4976_v39  ;;  %v7435_v39 = vld [vmem:[%s10569_s9 + $0x68] sm:$0x3] }
 0x441   :  { %v5214_v56 = vpop.f32.mrf.mxu0  ;;  %v8593_v36 = vpop.f32.mrf.mxu1 }
 0x442   :  { %v5340_v16 = vadd.f32 %v8593_v36, %v5233_v53 }
 0x443   :  { %v8586_v18 = vpop.f32.mrf.mxu0  ;;  %v5311_v41 = vpop.f32.mrf.mxu1 }
 0x444   :  { %v5339_v44 = vadd.f32 %v5311_v41, %v5232_v2  ;;  %v5236_v0 = vadd.f32 %v8586_v18, %v5105_v50 }
 0x445   :  { %v5223_v13 = vpop.f32.mrf.mxu0  ;;  %v8596_v27 = vpop.f32.mrf.mxu1 }
 0x446   :  { %v5341_v43 = vadd.f32 %v8596_v27, %v5234_v33  ;;  %v5235_v23 = vadd.f32 %v5223_v13, %v5104_v34  ;;  %v7416_v33 = vld [vmem:[%s10569_s9 + $0x40] sm:$0xff] }
 0x447   :  { %v5321_v9 = vpop.f32.mrf.mxu1  ;;  %v8606_v48 = vpop.f32.mrf.mxu0 }
 0x448   :  { %v5451_v37 = vadd.f32 %v8606_v48, %v5340_v16  ;;  %v7417_v9 = vld [vmem:[%s10569_s9 + $0x48] sm:$0x3] }
 0x449   :  { %v8599_v3 = vpop.f32.mrf.mxu1  ;;  %v5422_v7 = vpop.f32.mrf.mxu0 }
 0x44a   :  { %v5450_v10 = vadd.f32 %v5422_v7, %v5339_v44  ;;  %v5343_v62 = vadd.f32 %v8599_v3, %v5236_v0  ;;  %v7425_v0 = vld [vmem:[%s10569_s9 + $0x50] sm:$0xff] }
 0x44b   :  { %v5330_v47 = vpop.f32.mrf.mxu1  ;;  %v8609_v5 = vpop.f32.mrf.mxu0 }
 0x44c   :  { %v5452_v26 = vadd.f32 %v8609_v5, %v5341_v43  ;;  %v5342_v40 = vadd.f32 %v5330_v47, %v5235_v23 }
 0x44d   :  { %v5432_v4 = vpop.f32.mrf.mxu0  ;;  %v8619_v15 = vpop.f32.mrf.mxu1 }
 0x44e   :  { %v5562_v32 = vadd.f32 %v8619_v15, %v5451_v37 }
 0x44f   :  { %v8612_v35 = vpop.f32.mrf.mxu0  ;;  %v5533_v51 = vpop.f32.mrf.mxu1 }
 0x450   :  { %v5567_v49 = vmax.f32 %v5562_v32, 0.0  ;;  %v5561_v42 = vadd.f32 %v5533_v51, %v5450_v10  ;;  %v5454_v58 = vadd.f32 %v8612_v35, %v5343_v62 }
 0x451   :  { %v8622_v24 = vpop.f32.mrf.mxu1  ;;  %v5441_v56 = vpop.f32.mrf.mxu0 }
 0x452   :  { %5572 = vst.msk [vmem:[#allocation2 + $0xd] sm:$0xff] %vm2820_vm12, %v5567_v49  ;;  %v5566_v45 = vmax.f32 %v5561_v42, 0.0  ;;  %v5563_v61 = vadd.f32 %v8622_v24, %v5452_v26  ;;  %v5453_v17 = vadd.f32 %v5441_v56, %v5342_v40  ;;  %v7444_v42 = vld [vmem:[%s10569_s9 + $0x78] sm:$0x3] }
 0x453   :  { %v5543_v36 = vpop.f32.mrf.mxu1 }
 0x454   :  { %5571 = vst.msk [vmem:[#allocation2 + $0x5] sm:$0xff] %vm2820_vm12, %v5566_v45  ;;  %v5568_v20 = vmax.f32 %v5563_v61, 0.0 }
 0x455   :  { %v8625_v59 = vpop.f32.mrf.mxu1 }
 0x456   :  { %5573 = vst.msk [vmem:[#allocation2 + $0x1d] sm:$0xfc] %vm2823_vm13, %v5568_v20  ;;  %v5565_v6 = vadd.f32 %v8625_v59, %v5454_v58  ;;  %v7434_v20 = vld [vmem:[%s10569_s9 + $0x60] sm:$0xff] }
 0x457   :  { %v5552_v14 = vpop.f32.mrf.mxu1 }
 0x458   :  { %v5570_v18 = vmax.f32 %v5565_v6, 0.0  ;;  %v5564_v41 = vadd.f32 %v5552_v14, %v5453_v17  ;;  %v7453_v6 = vld [vmem:[%s10569_s9 + $0x88] sm:$0x3] }
 0x459   :  { %v10261_v22 = vld [vmem:[#allocation2 + $0x10] sm:$0xff] }
 0x45a   :  { %5575 = vst.msk [vmem:[#allocation2 + $0x2d] sm:$0x3] %vm2826_vm14, %v5570_v18  ;;  %v5569_v54 = vmax.f32 %v5564_v41, 0.0  ;;  %v5718_v27 = vrot.slane %v10261_v22, 1  ;;  %v5846_v16 = vrot.slane %v10261_v22, 2  ;;  %v5974_v43 = vrot.slane %v10261_v22, 3 }
 0x45b   :  { %v10264_v1 = vld [vmem:[#allocation2] sm:$0xff]  ;;  %v10266_v38 = vld [vmem:[#allocation2 + $0x8] sm:$0xff]  ;;  %v6102_v45 = vrot.slane %v10261_v22, 4 }
 0x45c   :  { %5574 = vst.msk [vmem:[#allocation2 + $0x25] sm:$0xff] %vm2820_vm12, %v5569_v54  ;;  %8630 = vmatprep.mubr.msk.f32.mxu0 %vm2820_vm12, %v10264_v1  ;;  %v5715_v52 = vrot.slane %v10264_v1, 1  ;;  %v5716_v13 = vrot.slane %v10266_v38, 1  ;;  %v5843_v19 = vrot.slane %v10264_v1, 2  ;;  %v5844_v25 = vrot.slane %v10266_v38, 2 }
 0x45d   :  { %8631 = vmatmul.mubr.msk.f32.vlgmr.msra.gmra.mxu0 %vm2820_vm12, %v10266_v38  ;;  %v10279_v21 = vld [vmem:[#allocation2 + $0x18] sm:$0xff]  ;;  %v5971_v46 = vrot.slane %v10264_v1, 3  ;;  %v5972_v47 = vrot.slane %v10266_v38, 3  ;;  %v6099_v32 = vrot.slane %v10264_v1, 4  ;;  %v6100_v34 = vrot.slane %v10266_v38, 4 }
 0x45e   :  { %8633 = vmatprep.mubr.msk.f32.mxu0 %vm2820_vm12, %v10261_v22  ;;  %8653 = vmatpush3.msk.msra.mxu0 %vm868_vm7, %v10240_v63  ;;  %v5717_v11 = vsel %vm204_vm3, %v5715_v52, %v5716_v13  ;;  %v10287_v60 = vsel %vm204_vm3, %v5716_v13, %v5718_v27  ;;  %v5720_v28 = vrot.slane %v10279_v21, 1  ;;  %v7407_v63 = vld [vmem:[%s10569_s9 + $0x30] sm:$0xff]  ;;  %v5848_v12 = vrot.slane %v10279_v21, 2 }
 0x45f   :  { %8643 = vmatprep.mubr.msk.f32.mxu1 %vm2820_vm12, %v5717_v11  ;;  %8654 = vmatprep.subr.mxu0 %v7398_v8  ;;  %v10345_v5 = vsel %vm337_vm4, %v5844_v25, %v5846_v16  ;;  %v5973_v4 = vsel %vm94_vm0, %v5971_v46, %v5972_v47  ;;  %v5976_v15 = vrot.slane %v10279_v21, 3  ;;  %v5975_v35 = vsel %vm94_vm0, %v5972_v47, %v5974_v43 }
 0x460   :  { %8644 = vmatmul.mubr.msk.f32.vlgmr.msra.gmra.mxu1 %vm2820_vm12, %v10287_v60  ;;  %v10297_v48 = vsel %vm204_vm3, %v5718_v27, %v5720_v28  ;;  %8655 = vmatpush3.msra.mxu0 %v7398_v8  ;;  %v10354_v44 = vsel %vm337_vm4, %v5846_v16, %v5848_v12  ;;  %v6101_v24 = vsel %vm602_vm5, %v6099_v32, %v6100_v34  ;;  %v6104_v23 = vrot.slane %v10279_v21, 4 }
 0x461   :  { %8634 = vmatmul.mubr.msk.f32.gmra.mxu0 %vm2820_vm12, %v10279_v21  ;;  %8646 = vmatprep.mubr.msk.f32.mxu1 %vm2820_vm12, %v10297_v48  ;;  %v5977_v26 = vsel %vm94_vm0, %v5974_v43, %v5976_v15  ;;  %v6227_v56 = vrot.slane %v10264_v1, 5  ;;  %v6228_v36 = vrot.slane %v10266_v38, 5  ;;  %v6103_v40 = vsel %vm602_vm5, %v6100_v34, %v6102_v45 }
 0x462   :  { %8666 = vmatpush3.msk.msra.mxu1 %vm868_vm7, %v10251_v30  ;;  %8678 = vmatprep.subr.msk.mxu0 %vm868_vm7, %v7417_v9  ;;  %v5845_v30 = vsel %vm337_vm4, %v5843_v19, %v5844_v25  ;;  %v6105_v59 = vsel %vm602_vm5, %v6102_v45, %v6104_v23  ;;  %v6232_v18 = vrot.slane %v10279_v21, 5  ;;  %v6230_v54 = vrot.slane %v10261_v22, 5  ;;  %v7462_v19 = vld [vmem:[%s10569_s9 + $0x98] sm:$0x3] }
 0x463   :  { %v10314_v53 = vld [vmem:[#allocation2 + $0x20] sm:$0xff]  ;;  %v10316_v57 = vld [vmem:[#allocation2 + $0x28] sm:$0xff]  ;;  %8667 = vmatprep.subr.mxu1 %v7407_v63  ;;  %v6229_v14 = vsel %vm735_vm6, %v6227_v56, %v6228_v36  ;;  %v6355_v13 = vrot.slane %v10264_v1, 6  ;;  %v6356_v27 = vrot.slane %v10266_v38, 6  ;;  %v6484_v16 = vrot.slane %v10264_v1, 7 }
 0x464   :  { %8636 = vmatprep.mubr.msk.f32.mxu0 %vm2820_vm12, %v10314_v53  ;;  %v5722_v3 = vrot.slane %v10314_v53, 1  ;;  %v10322_v7 = vrot.slane %v10316_v57, 1  ;;  %8668 = vmatpush3.msra.mxu1 %v7407_v63  ;;  %v5850_v55 = vrot.slane %v10314_v53, 2  ;;  %v10357_v37 = vrot.slane %v10316_v57, 2 }
 0x465   :  { %8637 = vmatmul.mubr.msk.f32.gmra.mxu0 %vm2820_vm12, %v10316_v57  ;;  %8691 = vmatprep.subr.msk.mxu1 %vm868_vm7, %v7426_v31  ;;  %v5978_v51 = vrot.slane %v10314_v53, 3  ;;  %v5980_v49 = vrot.slane %v10316_v57, 3  ;;  %v6106_v58 = vrot.slane %v10314_v53, 4  ;;  %v6108_v17 = vrot.slane %v10316_v57, 4 }
 0x466   :  { %8656 = vmatprep.mubr.msk.f32.mxu0 %vm2820_vm12, %v5845_v30  ;;  %v10331_v29 = vsel %vm204_vm3, %v5720_v28, %v5722_v3  ;;  %v10335_v2 = vsel %vm204_vm3, %v5722_v3, %v10322_v7  ;;  %v10371_v50 = vsel %vm337_vm4, %v5848_v12, %v5850_v55  ;;  %v10378_v10 = vsel %vm337_vm4, %v5850_v55, %v10357_v37  ;;  %v7443_v28 = vld [vmem:[%s10569_s9 + $0x70] sm:$0xff] }
 0x467   :  { %8647 = vmatmul.mubr.msk.f32.gmra.mxu1 %vm2820_vm12, %v10331_v29  ;;  %v5979_v62 = vsel %vm94_vm0, %v5976_v15, %v5978_v51  ;;  %v5981_v61 = vsel %vm94_vm0, %v5978_v51, %v5980_v49  ;;  %v6107_v41 = vsel %vm602_vm5, %v6104_v23, %v6106_v58  ;;  %v6109_v52 = vsel %vm602_vm5, %v6106_v58, %v6108_v17 }
 0x468   :  { %8649 = vmatprep.mubr.msk.f32.mxu1 %vm2820_vm12, %v10335_v2  ;;  %v6231_v8 = vsel %vm735_vm6, %v6228_v36, %v6230_v54  ;;  %v6234_v11 = vrot.slane %v10314_v53, 5  ;;  %v6236_v63 = vrot.slane %v10316_v57, 5  ;;  %v6357_v25 = vsel %vm868_vm7, %v6355_v13, %v6356_v27 }
 0x469   :  { %8657 = vmatmul.mubr.msk.f32.vlgmr.msra.gmra.mxu0 %vm2820_vm12, %v10345_v5  ;;  %v6358_v30 = vrot.slane %v10261_v22, 6  ;;  %v6485_v46 = vrot.slane %v10266_v38, 7  ;;  %v6362_v55 = vrot.slane %v10314_v53, 6  ;;  %v6364_v1 = vrot.slane %v10316_v57, 6 }
 0x46a   :  { %8659 = vmatprep.mubr.msk.f32.mxu0 %vm2820_vm12, %v10354_v44  ;;  %8679 = vmatpush3.msk.msra.mxu0 %vm868_vm7, %v7417_v9  ;;  %v6233_v9 = vsel %vm735_vm6, %v6230_v54, %v6232_v18  ;;  %v6235_v3 = vsel %vm735_vm6, %v6232_v18, %v6234_v11  ;;  %v6237_v12 = vsel %vm735_vm6, %v6234_v11, %v6236_v63  ;;  %v6489_v43 = vrot.slane %v10279_v21, 7 }
 0x46b   :  { %8650 = vmatmul.mubr.msk.f32.gmra.mxu1 %vm2820_vm12, %v10322_v7  ;;  %8680 = vmatprep.subr.mxu0 %v7416_v33  ;;  %v6359_v47 = vsel %vm868_vm7, %v6356_v27, %v6358_v30  ;;  %v6486_v15 = vsel %vm1002_vm8, %v6484_v16, %v6485_v46  ;;  %v6487_v34 = vrot.slane %v10261_v22, 7  ;;  %vm6949_vm0 = vcmask 23554  }
 0x46c   :  { %8669 = vmatprep.mubr.msk.f32.mxu1 %vm2820_vm12, %v5973_v4  ;;  %8681 = vmatpush3.msra.mxu0 %v7416_v33  ;;  %v7452_v33 = vld [vmem:[%s10569_s9 + $0x80] sm:$0xff]  ;;  %v7471_v4 = vld [vmem:[%s10569_s9 + $0xa8] sm:$0x3] }
 0x46d   :  { %8660 = vmatmul.mubr.msk.f32.gmra.mxu0 %vm2820_vm12, %v10371_v50  ;;  %8704 = vmatprep.subr.msk.mxu0 %vm868_vm7, %v7435_v39  ;;  %v6488_v51 = vsel %vm1002_vm8, %v6485_v46, %v6487_v34 }
 0x46e   :  { %8662 = vmatprep.mubr.msk.f32.mxu0 %vm2820_vm12, %v10378_v10 }
 0x46f   :  { %8670 = vmatmul.mubr.msk.f32.vlgmr.msra.gmra.mxu1 %vm2820_vm12, %v5975_v35  ;;  %v6365_v35 = vsel %vm868_vm7, %v6362_v55, %v6364_v1 }
 0x470   :  { %8672 = vmatprep.mubr.msk.f32.mxu1 %vm2820_vm12, %v5977_v26  ;;  %8692 = vmatpush3.msk.msra.mxu1 %vm868_vm7, %v7426_v31  ;;  %v6360_v31 = vrot.slane %v10279_v21, 6  ;;  %v7461_v26 = vld [vmem:[%s10569_s9 + $0x90] sm:$0xff] }
 0x471   :  { %8663 = vmatmul.mubr.msk.f32.gmra.mxu0 %vm2820_vm12, %v10357_v37  ;;  %8693 = vmatprep.subr.mxu1 %v7425_v0 }
 0x472   :  { %8682 = vmatprep.mubr.msk.f32.mxu0 %vm2820_vm12, %v6101_v24  ;;  %8694 = vmatpush3.msra.mxu1 %v7425_v0  ;;  %v6363_v32 = vsel %vm868_vm7, %v6360_v31, %v6362_v55  ;;  %v6491_v0 = vrot.slane %v10314_v53, 7  ;;  %v5582_v24 = vld [vmem:[#allocation2 + $0x30] sm:$0xf] }
 0x473   :  { %8673 = vmatmul.mubr.msk.f32.gmra.mxu1 %vm2820_vm12, %v5979_v62  ;;  %8717 = vmatprep.subr.msk.mxu1 %vm868_vm7, %v7444_v42  ;;  %v6495_v62 = vrot.slane %v5582_v24, 7 }
 0x474   :  { %8675 = vmatprep.mubr.msk.f32.mxu1 %vm2820_vm12, %v5981_v61  ;;  %v6492_v23 = vsel %vm1002_vm8, %v6489_v43, %v6491_v0  ;;  %v7470_v61 = vld [vmem:[%s10569_s9 + $0xa0] sm:$0xff] }
 0x475   :  { %8683 = vmatmul.mubr.msk.f32.vlgmr.msra.gmra.mxu0 %vm2820_vm12, %v6103_v40 }
 0x476   :  { %8685 = vmatprep.mubr.msk.f32.mxu0 %vm2820_vm12, %v6105_v59  ;;  %8705 = vmatpush3.msk.msra.mxu0 %vm868_vm7, %v7435_v39  ;;  %v6361_v39 = vsel %vm868_vm7, %v6358_v30, %v6360_v31 }
 0x477   :  { %8676 = vmatmul.mubr.msk.f32.gmra.mxu1 %vm2820_vm12, %v5980_v49  ;;  %8706 = vmatprep.subr.mxu0 %v7434_v20  ;;  %v6490_v49 = vsel %vm1002_vm8, %v6487_v34, %v6489_v43 }
 0x478   :  { %8695 = vmatprep.mubr.msk.f32.mxu1 %vm2820_vm12, %v6229_v14  ;;  %8707 = vmatpush3.msra.mxu0 %v7434_v20 }
 0x479   :  { %8686 = vmatmul.mubr.msk.f32.gmra.mxu0 %vm2820_vm12, %v6107_v41  ;;  %8730 = vmatprep.subr.msk.mxu0 %vm868_vm7, %v7453_v6 }
 0x47a   :  { %8688 = vmatprep.mubr.msk.f32.mxu0 %vm2820_vm12, %v6109_v52 }
 0x47b   :  { %8696 = vmatmul.mubr.msk.f32.vlgmr.msra.gmra.mxu1 %vm2820_vm12, %v6231_v8 }
 0x47c   :  { %8698 = vmatprep.mubr.msk.f32.mxu1 %vm2820_vm12, %v6233_v9  ;;  %8718 = vmatpush3.msk.msra.mxu1 %vm868_vm7, %v7444_v42  ;;  %v6493_v42 = vrot.slane %v10316_v57, 7 }
 0x47d   :  { %8689 = vmatmul.mubr.msk.f32.gmra.mxu0 %vm2820_vm12, %v6108_v17  ;;  %8719 = vmatprep.subr.mxu1 %v7443_v28 }
 0x47e   :  { %8708 = vmatprep.mubr.msk.f32.mxu0 %vm2820_vm12, %v6357_v25  ;;  %8720 = vmatpush3.msra.mxu1 %v7443_v28  ;;  %v6494_v45 = vsel %vm1002_vm8, %v6491_v0, %v6493_v42 }
 0x47f   :  { %8699 = vmatmul.mubr.msk.f32.gmra.mxu1 %vm2820_vm12, %v6235_v3  ;;  %8743 = vmatprep.subr.msk.mxu1 %vm868_vm7, %v7462_v19  ;;  %v7381_v3 = vld [vmem:[%s10571_s10] ss:$0 sm:$0xff] }
 0x480   :  { %8701 = vmatprep.mubr.msk.f32.mxu1 %vm2820_vm12, %v6237_v12 }
 0x481   :  { %8709 = vmatmul.mubr.msk.f32.vlgmr.msra.gmra.mxu0 %vm2820_vm12, %v6359_v47 }
 0x482   :  { %8711 = vmatprep.mubr.msk.f32.mxu0 %vm2820_vm12, %v6361_v39  ;;  %8731 = vmatpush3.msk.msra.mxu0 %vm868_vm7, %v7453_v6 }
 0x483   :  { %8702 = vmatmul.mubr.msk.f32.gmra.mxu1 %vm2820_vm12, %v6236_v63  ;;  %8732 = vmatprep.subr.mxu0 %v7452_v33 }
 0x484   :  { %8721 = vmatprep.mubr.msk.f32.mxu1 %vm2820_vm12, %v6486_v15  ;;  %8733 = vmatpush3.msra.mxu0 %v7452_v33 }
 0x485   :  { %8712 = vmatmul.mubr.msk.f32.gmra.mxu0 %vm2820_vm12, %v6363_v32  ;;  %8756 = vmatprep.subr.msk.mxu0 %vm868_vm7, %v7471_v4 }
 0x486   :  { %8714 = vmatprep.mubr.msk.f32.mxu0 %vm2820_vm12, %v6365_v35 }
 0x487   :  { %8722 = vmatmul.mubr.msk.f32.vlgmr.msra.gmra.mxu1 %vm2820_vm12, %v6488_v51 }
 0x488   :  { %8724 = vmatprep.mubr.msk.f32.mxu1 %vm2820_vm12, %v6490_v49  ;;  %8744 = vmatpush3.msk.msra.mxu1 %vm868_vm7, %v7462_v19 }
 0x489   :  { %8715 = vmatmul.mubr.msk.f32.gmra.mxu0 %vm2820_vm12, %v6364_v1  ;;  %8745 = vmatprep.subr.mxu1 %v7461_v26 }
 0x48a   :  { %8734 = vmatprep.mubr.msk.f32.mxu0 %vm2820_vm12, %v10266_v38  ;;  %8746 = vmatpush3.msra.mxu1 %v7461_v26  ;;  %v6496_v38 = vsel %vm1002_vm8, %v6493_v42, %v6495_v62 }
 0x48b   :  { %8725 = vmatmul.mubr.msk.f32.gmra.mxu1 %vm2820_vm12, %v6492_v23 }
 0x48c   :  { %8727 = vmatprep.mubr.msk.f32.mxu1 %vm2820_vm12, %v6494_v45 }
 0x48d   :  { %8735 = vmatmul.mubr.msk.f32.vlgmr.msra.gmra.mxu0 %vm2820_vm12, %v10261_v22  ;;  %v6721_v22 = vrot.slane %v5582_v24, 1 }
 0x48e   :  { %8737 = vmatprep.mubr.msk.f32.mxu0 %vm2820_vm12, %v10279_v21  ;;  %8757 = vmatpush3.msk.msra.mxu0 %vm868_vm7, %v7471_v4 }
 0x48f   :  { %8728 = vmatmul.mubr.msk.f32.gmra.mxu1 %vm2820_vm12, %v6496_v38  ;;  %8758 = vmatprep.subr.mxu0 %v7470_v61  ;;  %v6722_v21 = vsel %vm204_vm3, %v10322_v7, %v6721_v22 }
 0x490   :  { %8747 = vmatprep.mubr.msk.f32.mxu1 %vm2820_vm12, %v10287_v60  ;;  %8759 = vmatpush3.msra.mxu0 %v7470_v61  ;;  %v6832_v60 = vrot.slane %v5582_v24, 2 }
 0x491   :  { %8738 = vmatmul.mubr.msk.f32.gmra.mxu0 %vm2820_vm12, %v10314_v53 }
 0x492   :  { %8740 = vmatprep.mubr.msk.f32.mxu0 %vm2820_vm12, %v10316_v57 }
 0x493   :  { %8748 = vmatmul.mubr.msk.f32.vlgmr.msra.gmra.mxu1 %vm2820_vm12, %v10297_v48  ;;  %v6833_v48 = vsel %vm337_vm4, %v10357_v37, %v6832_v60 }
 0x494   :  { %8750 = vmatprep.mubr.msk.f32.mxu1 %vm2820_vm12, %v10331_v29 }
 0x495   :  { %8741 = vmatmul.mubr.msk.f32.gmra.mxu0 %vm2820_vm12, %v5582_v24 }
 0x496   :  { %8760 = vmatprep.mubr.msk.f32.mxu0 %vm2820_vm12, %v10345_v5 }
 0x497   :  { %8751 = vmatmul.mubr.msk.f32.gmra.mxu1 %vm2820_vm12, %v10335_v2 }
 0x498   :  { %8753 = vmatprep.mubr.msk.f32.mxu1 %vm2820_vm12, %v6722_v21 }
 0x499   :  { %8761 = vmatmul.mubr.msk.f32.vlgmr.msra.gmra.mxu0 %vm2820_vm12, %v10354_v44 }
 0x49a   :  { %8763 = vmatprep.mubr.msk.f32.mxu0 %vm2820_vm12, %v10371_v50 }
 0x49b   :  { %8754 = vmatmul.mubr.msk.f32.gmra.mxu1 %vm2820_vm12, %v6721_v22 }
 0x49d   :  { %8764 = vmatmul.mubr.msk.f32.gmra.mxu0 %vm2820_vm12, %v10378_v10 }
 0x49e   :  { %8766 = vmatprep.mubr.msk.f32.mxu0 %vm2820_vm12, %v6833_v48 }
 0x4a1   :  { %8767 = vmatmul.mubr.msk.f32.gmra.mxu0 %vm2820_vm12, %v6832_v60 }
 0x51d   :  { %v8632_v53 = vpop.f32.mrf.mxu0 }
 0x51e   :  { %v5708_v47 = vadd.f32 %v8632_v53, %v7381_v3 }
 0x51f   :  { %v5679_v57 = vpop.f32.mrf.mxu0 }
 0x520   :  { %v8645_v7 = vpop.f32.mrf.mxu1  ;;  %v5707_v39 = vadd.f32 %v7381_v3, %v5679_v57 }
 0x521   :  { %v8635_v29 = vpop.f32.mrf.mxu0  ;;  %v5836_v15 = vadd.f32 %v8645_v7, %v5708_v47 }
 0x522   :  { %v5807_v5 = vpop.f32.mrf.mxu1  ;;  %v5709_v34 = vadd.f32 %v8635_v29, %v7381_v3 }
 0x523   :  { %v5689_v2 = vpop.f32.mrf.mxu0  ;;  %v5835_v35 = vadd.f32 %v5807_v5, %v5707_v39 }
 0x525   :  { %v8638_v44 = vpop.f32.mrf.mxu0 }
 0x526   :  { %v5711_v45 = vadd.f32 %v8638_v44, %v7381_v3 }
 0x527   :  { %v5698_v50 = vpop.f32.mrf.mxu0  ;;  %v8648_v56 = vpop.f32.mrf.mxu1 }
 0x528   :  { %v5837_v49 = vadd.f32 %v8648_v56, %v5709_v34  ;;  %v5710_v21 = vadd.f32 %v7381_v3, %v5698_v50 }
 0x529   :  { %v5817_v36 = vpop.f32.mrf.mxu1  ;;  %v8658_v40 = vpop.f32.mrf.mxu0 }
 0x52a   :  { %v5964_v51 = vadd.f32 %v8658_v40, %v5836_v15 }
 0x52b   :  { %v8651_v58 = vpop.f32.mrf.mxu1  ;;  %v5935_v10 = vpop.f32.mrf.mxu0 }
 0x52c   :  { %v5963_v42 = vadd.f32 %v5935_v10, %v5835_v35  ;;  %v5839_v53 = vadd.f32 %v8651_v58, %v5711_v45 }
 0x52d   :  { %v5826_v20 = vpop.f32.mrf.mxu1  ;;  %v8661_v59 = vpop.f32.mrf.mxu0 }
 0x52e   :  { %v5965_v61 = vadd.f32 %v8661_v59, %v5837_v49  ;;  %v5838_v2 = vadd.f32 %v5826_v20, %v5710_v21 }
 0x52f   :  { %v5945_v37 = vpop.f32.mrf.mxu0  ;;  %v8671_v17 = vpop.f32.mrf.mxu1 }
 0x530   :  { %v6092_v24 = vadd.f32 %v8671_v17, %v5964_v51 }
 0x531   :  { %v8664_v6 = vpop.f32.mrf.mxu0  ;;  %v6063_v14 = vpop.f32.mrf.mxu1 }
 0x532   :  { %v6091_v38 = vadd.f32 %v6063_v14, %v5963_v42  ;;  %v5967_v40 = vadd.f32 %v8664_v6, %v5839_v53 }
 0x533   :  { %v5954_v18 = vpop.f32.mrf.mxu0  ;;  %v8674_v41 = vpop.f32.mrf.mxu1 }
 0x534   :  { %v6093_v57 = vadd.f32 %v8674_v41, %v5965_v61  ;;  %v5966_v17 = vadd.f32 %v5954_v18, %v5838_v2 }
 0x535   :  { %v6073_v54 = vpop.f32.mrf.mxu1  ;;  %v8684_v52 = vpop.f32.mrf.mxu0 }
 0x536   :  { %v6220_v22 = vadd.f32 %v8684_v52, %v6092_v24 }
 0x537   :  { %v8677_v13 = vpop.f32.mrf.mxu1  ;;  %v6191_v27 = vpop.f32.mrf.mxu0 }
 0x538   :  { %v6219_v7 = vadd.f32 %v6191_v27, %v6091_v38  ;;  %v6095_v59 = vadd.f32 %v8677_v13, %v5967_v40 }
 0x539   :  { %v6082_v8 = vpop.f32.mrf.mxu1  ;;  %v8687_v11 = vpop.f32.mrf.mxu0 }
 0x53a   :  { %v6221_v56 = vadd.f32 %v8687_v11, %v6093_v57 }
 0x53b   :  { %v6201_v28 = vpop.f32.mrf.mxu0  ;;  %v8697_v9 = vpop.f32.mrf.mxu1 }
 0x53c   :  { %v6348_v29 = vadd.f32 %v8697_v9, %v6220_v22  ;;  %v6094_v28 = vadd.f32 %v6082_v8, %v5966_v17 }
 0x53d   :  { %v8690_v63 = vpop.f32.mrf.mxu0  ;;  %v6319_v19 = vpop.f32.mrf.mxu1 }
 0x53e   :  { %v6347_v10 = vadd.f32 %v6319_v19, %v6219_v7  ;;  %v6223_v41 = vadd.f32 %v8690_v63, %v6095_v59 }
 0x53f   :  { %v6210_v25 = vpop.f32.mrf.mxu0  ;;  %v8700_v31 = vpop.f32.mrf.mxu1 }
 0x540   :  { %v6349_v14 = vadd.f32 %v8700_v31, %v6221_v56 }
 0x541   :  { %v6329_v30 = vpop.f32.mrf.mxu1  ;;  %v8710_v12 = vpop.f32.mrf.mxu0 }
 0x542   :  { %v6476_v37 = vadd.f32 %v8710_v12, %v6348_v29  ;;  %v6222_v30 = vadd.f32 %v6210_v25, %v6094_v28 }
 0x543   :  { %v8703_v16 = vpop.f32.mrf.mxu1  ;;  %v6447_v46 = vpop.f32.mrf.mxu0 }
 0x544   :  { %v6475_v52 = vadd.f32 %v6447_v46, %v6347_v10  ;;  %v6351_v11 = vadd.f32 %v8703_v16, %v6223_v41 }
 0x545   :  { %v6338_v55 = vpop.f32.mrf.mxu1  ;;  %v8713_v33 = vpop.f32.mrf.mxu0 }
 0x546   :  { %v6477_v27 = vadd.f32 %v8713_v33, %v6349_v14  ;;  %v6350_v39 = vadd.f32 %v6338_v55, %v6222_v30 }
 0x547   :  { %v6457_v1 = vpop.f32.mrf.mxu0  ;;  %v8723_v4 = vpop.f32.mrf.mxu1 }
 0x548   :  { %v6607_v50 = vadd.f32 %v8723_v4, %v6476_v37 }
 0x549   :  { %v8716_v43 = vpop.f32.mrf.mxu0  ;;  %v6578_v32 = vpop.f32.mrf.mxu1 }
 0x54a   :  { %v6606_v9 = vadd.f32 %v6578_v32, %v6475_v52  ;;  %v6479_v31 = vadd.f32 %v8716_v43, %v6351_v11 }
 0x54b   :  { %v6466_v0 = vpop.f32.mrf.mxu0  ;;  %v8726_v26 = vpop.f32.mrf.mxu1 }
 0x54c   :  { %v6608_v19 = vadd.f32 %v8726_v26, %v6477_v27  ;;  %v6478_v15 = vadd.f32 %v6466_v0, %v6350_v39 }
 0x54d   :  { %v6588_v23 = vpop.f32.mrf.mxu1  ;;  %v8736_v62 = vpop.f32.mrf.mxu0 }
 0x54e   :  { %v6714_v20 = vadd.f32 %v8736_v62, %v6607_v50 }
 0x54f   :  { %v8729_v60 = vpop.f32.mrf.mxu1  ;;  %v6685_v48 = vpop.f32.mrf.mxu0 }
 0x550   :  { %v6713_v12 = vadd.f32 %v6685_v48, %v6606_v9  ;;  %v6610_v32 = vadd.f32 %v8729_v60, %v6479_v31 }
 0x551   :  { %v6597_v5 = vpop.f32.mrf.mxu1  ;;  %v8739_v36 = vpop.f32.mrf.mxu0 }
 0x552   :  { %v6715_v46 = vadd.f32 %v8739_v36, %v6608_v19  ;;  %v6609_v16 = vadd.f32 %v6597_v5, %v6478_v15 }
 0x553   :  { %v6695_v54 = vpop.f32.mrf.mxu0  ;;  %v8749_v44 = vpop.f32.mrf.mxu1 }
 0x554   :  { %v6825_v18 = vadd.f32 %v8749_v44, %v6714_v20 }
 0x555   :  { %v8742_v3 = vpop.f32.mrf.mxu0  ;;  %v6796_v58 = vpop.f32.mrf.mxu1 }
 0x556   :  { %v6824_v4 = vadd.f32 %v6796_v58, %v6713_v12  ;;  %v6717_v26 = vadd.f32 %v8742_v3, %v6610_v32 }
 0x557   :  { %v6704_v47 = vpop.f32.mrf.mxu0  ;;  %v8752_v6 = vpop.f32.mrf.mxu1 }
 0x558   :  { %v6826_v34 = vadd.f32 %v8752_v6, %v6715_v46  ;;  %v6716_v42 = vadd.f32 %v6704_v47, %v6609_v16 }
 0x559   :  { %v6806_v1 = vpop.f32.mrf.mxu1  ;;  %v8762_v13 = vpop.f32.mrf.mxu0 }
 0x55a   :  { %v6936_v8 = vadd.f32 %v8762_v13, %v6825_v18 }
 0x55b   :  { %v8755_v63 = vpop.f32.mrf.mxu1  ;;  %v6907_v33 = vpop.f32.mrf.mxu0 }
 0x55c   :  { %v6941_v25 = vmax.f32 %v6936_v8, 0.0  ;;  %v6935_v35 = vadd.f32 %v6907_v33, %v6824_v4  ;;  %v6828_v24 = vadd.f32 %v8755_v63, %v6717_v26 }
 0x55d   :  { %v8765_v51 = vpop.f32.mrf.mxu0  ;;  %v6815_v49 = vpop.f32.mrf.mxu1 }
 0x55e   :  { %6947 = vst.msk [vmem:[%s10572_s11 + $0x8] sm:$0xff] %vm6945_vm15, %v6941_v25  ;;  %v6940_v55 = vmax.f32 %v6935_v35, 0.0  ;;  %v6937_v43 = vadd.f32 %v8765_v51, %v6826_v34  ;;  %v6827_v45 = vadd.f32 %v6815_v49, %v6716_v42 }
 0x55f   :  { %v6917_v0 = vpop.f32.mrf.mxu0 }
 0x560   :  { %6946 = vst.msk [vmem:[%s10572_s11] sm:$0xff] %vm6945_vm15, %v6940_v55  ;;  %v6942_v23 = vmax.f32 %v6937_v43, 0.0 }
 0x561   :  { %v8768_v62 = vpop.f32.mrf.mxu0 }
 0x562   :  { %7479 = vst.msk [vmem:[%s10572_s11 + $0xe] sm:$0xfc] %vm6949_vm0, %v6942_v23  ;;  %v6939_v61 = vadd.f32 %v8768_v62, %v6828_v24 }
 0x563   :  { %v6926_v38 = vpop.f32.mrf.mxu0 }
 0x564   :  { %v6944_v22 = vmax.f32 %v6939_v61, 0.0  ;;  %v6938_v21 = vadd.f32 %v6926_v38, %v6827_v45 }
 0x566   :  { %7481 = vst.msk [vmem:[%s10572_s11 + $0x1e] sm:$0x3] %vm6952_vm1, %v6944_v22  ;;  %v6943_v60 = vmax.f32 %v6938_v21, 0.0 }
 0x568   :  { %7480 = vst.msk [vmem:[%s10572_s11 + $0x16] sm:$0xff] %vm6945_vm15, %v6943_v60 }

</bundles_post_ra>
